<compile_context>
chip_gen: v6e
topology: v6e:2x2x1
jax: 0.10.0
libtpu: 0.0.40
codegen_flags: <defaults>
</compile_context>

<pallas_src>
import functools

import jax
import jax.numpy as jnp
from jax.experimental import pallas as pl
from jax.experimental.pallas import tpu as pltpu


def _vmem_limit_bytes():
    """Per-generation VMEM budget (v7x: 64 MiB/TC; v5e/v6e: 128 MiB)."""
    try:
        cap = int(pltpu.get_tpu_info().vmem_capacity_bytes)
        return int(min(max(cap * 3 // 4, 32 * 1024 * 1024), 96 * 1024 * 1024))
    except Exception:
        return 48 * 1024 * 1024  # safe on every generation


def _conv_leaky(x_ref, w_ref, *, wp, cin, hw2):
    """3x3 conv (pad=1) + LeakyReLU(0.1) for one image, channel-major.

    x_ref: (1, Cin, PL)   flattened zero-padded image, PL >= (H+2)*Wp + 2
    w_ref: (CP, 9*Cin)    conv weights, tap-major lanes, channel-padded rows
    returns act_t: (CP, HW2) f32 with HW2 = H*Wp columns (pad columns garbage)
    """
    x = x_ref[0]                                          # (Cin, PL)
    cp = w_ref.shape[0]
    acc = jnp.zeros((cp, hw2), dtype=jnp.float32)
    t = 0
    for dy in range(3):
        for dx in range(3):
            shift = dy * wp + dx                          # static offset
            x_tap = x[:, shift:shift + hw2]               # (Cin, HW2)
            w_tap = w_ref[:, t * cin:(t + 1) * cin]       # (CP, Cin)
            acc = acc + jnp.dot(w_tap, x_tap,
                                preferred_element_type=jnp.float32)
            t += 1
    return jnp.where(acc > 0, acc, 0.1 * acc)             # LeakyReLU(0.1), f32


def _stats_kernel(x_ref, w_ref, mask_ref, psum_ref, psumsq_ref, *, wp, cin, hw2):
    """Pass 1: per-image BN partial sums (no activation is written to HBM)."""
    act = _conv_leaky(x_ref, w_ref, wp=wp, cin=cin, hw2=hw2)   # (CP, HW2) f32
    m = act * mask_ref[...]                  # zero out the pad columns (w' >= W)
    psum_ref[0] = jnp.sum(m, axis=1, keepdims=True)            # (CP, 1)
    psumsq_ref[0] = jnp.sum(m * m, axis=1, keepdims=True)      # (CP, 1)


def _apply_kernel(x_ref, w_ref, scale_ref, shift_ref, out_ref, *, wp, cin, hw2, cout):
    """Pass 2: recompute conv+LeakyReLU (cheap, K=9*Cin), apply folded BN."""
    act = _conv_leaky(x_ref, w_ref, wp=wp, cin=cin, hw2=hw2)   # (CP, HW2) f32
    y = act * scale_ref[...] + shift_ref[...]                  # per-channel FMA
    out_ref[0] = y[:cout, :]                                   # (Cout, HW2)


def one_node_forward(x_nchw, conv_w, bn_gamma, bn_beta, *, use_bf16_matmul=False):
    """x_nchw: (N, Cin, H, W); conv_w: (Cout, Cin, 3, 3) as in PyTorch."""
    N, Cin, H, W = x_nchw.shape
    Cout = conv_w.shape[0]
    Wp = W + 2                        # padded width
    P2 = (H + 2) * Wp                 # flattened padded pixels per image
    HW2 = H * Wp                      # output columns per image (incl. pad cols)
    PL = P2 + 8                       # lane pad so all 9 shifted slices are in-bounds
    K = 9 * Cin
    CP = ((Cout + 127) // 128) * 128  # channel rows padded to a sublane-friendly 128
    M = N * H * W                     # true pixel count for BN statistics

    # TODO(synk): tile rows (with a 1-row halo) inside an image if
    # CP * H*(W+2) * 4 bytes outgrows the per-generation VMEM budget.

    # Compact padded input, flattened spatial dims (no 9x im2col blowup in HBM).
    xp = jnp.pad(x_nchw.astype(jnp.float32), ((0, 0), (0, 0), (1, 1), (1, 1)))
    x_flat = jnp.pad(xp.reshape(N, Cin, P2), ((0, 0), (0, 0), (0, PL - P2)))

    # Weights: (Cout, Cin, 3, 3) -> (Cout, 3, 3, Cin) -> (Cout, 9*Cin) -> (CP, 9*Cin)
    w_t = jnp.transpose(conv_w.astype(jnp.float32), (0, 2, 3, 1)).reshape(Cout, K)
    w_t = jnp.pad(w_t, ((0, CP - Cout), (0, 0)))

    if use_bf16_matmul:
        # bf16 MXU inputs, f32 accumulation — worthwhile on v5e/v6e/v7x alike.
        x_mm = x_flat.astype(jnp.bfloat16)
        w_mm = w_t.astype(jnp.bfloat16)
    else:
        x_mm, w_mm = x_flat, w_t

    # Valid-column mask (1, HW2): 1.0 where the flattened column is a real pixel.
    col = jnp.arange(HW2, dtype=jnp.int32) % Wp
    mask = (col < W).astype(jnp.float32).reshape(1, HW2)

    cparams = pltpu.CompilerParams(
        dimension_semantics=("parallel",),   # one image per step; shards across v7x TCs
        vmem_limit_bytes=_vmem_limit_bytes())

    # ---- pass 1: per-image BN partial sums (sum, sum of squares) --------------
    psum, psumsq = pl.pallas_call(
        functools.partial(_stats_kernel, wp=Wp, cin=Cin, hw2=HW2),
        out_shape=(jax.ShapeDtypeStruct((N, CP, 1), jnp.float32),
                   jax.ShapeDtypeStruct((N, CP, 1), jnp.float32)),
        grid=(N,),
        in_specs=[
            pl.BlockSpec((1, Cin, PL), lambda n: (n, 0, 0)),
            pl.BlockSpec((CP, K), lambda n: (0, 0)),
            pl.BlockSpec((1, HW2), lambda n: (0, 0)),
        ],
        out_specs=(pl.BlockSpec((1, CP, 1), lambda n: (n, 0, 0)),
                   pl.BlockSpec((1, CP, 1), lambda n: (n, 0, 0))),
        compiler_params=cparams,
    )(x_mm, w_mm, mask)

    # ---- fold BN into one per-channel scale/shift (tiny arrays, plain XLA) -----
    # TODO(synk): for very large M use per-block mean-subtracted partials
    # (Chan/Welford combine) instead of E[x^2]-E[x]^2 to avoid f32 cancellation.
    count = jnp.float32(M)
    s = jnp.sum(psum[:, :, 0], axis=0)                       # (CP,)
    ss = jnp.sum(psumsq[:, :, 0], axis=0)                    # (CP,)
    mean = s / count
    var = jnp.maximum(ss / count - mean * mean, 0.0)         # biased variance
    inv_std = jax.lax.rsqrt(var + 1e-5)
    gamma = jnp.zeros((CP,), jnp.float32).at[:Cout].set(bn_gamma.astype(jnp.float32))
    beta = jnp.zeros((CP,), jnp.float32).at[:Cout].set(bn_beta.astype(jnp.float32))
    scale = (gamma * inv_std).reshape(CP, 1)
    shift = (beta - mean * gamma * inv_std).reshape(CP, 1)

    # ---- pass 2: recompute conv+LeakyReLU, apply folded BN, channel-major out --
    out3 = pl.pallas_call(
        functools.partial(_apply_kernel, wp=Wp, cin=Cin, hw2=HW2, cout=Cout),
        out_shape=jax.ShapeDtypeStruct((N, Cout, HW2), jnp.float32),
        grid=(N,),
        in_specs=[
            pl.BlockSpec((1, Cin, PL), lambda n: (n, 0, 0)),
            pl.BlockSpec((CP, K), lambda n: (0, 0)),
            pl.BlockSpec((CP, 1), lambda n: (0, 0)),
            pl.BlockSpec((CP, 1), lambda n: (0, 0)),
        ],
        out_specs=pl.BlockSpec((1, Cout, HW2), lambda n: (n, 0, 0)),
        compiler_params=cparams,
    )(x_mm, w_mm, scale, shift)

    # Drop the pad columns: (N, Cout, H, Wp)[..., :W] is already NCHW.  Only a
    # Cout-wide slice; the reshape is a free metadata change (contiguous layout).
    return out3.reshape(N, Cout, H, Wp)[:, :, :, :W]


def _reference(x_nchw, conv_w, bn_gamma, bn_beta):
    """Pure-JAX reference matching PyTorch semantics (training-mode BN)."""
    out = jax.lax.conv_general_dilated(
        x_nchw.astype(jnp.float32), conv_w.astype(jnp.float32),
        window_strides=(1, 1), padding=((1, 1), (1, 1)),
        dimension_numbers=("NCHW", "OIHW", "NCHW"))
    out = jnp.where(out > 0, out, 0.1 * out)
    mean = jnp.mean(out, axis=(0, 2, 3), keepdims=True)
    var = jnp.mean((out - mean) ** 2, axis=(0, 2, 3), keepdims=True)
    out = (out - mean) * jax.lax.rsqrt(var + 1e-5)
    out = out * bn_gamma.reshape(1, -1, 1, 1) + bn_beta.reshape(1, -1, 1, 1)
    return out


if __name__ == "__main__":
    key = jax.random.PRNGKey(0)
    k_x, k_w, k_g, k_b = jax.random.split(key, 4)

    N, Cin, Cout, H, W = 2, 4, 8, 16, 16

    x = jax.random.normal(k_x, (N, Cin, H, W), dtype=jnp.float32)
    # Deterministic synthetic parameters (not a checkpoint load).
    conv_w = jax.random.normal(k_w, (Cout, Cin, 3, 3), dtype=jnp.float32) * 0.1
    bn_gamma = 1.0 + 0.1 * jax.random.normal(k_g, (Cout,), dtype=jnp.float32)
    bn_beta = 0.1 * jax.random.normal(k_b, (Cout,), dtype=jnp.float32)

    fwd = jax.jit(one_node_forward, static_argnames=("use_bf16_matmul",))

    out = jax.block_until_ready(fwd(x, conv_w, bn_gamma, bn_beta))
    ref = jax.block_until_ready(_reference(x, conv_w, bn_gamma, bn_beta))
    assert out.shape == (N, Cout, H, W)
    assert jnp.max(jnp.abs(out - ref)) < 1e-3, "mismatch vs reference (f32 path)"

    # bf16 MXU-input path (f32 accumulation); looser tolerance for bf16 inputs.
    out_bf16 = jax.block_until_ready(
        fwd(x, conv_w, bn_gamma, bn_beta, use_bf16_matmul=True))
    assert jnp.max(jnp.abs(out_bf16 - ref)) < 5e-2, "mismatch vs reference (bf16 path)"

    print("KERNEL_OK")
</pallas_src>

<mosaic_0001>
module attributes {stable_mosaic.version = 11 : i64} {
  func.func @_stats_kernel(%arg0: i32, %arg1: memref<1x4x332xf32, #tpu.memory_space<vmem>>, %arg2: memref<128x36xf32, #tpu.memory_space<vmem>>, %arg3: memref<1x288xf32, #tpu.memory_space<vmem>>, %arg4: memref<1x128x1xf32, #tpu.memory_space<vmem>>, %arg5: memref<1x128x1xf32, #tpu.memory_space<vmem>>) attributes {dimension_semantics = [#tpu.dimension_semantics<parallel>], iteration_bounds = array<i64: 2>, scalar_prefetch = 0 : i64, scratch_operands = 0 : i64, tpu.core_type = #tpu.core_type<tc>, window_params = [{transform_indices = @transform_0, window_bounds = array<i64: 1, 4, 332>}, {pipeline_mode = #tpu.pipeline_mode<synchronous>, transform_indices = @transform_1, window_bounds = array<i64: 128, 36>}, {pipeline_mode = #tpu.pipeline_mode<synchronous>, transform_indices = @transform_2, window_bounds = array<i64: 1, 288>}, {transform_indices = @transform_3, window_bounds = array<i64: 1, 128, 1>}, {transform_indices = @transform_4, window_bounds = array<i64: 1, 128, 1>}]} {
    %c0 = arith.constant 0 : index
    %c0_0 = arith.constant 0 : index
    %c0_1 = arith.constant 0 : index
    %0 = vector.load %arg1[%c0, %c0_0, %c0_1] : memref<1x4x332xf32, #tpu.memory_space<vmem>>, vector<1x4x332xf32>
    %1 = vector.shape_cast %0 : vector<1x4x332xf32> to vector<4x332xf32>
    %cst = arith.constant 0.000000e+00 : f32
    %2 = vector.broadcast %cst : f32 to vector<128x288xf32>
    %3 = vector.extract_strided_slice %1 {offsets = [0, 0], sizes = [4, 288], strides = [1, 1]} : vector<4x332xf32> to vector<4x288xf32>
    %c0_2 = arith.constant 0 : index
    %c0_3 = arith.constant 0 : index
    %4 = vector.load %arg2[%c0_2, %c0_3] : memref<128x36xf32, #tpu.memory_space<vmem>>, vector<128x4xf32>
    %cst_4 = arith.constant dense<0.000000e+00> : vector<128x288xf32>
    %5 = tpu.matmul %4, %3, %cst_4 {dimension_numbers = #tpu.dot_dimension_numbers<[1], [0], [0], [1], [0, 0, 1, 1], [], []>} : vector<128x4xf32>, vector<4x288xf32>, vector<128x288xf32> -> vector<128x288xf32>
    %6 = arith.addf %2, %5 : vector<128x288xf32>
    %7 = vector.extract_strided_slice %1 {offsets = [0, 1], sizes = [4, 288], strides = [1, 1]} : vector<4x332xf32> to vector<4x288xf32>
    %c0_5 = arith.constant 0 : index
    %c4 = arith.constant 4 : index
    %8 = vector.load %arg2[%c0_5, %c4] : memref<128x36xf32, #tpu.memory_space<vmem>>, vector<128x4xf32>
    %cst_6 = arith.constant dense<0.000000e+00> : vector<128x288xf32>
    %9 = tpu.matmul %8, %7, %cst_6 {dimension_numbers = #tpu.dot_dimension_numbers<[1], [0], [0], [1], [0, 0, 1, 1], [], []>} : vector<128x4xf32>, vector<4x288xf32>, vector<128x288xf32> -> vector<128x288xf32>
    %10 = arith.addf %6, %9 : vector<128x288xf32>
    %11 = vector.extract_strided_slice %1 {offsets = [0, 2], sizes = [4, 288], strides = [1, 1]} : vector<4x332xf32> to vector<4x288xf32>
    %c0_7 = arith.constant 0 : index
    %c8 = arith.constant 8 : index
    %12 = vector.load %arg2[%c0_7, %c8] : memref<128x36xf32, #tpu.memory_space<vmem>>, vector<128x4xf32>
    %cst_8 = arith.constant dense<0.000000e+00> : vector<128x288xf32>
    %13 = tpu.matmul %12, %11, %cst_8 {dimension_numbers = #tpu.dot_dimension_numbers<[1], [0], [0], [1], [0, 0, 1, 1], [], []>} : vector<128x4xf32>, vector<4x288xf32>, vector<128x288xf32> -> vector<128x288xf32>
    %14 = arith.addf %10, %13 : vector<128x288xf32>
    %15 = vector.extract_strided_slice %1 {offsets = [0, 18], sizes = [4, 288], strides = [1, 1]} : vector<4x332xf32> to vector<4x288xf32>
    %c0_9 = arith.constant 0 : index
    %c12 = arith.constant 12 : index
    %16 = vector.load %arg2[%c0_9, %c12] : memref<128x36xf32, #tpu.memory_space<vmem>>, vector<128x4xf32>
    %cst_10 = arith.constant dense<0.000000e+00> : vector<128x288xf32>
    %17 = tpu.matmul %16, %15, %cst_10 {dimension_numbers = #tpu.dot_dimension_numbers<[1], [0], [0], [1], [0, 0, 1, 1], [], []>} : vector<128x4xf32>, vector<4x288xf32>, vector<128x288xf32> -> vector<128x288xf32>
    %18 = arith.addf %14, %17 : vector<128x288xf32>
    %19 = vector.extract_strided_slice %1 {offsets = [0, 19], sizes = [4, 288], strides = [1, 1]} : vector<4x332xf32> to vector<4x288xf32>
    %c0_11 = arith.constant 0 : index
    %c16 = arith.constant 16 : index
    %20 = vector.load %arg2[%c0_11, %c16] : memref<128x36xf32, #tpu.memory_space<vmem>>, vector<128x4xf32>
    %cst_12 = arith.constant dense<0.000000e+00> : vector<128x288xf32>
    %21 = tpu.matmul %20, %19, %cst_12 {dimension_numbers = #tpu.dot_dimension_numbers<[1], [0], [0], [1], [0, 0, 1, 1], [], []>} : vector<128x4xf32>, vector<4x288xf32>, vector<128x288xf32> -> vector<128x288xf32>
    %22 = arith.addf %18, %21 : vector<128x288xf32>
    %23 = vector.extract_strided_slice %1 {offsets = [0, 20], sizes = [4, 288], strides = [1, 1]} : vector<4x332xf32> to vector<4x288xf32>
    %c0_13 = arith.constant 0 : index
    %c20 = arith.constant 20 : index
    %24 = vector.load %arg2[%c0_13, %c20] : memref<128x36xf32, #tpu.memory_space<vmem>>, vector<128x4xf32>
    %cst_14 = arith.constant dense<0.000000e+00> : vector<128x288xf32>
    %25 = tpu.matmul %24, %23, %cst_14 {dimension_numbers = #tpu.dot_dimension_numbers<[1], [0], [0], [1], [0, 0, 1, 1], [], []>} : vector<128x4xf32>, vector<4x288xf32>, vector<128x288xf32> -> vector<128x288xf32>
    %26 = arith.addf %22, %25 : vector<128x288xf32>
    %27 = vector.extract_strided_slice %1 {offsets = [0, 36], sizes = [4, 288], strides = [1, 1]} : vector<4x332xf32> to vector<4x288xf32>
    %c0_15 = arith.constant 0 : index
    %c24 = arith.constant 24 : index
    %28 = vector.load %arg2[%c0_15, %c24] : memref<128x36xf32, #tpu.memory_space<vmem>>, vector<128x4xf32>
    %cst_16 = arith.constant dense<0.000000e+00> : vector<128x288xf32>
    %29 = tpu.matmul %28, %27, %cst_16 {dimension_numbers = #tpu.dot_dimension_numbers<[1], [0], [0], [1], [0, 0, 1, 1], [], []>} : vector<128x4xf32>, vector<4x288xf32>, vector<128x288xf32> -> vector<128x288xf32>
    %30 = arith.addf %26, %29 : vector<128x288xf32>
    %31 = vector.extract_strided_slice %1 {offsets = [0, 37], sizes = [4, 288], strides = [1, 1]} : vector<4x332xf32> to vector<4x288xf32>
    %c0_17 = arith.constant 0 : index
    %c28 = arith.constant 28 : index
    %32 = vector.load %arg2[%c0_17, %c28] : memref<128x36xf32, #tpu.memory_space<vmem>>, vector<128x4xf32>
    %cst_18 = arith.constant dense<0.000000e+00> : vector<128x288xf32>
    %33 = tpu.matmul %32, %31, %cst_18 {dimension_numbers = #tpu.dot_dimension_numbers<[1], [0], [0], [1], [0, 0, 1, 1], [], []>} : vector<128x4xf32>, vector<4x288xf32>, vector<128x288xf32> -> vector<128x288xf32>
    %34 = arith.addf %30, %33 : vector<128x288xf32>
    %35 = vector.extract_strided_slice %1 {offsets = [0, 38], sizes = [4, 288], strides = [1, 1]} : vector<4x332xf32> to vector<4x288xf32>
    %c0_19 = arith.constant 0 : index
    %c32 = arith.constant 32 : index
    %36 = vector.load %arg2[%c0_19, %c32] : memref<128x36xf32, #tpu.memory_space<vmem>>, vector<128x4xf32>
    %cst_20 = arith.constant dense<0.000000e+00> : vector<128x288xf32>
    %37 = tpu.matmul %36, %35, %cst_20 {dimension_numbers = #tpu.dot_dimension_numbers<[1], [0], [0], [1], [0, 0, 1, 1], [], []>} : vector<128x4xf32>, vector<4x288xf32>, vector<128x288xf32> -> vector<128x288xf32>
    %38 = arith.addf %34, %37 : vector<128x288xf32>
    %cst_21 = arith.constant 0.000000e+00 : f32
    %39 = vector.broadcast %cst_21 : f32 to vector<128x288xf32>
    %40 = arith.cmpf ogt, %38, %39 : vector<128x288xf32>
    %cst_22 = arith.constant 1.000000e-01 : f32
    %41 = vector.broadcast %cst_22 : f32 to vector<128x288xf32>
    %42 = arith.mulf %41, %38 : vector<128x288xf32>
    %43 = arith.select %40, %38, %42 : vector<128x288xi1>, vector<128x288xf32>
    %c0_23 = arith.constant 0 : index
    %c0_24 = arith.constant 0 : index
    %44 = vector.load %arg3[%c0_23, %c0_24] : memref<1x288xf32, #tpu.memory_space<vmem>>, vector<1x288xf32>
    %45 = vector.broadcast %44 : vector<1x288xf32> to vector<128x288xf32>
    %46 = arith.mulf %43, %45 : vector<128x288xf32>
    %cst_25 = arith.constant dense<0.000000e+00> : vector<128xf32>
    %47 = vector.multi_reduction <add>, %46, %cst_25 [1] : vector<128x288xf32> to vector<128xf32>
    %48 = vector.shape_cast %47 : vector<128xf32> to vector<128x1xf32>
    %c0_26 = arith.constant 0 : index
    %c0_27 = arith.constant 0 : index
    %c0_28 = arith.constant 0 : index
    %49 = vector.load %arg4[%c0_26, %c0_27, %c0_28] : memref<1x128x1xf32, #tpu.memory_space<vmem>>, vector<1x128x1xf32>
    %50 = vector.shape_cast %49 : vector<1x128x1xf32> to vector<128x1xf32>
    %51 = vector.shape_cast %48 : vector<128x1xf32> to vector<1x128x1xf32>
    tpu.vector_store %arg4[%c0_26, %c0_27, %c0_28], %51 {strides = array<i32>} : memref<1x128x1xf32, #tpu.memory_space<vmem>>, vector<1x128x1xf32>,
    %52 = arith.mulf %46, %46 : vector<128x288xf32>
    %cst_29 = arith.constant dense<0.000000e+00> : vector<128xf32>
    %53 = vector.multi_reduction <add>, %52, %cst_29 [1] : vector<128x288xf32> to vector<128xf32>
    %54 = vector.shape_cast %53 : vector<128xf32> to vector<128x1xf32>
    %c0_30 = arith.constant 0 : index
    %c0_31 = arith.constant 0 : index
    %c0_32 = arith.constant 0 : index
    %55 = vector.load %arg5[%c0_30, %c0_31, %c0_32] : memref<1x128x1xf32, #tpu.memory_space<vmem>>, vector<1x128x1xf32>
    %56 = vector.shape_cast %55 : vector<1x128x1xf32> to vector<128x1xf32>
    %57 = vector.shape_cast %54 : vector<128x1xf32> to vector<1x128x1xf32>
    tpu.vector_store %arg5[%c0_30, %c0_31, %c0_32], %57 {strides = array<i32>} : memref<1x128x1xf32, #tpu.memory_space<vmem>>, vector<1x128x1xf32>,
    return
  }
  func.func @transform_0(%arg0: i32) -> (i32, i32, i32) {
    %c0_i32 = arith.constant 0 : i32
    %c0_i32_0 = arith.constant 0 : i32
    %c0_i32_1 = arith.constant 0 : i32
    return %arg0, %c0_i32, %c0_i32_0 : i32, i32, i32
  }
  func.func @transform_1(%arg0: i32) -> (i32, i32) {
    %c0_i32 = arith.constant 0 : i32
    %c0_i32_0 = arith.constant 0 : i32
    %c0_i32_1 = arith.constant 0 : i32
    return %c0_i32, %c0_i32_0 : i32, i32
  }
  func.func @transform_2(%arg0: i32) -> (i32, i32) {
    %c0_i32 = arith.constant 0 : i32
    %c0_i32_0 = arith.constant 0 : i32
    %c0_i32_1 = arith.constant 0 : i32
    return %c0_i32, %c0_i32_0 : i32, i32
  }
  func.func @transform_3(%arg0: i32) -> (i32, i32, i32) {
    %c0_i32 = arith.constant 0 : i32
    %c0_i32_0 = arith.constant 0 : i32
    %c0_i32_1 = arith.constant 0 : i32
    return %arg0, %c0_i32, %c0_i32_0 : i32, i32, i32
  }
  func.func @transform_4(%arg0: i32) -> (i32, i32, i32) {
    %c0_i32 = arith.constant 0 : i32
    %c0_i32_0 = arith.constant 0 : i32
    %c0_i32_1 = arith.constant 0 : i32
    return %arg0, %c0_i32, %c0_i32_0 : i32, i32, i32
  }
}

module attributes {stable_mosaic.version = 11 : i64} {
  func.func @_apply_kernel(%arg0: i32, %arg1: memref<1x4x332xf32, #tpu.memory_space<vmem>>, %arg2: memref<128x36xf32, #tpu.memory_space<vmem>>, %arg3: memref<128x1xf32, #tpu.memory_space<vmem>>, %arg4: memref<128x1xf32, #tpu.memory_space<vmem>>, %arg5: memref<1x8x288xf32, #tpu.memory_space<vmem>>) attributes {dimension_semantics = [#tpu.dimension_semantics<parallel>], iteration_bounds = array<i64: 2>, scalar_prefetch = 0 : i64, scratch_operands = 0 : i64, tpu.core_type = #tpu.core_type<tc>, window_params = [{transform_indices = @transform_0, window_bounds = array<i64: 1, 4, 332>}, {pipeline_mode = #tpu.pipeline_mode<synchronous>, transform_indices = @transform_1, window_bounds = array<i64: 128, 36>}, {pipeline_mode = #tpu.pipeline_mode<synchronous>, transform_indices = @transform_2, window_bounds = array<i64: 128, 1>}, {pipeline_mode = #tpu.pipeline_mode<synchronous>, transform_indices = @transform_3, window_bounds = array<i64: 128, 1>}, {transform_indices = @transform_4, window_bounds = array<i64: 1, 8, 288>}]} {
    %c0 = arith.constant 0 : index
    %c0_0 = arith.constant 0 : index
    %c0_1 = arith.constant 0 : index
    %0 = vector.load %arg1[%c0, %c0_0, %c0_1] : memref<1x4x332xf32, #tpu.memory_space<vmem>>, vector<1x4x332xf32>
    %1 = vector.shape_cast %0 : vector<1x4x332xf32> to vector<4x332xf32>
    %cst = arith.constant 0.000000e+00 : f32
    %2 = vector.broadcast %cst : f32 to vector<128x288xf32>
    %3 = vector.extract_strided_slice %1 {offsets = [0, 0], sizes = [4, 288], strides = [1, 1]} : vector<4x332xf32> to vector<4x288xf32>
    %c0_2 = arith.constant 0 : index
    %c0_3 = arith.constant 0 : index
    %4 = vector.load %arg2[%c0_2, %c0_3] : memref<128x36xf32, #tpu.memory_space<vmem>>, vector<128x4xf32>
    %cst_4 = arith.constant dense<0.000000e+00> : vector<128x288xf32>
    %5 = tpu.matmul %4, %3, %cst_4 {dimension_numbers = #tpu.dot_dimension_numbers<[1], [0], [0], [1], [0, 0, 1, 1], [], []>} : vector<128x4xf32>, vector<4x288xf32>, vector<128x288xf32> -> vector<128x288xf32>
    %6 = arith.addf %2, %5 : vector<128x288xf32>
    %7 = vector.extract_strided_slice %1 {offsets = [0, 1], sizes = [4, 288], strides = [1, 1]} : vector<4x332xf32> to vector<4x288xf32>
    %c0_5 = arith.constant 0 : index
    %c4 = arith.constant 4 : index
    %8 = vector.load %arg2[%c0_5, %c4] : memref<128x36xf32, #tpu.memory_space<vmem>>, vector<128x4xf32>
    %cst_6 = arith.constant dense<0.000000e+00> : vector<128x288xf32>
    %9 = tpu.matmul %8, %7, %cst_6 {dimension_numbers = #tpu.dot_dimension_numbers<[1], [0], [0], [1], [0, 0, 1, 1], [], []>} : vector<128x4xf32>, vector<4x288xf32>, vector<128x288xf32> -> vector<128x288xf32>
    %10 = arith.addf %6, %9 : vector<128x288xf32>
    %11 = vector.extract_strided_slice %1 {offsets = [0, 2], sizes = [4, 288], strides = [1, 1]} : vector<4x332xf32> to vector<4x288xf32>
    %c0_7 = arith.constant 0 : index
    %c8 = arith.constant 8 : index
    %12 = vector.load %arg2[%c0_7, %c8] : memref<128x36xf32, #tpu.memory_space<vmem>>, vector<128x4xf32>
    %cst_8 = arith.constant dense<0.000000e+00> : vector<128x288xf32>
    %13 = tpu.matmul %12, %11, %cst_8 {dimension_numbers = #tpu.dot_dimension_numbers<[1], [0], [0], [1], [0, 0, 1, 1], [], []>} : vector<128x4xf32>, vector<4x288xf32>, vector<128x288xf32> -> vector<128x288xf32>
    %14 = arith.addf %10, %13 : vector<128x288xf32>
    %15 = vector.extract_strided_slice %1 {offsets = [0, 18], sizes = [4, 288], strides = [1, 1]} : vector<4x332xf32> to vector<4x288xf32>
    %c0_9 = arith.constant 0 : index
    %c12 = arith.constant 12 : index
    %16 = vector.load %arg2[%c0_9, %c12] : memref<128x36xf32, #tpu.memory_space<vmem>>, vector<128x4xf32>
    %cst_10 = arith.constant dense<0.000000e+00> : vector<128x288xf32>
    %17 = tpu.matmul %16, %15, %cst_10 {dimension_numbers = #tpu.dot_dimension_numbers<[1], [0], [0], [1], [0, 0, 1, 1], [], []>} : vector<128x4xf32>, vector<4x288xf32>, vector<128x288xf32> -> vector<128x288xf32>
    %18 = arith.addf %14, %17 : vector<128x288xf32>
    %19 = vector.extract_strided_slice %1 {offsets = [0, 19], sizes = [4, 288], strides = [1, 1]} : vector<4x332xf32> to vector<4x288xf32>
    %c0_11 = arith.constant 0 : index
    %c16 = arith.constant 16 : index
    %20 = vector.load %arg2[%c0_11, %c16] : memref<128x36xf32, #tpu.memory_space<vmem>>, vector<128x4xf32>
    %cst_12 = arith.constant dense<0.000000e+00> : vector<128x288xf32>
    %21 = tpu.matmul %20, %19, %cst_12 {dimension_numbers = #tpu.dot_dimension_numbers<[1], [0], [0], [1], [0, 0, 1, 1], [], []>} : vector<128x4xf32>, vector<4x288xf32>, vector<128x288xf32> -> vector<128x288xf32>
    %22 = arith.addf %18, %21 : vector<128x288xf32>
    %23 = vector.extract_strided_slice %1 {offsets = [0, 20], sizes = [4, 288], strides = [1, 1]} : vector<4x332xf32> to vector<4x288xf32>
    %c0_13 = arith.constant 0 : index
    %c20 = arith.constant 20 : index
    %24 = vector.load %arg2[%c0_13, %c20] : memref<128x36xf32, #tpu.memory_space<vmem>>, vector<128x4xf32>
    %cst_14 = arith.constant dense<0.000000e+00> : vector<128x288xf32>
    %25 = tpu.matmul %24, %23, %cst_14 {dimension_numbers = #tpu.dot_dimension_numbers<[1], [0], [0], [1], [0, 0, 1, 1], [], []>} : vector<128x4xf32>, vector<4x288xf32>, vector<128x288xf32> -> vector<128x288xf32>
    %26 = arith.addf %22, %25 : vector<128x288xf32>
    %27 = vector.extract_strided_slice %1 {offsets = [0, 36], sizes = [4, 288], strides = [1, 1]} : vector<4x332xf32> to vector<4x288xf32>
    %c0_15 = arith.constant 0 : index
    %c24 = arith.constant 24 : index
    %28 = vector.load %arg2[%c0_15, %c24] : memref<128x36xf32, #tpu.memory_space<vmem>>, vector<128x4xf32>
    %cst_16 = arith.constant dense<0.000000e+00> : vector<128x288xf32>
    %29 = tpu.matmul %28, %27, %cst_16 {dimension_numbers = #tpu.dot_dimension_numbers<[1], [0], [0], [1], [0, 0, 1, 1], [], []>} : vector<128x4xf32>, vector<4x288xf32>, vector<128x288xf32> -> vector<128x288xf32>
    %30 = arith.addf %26, %29 : vector<128x288xf32>
    %31 = vector.extract_strided_slice %1 {offsets = [0, 37], sizes = [4, 288], strides = [1, 1]} : vector<4x332xf32> to vector<4x288xf32>
    %c0_17 = arith.constant 0 : index
    %c28 = arith.constant 28 : index
    %32 = vector.load %arg2[%c0_17, %c28] : memref<128x36xf32, #tpu.memory_space<vmem>>, vector<128x4xf32>
    %cst_18 = arith.constant dense<0.000000e+00> : vector<128x288xf32>
    %33 = tpu.matmul %32, %31, %cst_18 {dimension_numbers = #tpu.dot_dimension_numbers<[1], [0], [0], [1], [0, 0, 1, 1], [], []>} : vector<128x4xf32>, vector<4x288xf32>, vector<128x288xf32> -> vector<128x288xf32>
    %34 = arith.addf %30, %33 : vector<128x288xf32>
    %35 = vector.extract_strided_slice %1 {offsets = [0, 38], sizes = [4, 288], strides = [1, 1]} : vector<4x332xf32> to vector<4x288xf32>
    %c0_19 = arith.constant 0 : index
    %c32 = arith.constant 32 : index
    %36 = vector.load %arg2[%c0_19, %c32] : memref<128x36xf32, #tpu.memory_space<vmem>>, vector<128x4xf32>
    %cst_20 = arith.constant dense<0.000000e+00> : vector<128x288xf32>
    %37 = tpu.matmul %36, %35, %cst_20 {dimension_numbers = #tpu.dot_dimension_numbers<[1], [0], [0], [1], [0, 0, 1, 1], [], []>} : vector<128x4xf32>, vector<4x288xf32>, vector<128x288xf32> -> vector<128x288xf32>
    %38 = arith.addf %34, %37 : vector<128x288xf32>
    %cst_21 = arith.constant 0.000000e+00 : f32
    %39 = vector.broadcast %cst_21 : f32 to vector<128x288xf32>
    %40 = arith.cmpf ogt, %38, %39 : vector<128x288xf32>
    %cst_22 = arith.constant 1.000000e-01 : f32
    %41 = vector.broadcast %cst_22 : f32 to vector<128x288xf32>
    %42 = arith.mulf %41, %38 : vector<128x288xf32>
    %43 = arith.select %40, %38, %42 : vector<128x288xi1>, vector<128x288xf32>
    %c0_23 = arith.constant 0 : index
    %c0_24 = arith.constant 0 : index
    %44 = vector.load %arg3[%c0_23, %c0_24] : memref<128x1xf32, #tpu.memory_space<vmem>>, vector<128x1xf32>
    %45 = vector.broadcast %44 : vector<128x1xf32> to vector<128x288xf32>
    %46 = arith.mulf %43, %45 : vector<128x288xf32>
    %c0_25 = arith.constant 0 : index
    %c0_26 = arith.constant 0 : index
    %47 = vector.load %arg4[%c0_25, %c0_26] : memref<128x1xf32, #tpu.memory_space<vmem>>, vector<128x1xf32>
    %48 = vector.broadcast %47 : vector<128x1xf32> to vector<128x288xf32>
    %49 = arith.addf %46, %48 : vector<128x288xf32>
    %50 = vector.extract_strided_slice %49 {offsets = [0, 0], sizes = [8, 288], strides = [1, 1]} : vector<128x288xf32> to vector<8x288xf32>
    %c0_27 = arith.constant 0 : index
    %c0_28 = arith.constant 0 : index
    %c0_29 = arith.constant 0 : index
    %51 = vector.load %arg5[%c0_27, %c0_28, %c0_29] : memref<1x8x288xf32, #tpu.memory_space<vmem>>, vector<1x8x288xf32>
    %52 = vector.shape_cast %51 : vector<1x8x288xf32> to vector<8x288xf32>
    %53 = vector.shape_cast %50 : vector<8x288xf32> to vector<1x8x288xf32>
    tpu.vector_store %arg5[%c0_27, %c0_28, %c0_29], %53 {strides = array<i32>} : memref<1x8x288xf32, #tpu.memory_space<vmem>>, vector<1x8x288xf32>,
    return
  }
  func.func @transform_0(%arg0: i32) -> (i32, i32, i32) {
    %c0_i32 = arith.constant 0 : i32
    %c0_i32_0 = arith.constant 0 : i32
    %c0_i32_1 = arith.constant 0 : i32
    return %arg0, %c0_i32, %c0_i32_0 : i32, i32, i32
  }
  func.func @transform_1(%arg0: i32) -> (i32, i32) {
    %c0_i32 = arith.constant 0 : i32
    %c0_i32_0 = arith.constant 0 : i32
    %c0_i32_1 = arith.constant 0 : i32
    return %c0_i32, %c0_i32_0 : i32, i32
  }
  func.func @transform_2(%arg0: i32) -> (i32, i32) {
    %c0_i32 = arith.constant 0 : i32
    %c0_i32_0 = arith.constant 0 : i32
    %c0_i32_1 = arith.constant 0 : i32
    return %c0_i32, %c0_i32_0 : i32, i32
  }
  func.func @transform_3(%arg0: i32) -> (i32, i32) {
    %c0_i32 = arith.constant 0 : i32
    %c0_i32_0 = arith.constant 0 : i32
    %c0_i32_1 = arith.constant 0 : i32
    return %c0_i32, %c0_i32_0 : i32, i32
  }
  func.func @transform_4(%arg0: i32) -> (i32, i32, i32) {
    %c0_i32 = arith.constant 0 : i32
    %c0_i32_0 = arith.constant 0 : i32
    %c0_i32_1 = arith.constant 0 : i32
    return %arg0, %c0_i32, %c0_i32_0 : i32, i32, i32
  }
}

</mosaic_0001>

<bundles_post_ra>
// kernel: one_node_forward.3
= control target key start
LH: loop header
LB: loop body
LE: loop exit
PB: predicated region body
PF: predicated region fallthrough
CT: control target
= control target key end

     0   :  { %s4380_s15 = smov 0   ;;  %s5882_s0 = inlined_call_operand.vmem [shape: f32[2,4,332], index: 0, kind: input, shape index: {}]   ;;  %s5883_s1 = inlined_call_operand.vmem [shape: f32[128,36], index: 1, kind: input, shape index: {}]   ;;  %s5884_s2 = inlined_call_operand.vmem [shape: f32[128,1], index: 2, kind: input, shape index: {}]   ;;  %s5885_s3 = inlined_call_operand.vmem [shape: f32[128,1], index: 3, kind: input, shape index: {}]   ;;  %s5886_s4 = inlined_call_operand.vmem [shape: f32[2,8,288], index: 4, kind: output, shape index: {}]  }
   0x1 LB: > { %s3587_s16 = sadd.s32 4294967295, %s4336_s15   ;;  %p3591_p0 = scmp.ge.s32.totalorder %s4336_s15, 1  ;;  %s4336_s15 = sphi %s4380_s15, %s14_s15  }
   0x2   : > { %p162_p1 = scmp.lt.s32.totalorder %s4336_s15, 3 }
   0x4   : > { %p163_p2 = pnand %p3591_p0, %p162_p1 }
   0x5   : > { %p188_p3 = scmp.lt.s32.totalorder (!%p163_p2), %s3587_s16, 1  ;;  %s4339_s21 = smov (!%p163_p2), 127  }
   0x6   : > { %166 = sbr.rel (%p163_p2) target bundleno = 762 (0x2fa), region = 36  ;;  %s4340_s24 = smov (!%p163_p2), 124  }
   0x7   : > { %s4341_s6 = smov (!%p163_p2), 126   ;;  %s4342_s7 = smov (!%p163_p2), 120  }
   0x8   : > { %s4344_s8 = smov (!%p163_p2), 116   ;;  %s4345_s9 = smov (!%p163_p2), 109  }
   0x9   : > { %s4346_s10 = smov (!%p163_p2), 112   ;;  %s4347_s11 = smov (!%p163_p2), 108  }
   0xa   : > { %s4348_s12 = smov (!%p163_p2), 92   ;;  %s4349_s13 = smov (!%p163_p2), 104  }
   0xb   : > { %s5888_s16 = smov (!%p188_p3, %s3587_s16), 1  ;;  %v4338_v0 = vmov 0.0   ;;  %v4409_v4 = vld [vmem:[%s5883_s1] sm:$0xff]  ;;  %v4422_v6 = vld [vmem:[%s5883_s1 + $0x8] sm:$0xff]  ;;  %v4436_v8 = vld [vmem:[%s5883_s1 + $0x10] sm:$0xff]  ;;  %vm273_vm0 = vcmask 1039360  }
   0xc   : > { %380 = vmatprep.mubr.f32.mxu0 %v4338_v0  ;;  %430 = vmatprep.mubr.f32.mxu1 %v4338_v0  ;;  %s4300_s17 = smul.u32 12, %s5888_s16  ;;  %v4417_v5 = vld [vmem:[%s5883_s1 + $0x60] sm:$0xff]  ;;  %v4431_v7 = vld [vmem:[%s5883_s1 + $0x68] sm:$0xff]  ;;  %v4445_v9 = vld [vmem:[%s5883_s1 + $0x70] sm:$0xff]  ;;  %vm309_vm1 = vcmask 1043456   ;;  %vm276_vm2 = vcmask 31744  }
   0xd   : > { %v4450_v10 = vld [vmem:[%s5883_s1 + $0x18] sm:$0xff]  ;;  %v4464_v12 = vld [vmem:[%s5883_s1 + $0x20] sm:$0xff]  ;;  %v4473_v13 = vld [vmem:[%s5883_s1 + $0x28] sm:$0xff]  ;;  %vm946_vm3 = vcmask 1031168   ;;  %vm1321_vm4 = vcmask 900096   ;;  %vm1696_vm5 = vcmask 891904  }
   0xe   : > { %s192_s20 = scalar_lea.vmem %s5882_s0, %s4300_s17  ;;  %v4459_v11 = vld [vmem:[%s5883_s1 + $0x78] sm:$0xff]  ;;  %v4478_v14 = vld [vmem:[%s5883_s1 + $0x30] sm:$0xff]  ;;  %v4487_v15 = vld [vmem:[%s5883_s1 + $0x40] sm:$0xff]  ;;  %s4350_s14 = smov 91   ;;  %vm2071_vm6 = vcmask 883712   ;;  %vm2446_vm7 = vcmask 752640  }
   0xf   : > { %v4396_v1 = vld [vmem:[%s192_s20 + $0x8] sm:$0xf]  ;;  %v4398_v2 = vld [vmem:[%s192_s20] sm:$0xff]  ;;  %v4492_v16 = vld [vmem:[%s5883_s1 + $0x38] sm:$0xff]  ;;  %s4351_s19 = smov 100   ;;  %s4352_s28 = smov 90  }
  0x10   : > { %271 = vrot.lane.b32.xlu0 %v4396_v1, %s4339_s21  ;;  %267 = vrot.lane.b32.xlu1 %v4398_v2, %s4339_s21  ;;  %v4404_v3 = vcombine.high %v4398_v2, %v4398_v2  ;;  %v4501_v17 = vld [vmem:[%s5883_s1 + $0x50] sm:$0xff]  ;;  %v4506_v18 = vld [vmem:[%s5883_s1 + $0x48] sm:$0xff]  ;;  %vm2821_vm8 = vcmask 744448   ;;  %vm3196_vm9 = vcmask 736256   ;;  %vm3530_vm13 = vcmask 261120  }
  0x11   : > { %v4515_v19 = vld [vmem:[%s5883_s1 + $0x58] sm:$0xff] }
  0x14   : > { %269 = vrot.lane.b32.xlu0 %v4404_v3, %s4339_s21  ;;  %232 = vrot.lane.b32.xlu1 %v4409_v4, %s4340_s24 }
  0x18   : > { %256 = vrot.lane.b32.xlu0 %v4417_v5, %s4340_s24  ;;  %234 = vrot.lane.b32.xlu1 %v4422_v6, %s4340_s24 }
  0x1c   : > { %258 = vrot.lane.b32.xlu0 %v4431_v7, %s4340_s24  ;;  %236 = vrot.lane.b32.xlu1 %v4436_v8, %s4340_s24 }
  0x20   : > { %260 = vrot.lane.b32.xlu0 %v4445_v9, %s4340_s24  ;;  %238 = vrot.lane.b32.xlu1 %v4450_v10, %s4340_s24 }
  0x24   : > { %262 = vrot.lane.b32.xlu0 %v4459_v11, %s4340_s24  ;;  %240 = vrot.lane.b32.xlu1 %v4464_v12, %s4340_s24 }
  0x28   : > { %242 = vrot.lane.b32.xlu0 %v4473_v13, %s4340_s24  ;;  %244 = vrot.lane.b32.xlu1 %v4478_v14, %s4340_s24 }
  0x2c   : > { %248 = vrot.lane.b32.xlu1 %v4487_v15, %s4340_s24  ;;  %246 = vrot.lane.b32.xlu0 %v4492_v16, %s4340_s24 }
  0x30   : > { %252 = vrot.lane.b32.xlu1 %v4501_v17, %s4340_s24  ;;  %250 = vrot.lane.b32.xlu0 %v4506_v18, %s4340_s24 }
  0x34   : > { %942 = vrot.lane.b32.xlu1 %v4404_v3, %s4341_s6  ;;  %254 = vrot.lane.b32.xlu0 %v4515_v19, %s4340_s24  ;;  %s4343_s24 = smov 110  }
  0x38   : > { %940 = vrot.lane.b32.xlu1 %v4398_v2, %s4341_s6  ;;  %944 = vrot.lane.b32.xlu0 %v4396_v1, %s4341_s6 }
  0x3c   : > { %910 = vrot.lane.b32.xlu1 %v4422_v6, %s4342_s7  ;;  %908 = vrot.lane.b32.xlu0 %v4409_v4, %s4342_s7 }
  0x40   : > { %914 = vrot.lane.b32.xlu1 %v4450_v10, %s4342_s7  ;;  %912 = vrot.lane.b32.xlu0 %v4436_v8, %s4342_s7 }
  0x44   : > { %918 = vrot.lane.b32.xlu1 %v4473_v13, %s4342_s7  ;;  %916 = vrot.lane.b32.xlu0 %v4464_v12, %s4342_s7 }
  0x48   : > { %922 = vrot.lane.b32.xlu1 %v4492_v16, %s4342_s7  ;;  %920 = vrot.lane.b32.xlu0 %v4478_v14, %s4342_s7 }
  0x4c   : > { %926 = vrot.lane.b32.xlu1 %v4506_v18, %s4342_s7  ;;  %924 = vrot.lane.b32.xlu0 %v4487_v15, %s4342_s7 }
  0x50   : > { %930 = vrot.lane.b32.xlu1 %v4515_v19, %s4342_s7  ;;  %928 = vrot.lane.b32.xlu0 %v4501_v17, %s4342_s7 }
  0x54   : > { %934 = vrot.lane.b32.xlu1 %v4431_v7, %s4342_s7  ;;  %932 = vrot.lane.b32.xlu0 %v4417_v5, %s4342_s7 }
  0x58   : > { %938 = vrot.lane.b32.xlu1 %v4459_v11, %s4342_s7  ;;  %936 = vrot.lane.b32.xlu0 %v4445_v9, %s4342_s7  ;;  %s4301_s7 = smul.u32 24, %s5888_s16 }
  0x5c   : > { %1319 = vrot.lane.b32.xlu1 %v4396_v1, %s4343_s24  ;;  %1317 = vrot.lane.b32.xlu0 %v4404_v3, %s4343_s24 }
  0x60   : > { %1283 = vrot.lane.b32.xlu1 %v4409_v4, %s4344_s8  ;;  %1315 = vrot.lane.b32.xlu0 %v4398_v2, %s4343_s24 }
  0x64   : > { %1287 = vrot.lane.b32.xlu1 %v4436_v8, %s4344_s8  ;;  %1285 = vrot.lane.b32.xlu0 %v4422_v6, %s4344_s8 }
  0x68   : > { %1291 = vrot.lane.b32.xlu1 %v4464_v12, %s4344_s8  ;;  %1289 = vrot.lane.b32.xlu0 %v4450_v10, %s4344_s8 }
  0x6c   : > { %1295 = vrot.lane.b32.xlu1 %v4478_v14, %s4344_s8  ;;  %1293 = vrot.lane.b32.xlu0 %v4473_v13, %s4344_s8 }
  0x70   : > { %1299 = vrot.lane.b32.xlu1 %v4487_v15, %s4344_s8  ;;  %1297 = vrot.lane.b32.xlu0 %v4492_v16, %s4344_s8 }
  0x74   : > { %1303 = vrot.lane.b32.xlu1 %v4501_v17, %s4344_s8  ;;  %1301 = vrot.lane.b32.xlu0 %v4506_v18, %s4344_s8 }
  0x78   : > { %1307 = vrot.lane.b32.xlu1 %v4417_v5, %s4344_s8  ;;  %1305 = vrot.lane.b32.xlu0 %v4515_v19, %s4344_s8 }
  0x7c   : > { %1311 = vrot.lane.b32.xlu1 %v4445_v9, %s4344_s8  ;;  %1309 = vrot.lane.b32.xlu0 %v4431_v7, %s4344_s8 }
  0x80   : > { %1692 = vrot.lane.b32.xlu1 %v4404_v3, %s4345_s9  ;;  %1313 = vrot.lane.b32.xlu0 %v4459_v11, %s4344_s8 }
  0x82   : > { %v272_v20 = vpop.permute.xlu0 %271  ;;  %v268_v21 = vpop.permute.xlu1 %267 }
  0x84   : > { %1690 = vrot.lane.b32.xlu1 %v4398_v2, %s4345_s9  ;;  %1694 = vrot.lane.b32.xlu0 %v4396_v1, %s4345_s9  ;;  %s5872_s9 = scalar_lea.vmem %s5886_s4, %s4301_s7 }
  0x86   : > { %v270_v22 = vpop.permute.xlu0 %269  ;;  %v233_v23 = vpop.permute.xlu1 %232 }
  0x87   : > { %v275_v24 = vsel %vm273_vm0, %v270_v22, %v272_v20  ;;  %v274_v25 = vsel %vm273_vm0, %v268_v21, %v270_v22 }
  0x88   : > { %3594 = vmatprep.subr.msk.mxu0 %vm309_vm1, %v275_v24  ;;  %4298 = vmatprep.subr.msk.mxu1 %vm309_vm1, %v275_v24 }
  0x89   : > { %3595 = vmatpush1.msk.msra.mxu0 %vm309_vm1, %v274_v25  ;;  %4299 = vmatpush1.msk.msra.mxu1 %vm309_vm1, %v274_v25 }
  0x8a   : > { %3596 = vmatmul.mubr.msk.f32.vlgmr.msra.gmra.mxu0 %vm276_vm2, %v233_v23  ;;  %4064 = vmatprep.subr.msk.mxu1 %vm309_vm1, %v272_v20  ;;  %v4566_v26 = vpop.permute.xlu0 %256  ;;  %v235_v27 = vpop.permute.xlu1 %234 }
  0x8b   : > { %4090 = vmatprep.subr.msk.mxu0 %vm309_vm1, %v4396_v1  ;;  %3608 = vmatmul.mubr.msk.f32.vlgmr.msra.gmra.mxu1 %vm276_vm2, %v4566_v26 }
  0x8c   : > { %4065 = vmatpush3.msk.msra.mxu1 %vm309_vm1, %v272_v20  ;;  %4091 = vmatpush3.msk.msra.mxu0 %vm309_vm1, %v4396_v1 }
  0x8d   : > { %386 = vmatprep.mubr.f32.mxu0 %v4338_v0  ;;  %434 = vmatprep.mubr.f32.mxu1 %v4338_v0 }
  0x8e   : > { %3597 = vmatmul.mubr.msk.f32.gmra.mxu0 %vm276_vm2, %v235_v27  ;;  %v4578_v28 = vpop.permute.xlu0 %258  ;;  %v237_v29 = vpop.permute.xlu1 %236  ;;  %3629 = vmatprep.subr.msk.mxu1 %vm309_vm1, %v4404_v3 }
  0x8f   : > { %3609 = vmatmul.mubr.msk.f32.gmra.mxu1 %vm276_vm2, %v4578_v28  ;;  %390 = vmatprep.mubr.f32.mxu0 %v4338_v0 }
  0x90   : > { %438 = vmatprep.mubr.f32.mxu1 %v4338_v0  ;;  %1660 = vrot.lane.b32.xlu1 %v4422_v6, %s4346_s10 }
  0x91   : > { %1658 = vrot.lane.b32.xlu0 %v4409_v4, %s4346_s10 }
  0x92   : > { %3598 = vmatmul.mubr.msk.f32.gmra.mxu0 %vm276_vm2, %v237_v29  ;;  %v4591_v30 = vpop.permute.xlu0 %260  ;;  %v239_v31 = vpop.permute.xlu1 %238 }
  0x93   : > { %3610 = vmatmul.mubr.msk.f32.gmra.mxu1 %vm276_vm2, %v4591_v30  ;;  %394 = vmatprep.mubr.f32.mxu0 %v4338_v0 }
  0x94   : > { %442 = vmatprep.mubr.f32.mxu1 %v4338_v0  ;;  %1664 = vrot.lane.b32.xlu1 %v4450_v10, %s4346_s10 }
  0x95   : > { %1662 = vrot.lane.b32.xlu0 %v4436_v8, %s4346_s10 }
  0x96   : > { %3599 = vmatmul.mubr.msk.f32.gmra.mxu0 %vm276_vm2, %v239_v31  ;;  %v4602_v32 = vpop.permute.xlu0 %262  ;;  %v241_v33 = vpop.permute.xlu1 %240 }
  0x97   : > { %3611 = vmatmul.mubr.msk.f32.gmra.mxu1 %vm276_vm2, %v4602_v32  ;;  %398 = vmatprep.mubr.f32.mxu0 %v4338_v0 }
  0x98   : > { %4066 = vmatprep.mubr.msk.f32.mxu1 %vm276_vm2, %v233_v23  ;;  %1668 = vrot.lane.b32.xlu1 %v4473_v13, %s4346_s10 }
  0x99   : > { %1666 = vrot.lane.b32.xlu0 %v4464_v12, %s4346_s10 }
  0x9a   : > { %3600 = vmatmul.mubr.msk.f32.gmra.mxu0 %vm276_vm2, %v241_v33  ;;  %v243_v34 = vpop.permute.xlu0 %242  ;;  %v245_v35 = vpop.permute.xlu1 %244 }
  0x9b   : > { %4067 = vmatmul.mubr.msk.f32.vlgmr.msra.gmra.mxu1 %vm276_vm2, %v235_v27  ;;  %402 = vmatprep.mubr.f32.mxu0 %v4338_v0 }
  0x9c   : > { %3630 = vmatpush1.msk.msra.mxu1 %vm309_vm1, %v4398_v2  ;;  %4069 = vmatprep.mubr.msk.f32.mxu1 %vm276_vm2, %v237_v29 }
  0x9d   : > { %1672 = vrot.lane.b32.xlu1 %v4492_v16, %s4346_s10  ;;  %1670 = vrot.lane.b32.xlu0 %v4478_v14, %s4346_s10 }
  0x9e   : > { %3601 = vmatmul.mubr.msk.f32.gmra.mxu0 %vm276_vm2, %v243_v34  ;;  %v249_v36 = vpop.permute.xlu1 %248  ;;  %v247_v37 = vpop.permute.xlu0 %246 }
  0x9f   : > { %4070 = vmatmul.mubr.msk.f32.gmra.mxu1 %vm276_vm2, %v239_v31  ;;  %406 = vmatprep.mubr.f32.mxu0 %v4338_v0  ;;  %v4984_v31 = vld [vmem:[%s5883_s1 + $0x8] sm:$0xff] }
  0xa0   : > { %4072 = vmatprep.mubr.msk.f32.mxu1 %vm276_vm2, %v241_v33 }
  0xa1   : > { %1676 = vrot.lane.b32.xlu1 %v4506_v18, %s4346_s10  ;;  %1674 = vrot.lane.b32.xlu0 %v4487_v15, %s4346_s10 }
  0xa2   : > { %3602 = vmatmul.mubr.msk.f32.gmra.mxu0 %vm276_vm2, %v245_v35  ;;  %v253_v38 = vpop.permute.xlu1 %252  ;;  %v251_v39 = vpop.permute.xlu0 %250 }
  0xa3   : > { %4073 = vmatmul.mubr.msk.f32.gmra.mxu1 %vm276_vm2, %v243_v34  ;;  %410 = vmatprep.mubr.f32.mxu0 %v4338_v0 }
  0xa4   : > { %4075 = vmatprep.mubr.msk.f32.mxu1 %vm276_vm2, %v245_v35  ;;  %v5009_v35 = vld [vmem:[%s5883_s1 + $0x18] sm:$0xff] }
  0xa5   : > { %1680 = vrot.lane.b32.xlu1 %v4515_v19, %s4346_s10  ;;  %1678 = vrot.lane.b32.xlu0 %v4501_v17, %s4346_s10 }
  0xa6   : > { %3603 = vmatmul.mubr.msk.f32.gmra.mxu0 %vm276_vm2, %v247_v37  ;;  %v943_v40 = vpop.permute.xlu1 %942  ;;  %v255_v41 = vpop.permute.xlu0 %254 }
  0xa7   : > { %4076 = vmatmul.mubr.msk.f32.gmra.mxu1 %vm276_vm2, %v247_v37  ;;  %414 = vmatprep.mubr.f32.mxu0 %v4338_v0 }
  0xa8   : > { %4078 = vmatprep.mubr.msk.f32.mxu1 %vm276_vm2, %v249_v36 }
  0xa9   : > { %1684 = vrot.lane.b32.xlu1 %v4431_v7, %s4346_s10  ;;  %1682 = vrot.lane.b32.xlu0 %v4417_v5, %s4346_s10 }
  0xaa   : > { %3604 = vmatmul.mubr.msk.f32.gmra.mxu0 %vm276_vm2, %v249_v36  ;;  %v941_v42 = vpop.permute.xlu1 %940  ;;  %v945_v43 = vpop.permute.xlu0 %944  ;;  %v5022_v36 = vld [vmem:[%s5883_s1 + $0x30] sm:$0xff] }
  0xab   : > { %4079 = vmatmul.mubr.msk.f32.gmra.mxu1 %vm276_vm2, %v251_v39  ;;  %418 = vmatprep.mubr.f32.mxu0 %v4338_v0  ;;  %v948_v44 = vsel %vm946_vm3, %v943_v40, %v945_v43  ;;  %v947_v51 = vsel %vm946_vm3, %v941_v42, %v943_v40  ;;  %v5047_v40 = vld [vmem:[%s5883_s1 + $0x40] sm:$0xff] }
  0xac   : > { %4081 = vmatprep.mubr.msk.f32.mxu1 %vm276_vm2, %v253_v38  ;;  %3664 = vmatprep.subr.msk.mxu0 %vm309_vm1, %v948_v44  ;;  %v5072_v44 = vld [vmem:[%s5883_s1 + $0x50] sm:$0xff] }
  0xad   : > { %4116 = vmatprep.subr.msk.mxu1 %vm309_vm1, %v945_v43  ;;  %1688 = vrot.lane.b32.xlu1 %v4459_v11, %s4346_s10 }
  0xae   : > { %3605 = vmatmul.mubr.msk.f32.gmra.mxu0 %vm276_vm2, %v251_v39  ;;  %v4656_v45 = vpop.permute.xlu1 %910  ;;  %v4658_v46 = vpop.permute.xlu0 %908  ;;  %1686 = vrot.lane.b32.xlu0 %v4445_v9, %s4346_s10  ;;  %v5034_v39 = vld [vmem:[%s5883_s1 + $0x28] sm:$0xff] }
  0xaf   : > { %4082 = vmatmul.mubr.msk.f32.gmra.mxu1 %vm276_vm2, %v255_v41  ;;  %422 = vmatprep.mubr.f32.mxu0 %v4338_v0 }
  0xb0   : > { %4084 = vmatprep.mubr.msk.f32.mxu1 %vm276_vm2, %v4566_v26 }
  0xb1   : > { %2069 = vrot.lane.b32.xlu1 %v4396_v1, %s4347_s11 }
  0xb2   : > { %3606 = vmatmul.mubr.msk.f32.gmra.mxu0 %vm276_vm2, %v253_v38  ;;  %v4669_v47 = vpop.permute.xlu1 %914  ;;  %v4671_v48 = vpop.permute.xlu0 %912  ;;  %2067 = vrot.lane.b32.xlu0 %v4404_v3, %s4347_s11 }
  0xb3   : > { %4085 = vmatmul.mubr.msk.f32.gmra.mxu1 %vm276_vm2, %v4578_v28  ;;  %426 = vmatprep.mubr.f32.mxu0 %v4338_v0 }
  0xb4   : > { %4087 = vmatprep.mubr.msk.f32.mxu1 %vm276_vm2, %v4591_v30 }
  0xb5   : > { %2033 = vrot.lane.b32.xlu1 %v4409_v4, %s4347_s11 }
  0xb6   : > { %3607 = vmatmul.mubr.msk.f32.gmra.mxu0 %vm276_vm2, %v255_v41  ;;  %v4683_v49 = vpop.permute.xlu1 %918  ;;  %v4685_v50 = vpop.permute.xlu0 %916  ;;  %2065 = vrot.lane.b32.xlu0 %v4398_v2, %s4347_s11 }
  0xb7   : > { %4088 = vmatmul.mubr.msk.f32.gmra.mxu1 %vm276_vm2, %v4602_v32  ;;  %4092 = vmatprep.mubr.msk.f32.mxu0 %vm276_vm2, %v4409_v4  ;;  %v4997_v32 = vld [vmem:[%s5883_s1 + $0x20] sm:$0xff] }
  0xb8   : > { %679 = vmatprep.mubr.f32.mxu1 %v4338_v0 }
  0xb9   : > { %2037 = vrot.lane.b32.xlu1 %v4436_v8, %s4347_s11 }
  0xba   : > { %4093 = vmatmul.mubr.msk.f32.vlgmr.msra.gmra.mxu0 %vm276_vm2, %v4422_v6  ;;  %v4699_v52 = vpop.permute.xlu1 %922  ;;  %v4701_v53 = vpop.permute.xlu0 %920  ;;  %2035 = vrot.lane.b32.xlu0 %v4422_v6, %s4347_s11 }
  0xbb   : > { %3665 = vmatpush1.msk.msra.mxu0 %vm309_vm1, %v947_v51  ;;  %3631 = vmatmul.mubr.msk.f32.vlgmr.msra.gmra.mxu1 %vm276_vm2, %v4409_v4  ;;  %v5110_v51 = vld [vmem:[%s5883_s1 + $0x58] sm:$0xff] }
  0xbc   : > { %4117 = vmatpush3.msk.msra.mxu1 %vm309_vm1, %v945_v43  ;;  %4095 = vmatprep.mubr.msk.f32.mxu0 %vm276_vm2, %v4436_v8  ;;  %v5059_v43 = vld [vmem:[%s5883_s1 + $0x38] sm:$0xff] }
  0xbd   : > { %685 = vmatprep.mubr.f32.mxu1 %v4338_v0  ;;  %2041 = vrot.lane.b32.xlu1 %v4464_v12, %s4347_s11 }
  0xbe   : > { %4096 = vmatmul.mubr.msk.f32.gmra.mxu0 %vm276_vm2, %v4450_v10  ;;  %v4716_v54 = vpop.permute.xlu1 %926  ;;  %v4718_v55 = vpop.permute.xlu0 %924  ;;  %2039 = vrot.lane.b32.xlu0 %v4450_v10, %s4347_s11 }
  0xbf   : > { %3632 = vmatmul.mubr.msk.f32.gmra.mxu1 %vm276_vm2, %v4422_v6  ;;  %4098 = vmatprep.mubr.msk.f32.mxu0 %vm276_vm2, %v4464_v12 }
  0xc0   : > { %689 = vmatprep.mubr.f32.mxu1 %v4338_v0 }
  0xc1   : > { %2045 = vrot.lane.b32.xlu1 %v4478_v14, %s4347_s11 }
  0xc2   : > { %4099 = vmatmul.mubr.msk.f32.gmra.mxu0 %vm276_vm2, %v4473_v13  ;;  %v4731_v56 = vpop.permute.xlu1 %930  ;;  %v4733_v57 = vpop.permute.xlu0 %928  ;;  %2043 = vrot.lane.b32.xlu0 %v4473_v13, %s4347_s11 }
  0xc3   : > { %3633 = vmatmul.mubr.msk.f32.gmra.mxu1 %vm276_vm2, %v4436_v8  ;;  %4101 = vmatprep.mubr.msk.f32.mxu0 %vm276_vm2, %v4478_v14 }
  0xc4   : > { %693 = vmatprep.mubr.f32.mxu1 %v4338_v0 }
  0xc5   : > { %2049 = vrot.lane.b32.xlu1 %v4487_v15, %s4347_s11 }
  0xc6   : > { %4102 = vmatmul.mubr.msk.f32.gmra.mxu0 %vm276_vm2, %v4492_v16  ;;  %v4746_v58 = vpop.permute.xlu1 %934  ;;  %v4748_v59 = vpop.permute.xlu0 %932  ;;  %2047 = vrot.lane.b32.xlu0 %v4492_v16, %s4347_s11 }
  0xc7   : > { %3634 = vmatmul.mubr.msk.f32.gmra.mxu1 %vm276_vm2, %v4450_v10  ;;  %4104 = vmatprep.mubr.msk.f32.mxu0 %vm276_vm2, %v4487_v15 }
  0xc8   : > { %697 = vmatprep.mubr.f32.mxu1 %v4338_v0 }
  0xc9   : > { %2053 = vrot.lane.b32.xlu1 %v4501_v17, %s4347_s11 }
  0xca   : > { %4105 = vmatmul.mubr.msk.f32.gmra.mxu0 %vm276_vm2, %v4506_v18  ;;  %v4761_v60 = vpop.permute.xlu1 %938  ;;  %v4763_v61 = vpop.permute.xlu0 %936  ;;  %2051 = vrot.lane.b32.xlu0 %v4506_v18, %s4347_s11 }
  0xcb   : > { %3635 = vmatmul.mubr.msk.f32.gmra.mxu1 %vm276_vm2, %v4464_v12  ;;  %4107 = vmatprep.mubr.msk.f32.mxu0 %vm276_vm2, %v4501_v17 }
  0xcc   : > { %701 = vmatprep.mubr.f32.mxu1 %v4338_v0 }
  0xcd   : > { %2057 = vrot.lane.b32.xlu1 %v4417_v5, %s4347_s11 }
  0xce   : > { %4108 = vmatmul.mubr.msk.f32.gmra.mxu0 %vm276_vm2, %v4515_v19  ;;  %v1320_v62 = vpop.permute.xlu1 %1319  ;;  %v4776_v63 = vpop.permute.xlu0 %1317  ;;  %2055 = vrot.lane.b32.xlu0 %v4515_v19, %s4347_s11 }
  0xcf   : > { %3636 = vmatmul.mubr.msk.f32.gmra.mxu1 %vm276_vm2, %v4473_v13  ;;  %4110 = vmatprep.mubr.msk.f32.mxu0 %vm276_vm2, %v4417_v5  ;;  %v1323_v20 = vsel %vm1321_vm4, %v4776_v63, %v1320_v62 }
  0xd0   : > { %705 = vmatprep.mubr.f32.mxu1 %v4338_v0  ;;  %4142 = vmatprep.subr.msk.mxu0 %vm309_vm1, %v1320_v62 }
  0xd1   : > { %3699 = vmatprep.subr.msk.mxu1 %vm309_vm1, %v1323_v20  ;;  %2061 = vrot.lane.b32.xlu1 %v4445_v9, %s4347_s11 }
  0xd2   : > { %4111 = vmatmul.mubr.msk.f32.gmra.mxu0 %vm276_vm2, %v4431_v7  ;;  %v4793_v21 = vpop.permute.xlu1 %1283  ;;  %v4795_v22 = vpop.permute.xlu0 %1315  ;;  %2059 = vrot.lane.b32.xlu0 %v4431_v7, %s4347_s11 }
  0xd3   : > { %3637 = vmatmul.mubr.msk.f32.gmra.mxu1 %vm276_vm2, %v4478_v14  ;;  %4113 = vmatprep.mubr.msk.f32.mxu0 %vm276_vm2, %v4445_v9 }
  0xd4   : > { %709 = vmatprep.mubr.f32.mxu1 %v4338_v0 }
  0xd5   : > { %2442 = vrot.lane.b32.xlu1 %v4404_v3, %s4348_s12 }
  0xd6   : > { %4114 = vmatmul.mubr.msk.f32.gmra.mxu0 %vm276_vm2, %v4459_v11  ;;  %v4807_v23 = vpop.permute.xlu1 %1287  ;;  %v4809_v24 = vpop.permute.xlu0 %1285  ;;  %2063 = vrot.lane.b32.xlu0 %v4459_v11, %s4347_s11 }
  0xd7   : > { %3638 = vmatmul.mubr.msk.f32.gmra.mxu1 %vm276_vm2, %v4492_v16  ;;  %1051 = vmatprep.mubr.f32.mxu0 %v4338_v0 }
  0xd8   : > { %713 = vmatprep.mubr.f32.mxu1 %v4338_v0 }
  0xd9   : > { %2440 = vrot.lane.b32.xlu1 %v4398_v2, %s4348_s12 }
  0xda   : > { %3666 = vmatmul.mubr.msk.f32.vlgmr.msra.gmra.mxu0 %vm276_vm2, %v4658_v46  ;;  %v4820_v25 = vpop.permute.xlu1 %1291  ;;  %v4822_v26 = vpop.permute.xlu0 %1289  ;;  %2444 = vrot.lane.b32.xlu0 %v4396_v1, %s4348_s12 }
  0xdb   : > { %4143 = vmatpush3.msk.msra.mxu0 %vm309_vm1, %v1320_v62  ;;  %3639 = vmatmul.mubr.msk.f32.gmra.mxu1 %vm276_vm2, %v4487_v15 }
  0xdc   : > { %1057 = vmatprep.mubr.f32.mxu0 %v4338_v0  ;;  %717 = vmatprep.mubr.f32.mxu1 %v4338_v0 }
  0xdd   : > { %2410 = vrot.lane.b32.xlu1 %v4422_v6, %s4349_s13 }
  0xde   : > { %3667 = vmatmul.mubr.msk.f32.gmra.mxu0 %vm276_vm2, %v4656_v45  ;;  %v4834_v27 = vpop.permute.xlu1 %1295  ;;  %v4836_v28 = vpop.permute.xlu0 %1293  ;;  %2408 = vrot.lane.b32.xlu0 %v4409_v4, %s4349_s13 }
  0xdf   : > { %3640 = vmatmul.mubr.msk.f32.gmra.mxu1 %vm276_vm2, %v4506_v18  ;;  %1061 = vmatprep.mubr.f32.mxu0 %v4338_v0 }
  0xe0   : > { %721 = vmatprep.mubr.f32.mxu1 %v4338_v0 }
  0xe1   : > { %2414 = vrot.lane.b32.xlu1 %v4450_v10, %s4349_s13 }
  0xe2   : > { %3668 = vmatmul.mubr.msk.f32.gmra.mxu0 %vm276_vm2, %v4671_v48  ;;  %v4848_v6 = vpop.permute.xlu1 %1299  ;;  %v4850_v29 = vpop.permute.xlu0 %1297  ;;  %2412 = vrot.lane.b32.xlu0 %v4436_v8, %s4349_s13 }
  0xe3   : > { %3641 = vmatmul.mubr.msk.f32.gmra.mxu1 %vm276_vm2, %v4501_v17  ;;  %1065 = vmatprep.mubr.f32.mxu0 %v4338_v0 }
  0xe4   : > { %725 = vmatprep.mubr.f32.mxu1 %v4338_v0 }
  0xe5   : > { %2418 = vrot.lane.b32.xlu1 %v4473_v13, %s4349_s13 }
  0xe6   : > { %3669 = vmatmul.mubr.msk.f32.gmra.mxu0 %vm276_vm2, %v4669_v47  ;;  %v4862_v4 = vpop.permute.xlu1 %1303  ;;  %v4864_v10 = vpop.permute.xlu0 %1301  ;;  %2416 = vrot.lane.b32.xlu0 %v4464_v12, %s4349_s13 }
  0xe7   : > { %3642 = vmatmul.mubr.msk.f32.gmra.mxu1 %vm276_vm2, %v4515_v19  ;;  %1069 = vmatprep.mubr.f32.mxu0 %v4338_v0 }
  0xe8   : > { %729 = vmatprep.mubr.f32.mxu1 %v4338_v0 }
  0xe9   : > { %2422 = vrot.lane.b32.xlu1 %v4492_v16, %s4349_s13 }
  0xea   : > { %3670 = vmatmul.mubr.msk.f32.gmra.mxu0 %vm276_vm2, %v4685_v50  ;;  %v4876_v8 = vpop.permute.xlu1 %1307  ;;  %v4878_v13 = vpop.permute.xlu0 %1305  ;;  %2420 = vrot.lane.b32.xlu0 %v4478_v14, %s4349_s13 }
  0xeb   : > { %3643 = vmatmul.mubr.msk.f32.gmra.mxu1 %vm276_vm2, %v4417_v5  ;;  %1073 = vmatprep.mubr.f32.mxu0 %v4338_v0 }
  0xec   : > { %733 = vmatprep.mubr.f32.mxu1 %v4338_v0 }
  0xed   : > { %2426 = vrot.lane.b32.xlu1 %v4506_v18, %s4349_s13 }
  0xee   : > { %3671 = vmatmul.mubr.msk.f32.gmra.mxu0 %vm276_vm2, %v4683_v49  ;;  %v4890_v12 = vpop.permute.xlu0 %1309  ;;  %2424 = vrot.lane.b32.xlu0 %v4487_v15, %s4349_s13  ;;  %v4898_v14 = vpop.permute.xlu1 %1311 }
  0xef   : > { %3644 = vmatmul.mubr.msk.f32.gmra.mxu1 %vm276_vm2, %v4431_v7  ;;  %1077 = vmatprep.mubr.f32.mxu0 %v4338_v0 }
  0xf0   : > { %737 = vmatprep.mubr.f32.mxu1 %v4338_v0 }
  0xf1   : > { %2430 = vrot.lane.b32.xlu1 %v4515_v19, %s4349_s13 }
  0xf2   : > { %3672 = vmatmul.mubr.msk.f32.gmra.mxu0 %vm276_vm2, %v4701_v53  ;;  %v4904_v16 = vpop.permute.xlu0 %1313  ;;  %2428 = vrot.lane.b32.xlu0 %v4501_v17, %s4349_s13  ;;  %v4916_v15 = vpop.permute.xlu1 %1692 }
  0xf3   : > { %3645 = vmatmul.mubr.msk.f32.gmra.mxu1 %vm276_vm2, %v4445_v9  ;;  %1081 = vmatprep.mubr.f32.mxu0 %v4338_v0 }
  0xf4   : > { %741 = vmatprep.mubr.f32.mxu1 %v4338_v0 }
  0xf5   : > { %2434 = vrot.lane.b32.xlu1 %v4431_v7, %s4349_s13  ;;  %v1322_v7 = vsel %vm1321_vm4, %v4795_v22, %v4776_v63 }
  0xf6   : > { %3673 = vmatmul.mubr.msk.f32.gmra.mxu0 %vm276_vm2, %v4699_v52  ;;  %v4918_v18 = vpop.permute.xlu0 %1694  ;;  %2432 = vrot.lane.b32.xlu0 %v4417_v5, %s4349_s13  ;;  %v4955_v5 = vld [vmem:[%s5883_s1] sm:$0xff] }
  0xf7   : > { %3646 = vmatmul.mubr.msk.f32.gmra.mxu1 %vm276_vm2, %v4459_v11  ;;  %1085 = vmatprep.mubr.f32.mxu0 %v4338_v0  ;;  %v1698_v17 = vsel %vm1696_vm5, %v4916_v15, %v4918_v18 }
  0xf8   : > { %4118 = vmatprep.mubr.msk.f32.mxu1 %vm276_vm2, %v4658_v46  ;;  %3734 = vmatprep.subr.msk.mxu0 %vm309_vm1, %v1698_v17 }
  0xf9   : > { %2438 = vrot.lane.b32.xlu1 %v4459_v11, %s4349_s13  ;;  %v4972_v11 = vld [vmem:[%s5883_s1 + $0x10] sm:$0xff] }
  0xfa   : > { %3674 = vmatmul.mubr.msk.f32.gmra.mxu0 %vm276_vm2, %v4718_v55  ;;  %2436 = vrot.lane.b32.xlu0 %v4445_v9, %s4349_s13  ;;  %v4960_v9 = vpop.permute.xlu1 %1690 }
  0xfb   : > { %4119 = vmatmul.mubr.msk.f32.vlgmr.msra.gmra.mxu1 %vm276_vm2, %v4656_v45  ;;  %1089 = vmatprep.mubr.f32.mxu0 %v4338_v0 }
  0xfc   : > { %3700 = vmatpush1.msk.msra.mxu1 %vm309_vm1, %v1322_v7  ;;  %4121 = vmatprep.mubr.msk.f32.mxu1 %vm276_vm2, %v4671_v48  ;;  %v5097_v48 = vld [vmem:[%s5883_s1 + $0x60] sm:$0xff] }
  0xfd   : > { %4168 = vmatprep.subr.msk.mxu1 %vm309_vm1, %v4918_v18  ;;  %2819 = vrot.lane.b32.xlu1 %v4396_v1, %s4350_s14 }
  0xfe   : > { %3675 = vmatmul.mubr.msk.f32.gmra.mxu0 %vm276_vm2, %v4716_v54  ;;  %2817 = vrot.lane.b32.xlu0 %v4404_v3, %s4350_s14 }
  0xff   : > { %4122 = vmatmul.mubr.msk.f32.gmra.mxu1 %vm276_vm2, %v4669_v47  ;;  %1093 = vmatprep.mubr.f32.mxu0 %v4338_v0  ;;  %v5084_v47 = vld [vmem:[%s5883_s1 + $0x48] sm:$0xff] }
 0x100   : > { %4124 = vmatprep.mubr.msk.f32.mxu1 %vm276_vm2, %v4685_v50 }
 0x101   : > { %2783 = vrot.lane.b32.xlu1 %v4955_v5, %s4351_s19 }
 0x102   : > { %3676 = vmatmul.mubr.msk.f32.gmra.mxu0 %vm276_vm2, %v4733_v57  ;;  %2815 = vrot.lane.b32.xlu0 %v4398_v2, %s4350_s14  ;;  %v4977_v19 = vpop.permute.xlu1 %1660 }
 0x103   : > { %4125 = vmatmul.mubr.msk.f32.gmra.mxu1 %vm276_vm2, %v4683_v49  ;;  %1097 = vmatprep.mubr.f32.mxu0 %v4338_v0  ;;  %v4979_v30 = vpop.permute.xlu0 %1658 }
 0x104   : > { %4127 = vmatprep.mubr.msk.f32.mxu1 %vm276_vm2, %v4701_v53  ;;  %v5125_v53 = vld [vmem:[%s5883_s1 + $0x70] sm:$0xff] }
 0x105   : > { %2787 = vrot.lane.b32.xlu1 %v4972_v11, %s4351_s19 }
 0x106   : > { %3677 = vmatmul.mubr.msk.f32.gmra.mxu0 %vm276_vm2, %v4731_v56  ;;  %2785 = vrot.lane.b32.xlu0 %v4984_v31, %s4351_s19  ;;  %v5002_v33 = vpop.permute.xlu1 %1664 }
 0x107   : > { %4128 = vmatmul.mubr.msk.f32.gmra.mxu1 %vm276_vm2, %v4699_v52  ;;  %1101 = vmatprep.mubr.f32.mxu0 %v4338_v0  ;;  %v5004_v34 = vpop.permute.xlu0 %1662  ;;  %v1697_v52 = vsel %vm1696_vm5, %v4960_v9, %v4916_v15 }
 0x108   : > { %4130 = vmatprep.mubr.msk.f32.mxu1 %vm276_vm2, %v4718_v55 }
 0x109   : > { %2791 = vrot.lane.b32.xlu1 %v4997_v32, %s4351_s19 }
 0x10a   : > { %3678 = vmatmul.mubr.msk.f32.gmra.mxu0 %vm276_vm2, %v4748_v59  ;;  %2789 = vrot.lane.b32.xlu0 %v5009_v35, %s4351_s19  ;;  %v5027_v37 = vpop.permute.xlu1 %1668 }
 0x10b   : > { %4131 = vmatmul.mubr.msk.f32.gmra.mxu1 %vm276_vm2, %v4716_v54  ;;  %1105 = vmatprep.mubr.f32.mxu0 %v4338_v0  ;;  %v5029_v38 = vpop.permute.xlu0 %1666 }
 0x10c   : > { %4133 = vmatprep.mubr.msk.f32.mxu1 %vm276_vm2, %v4733_v57 }
 0x10d   : > { %2795 = vrot.lane.b32.xlu1 %v5022_v36, %s4351_s19 }
 0x10e   : > { %3679 = vmatmul.mubr.msk.f32.gmra.mxu0 %vm276_vm2, %v4746_v58  ;;  %2793 = vrot.lane.b32.xlu0 %v5034_v39, %s4351_s19 }
 0x10f   : > { %4134 = vmatmul.mubr.msk.f32.gmra.mxu1 %vm276_vm2, %v4731_v56  ;;  %1109 = vmatprep.mubr.f32.mxu0 %v4338_v0  ;;  %v5052_v41 = vpop.permute.xlu1 %1672  ;;  %v5054_v42 = vpop.permute.xlu0 %1670  ;;  %v5137_v56 = vld [vmem:[%s5883_s1 + $0x68] sm:$0xff] }
 0x110   : > { %4136 = vmatprep.mubr.msk.f32.mxu1 %vm276_vm2, %v4748_v59 }
 0x111   : > { %2799 = vrot.lane.b32.xlu1 %v5047_v40, %s4351_s19 }
 0x112   : > { %3680 = vmatmul.mubr.msk.f32.gmra.mxu0 %vm276_vm2, %v4763_v61  ;;  %2797 = vrot.lane.b32.xlu0 %v5059_v43, %s4351_s19 }
 0x113   : > { %4137 = vmatmul.mubr.msk.f32.gmra.mxu1 %vm276_vm2, %v4746_v58  ;;  %1113 = vmatprep.mubr.f32.mxu0 %v4338_v0  ;;  %v5077_v45 = vpop.permute.xlu1 %1676  ;;  %v5079_v46 = vpop.permute.xlu0 %1674  ;;  %v5159_v58 = vld [vmem:[%s5883_s1 + $0x78] sm:$0xff] }
 0x114   : > { %4139 = vmatprep.mubr.msk.f32.mxu1 %vm276_vm2, %v4763_v61 }
 0x115   : > { %2803 = vrot.lane.b32.xlu1 %v5072_v44, %s4351_s19 }
 0x116   : > { %3681 = vmatmul.mubr.msk.f32.gmra.mxu0 %vm276_vm2, %v4761_v60  ;;  %2801 = vrot.lane.b32.xlu0 %v5084_v47, %s4351_s19 }
 0x117   : > { %4140 = vmatmul.mubr.msk.f32.gmra.mxu1 %vm276_vm2, %v4761_v60  ;;  %4144 = vmatprep.mubr.msk.f32.mxu0 %vm276_vm2, %v4793_v21  ;;  %v5103_v49 = vpop.permute.xlu1 %1680  ;;  %v5105_v50 = vpop.permute.xlu0 %1678 }
 0x118   : > { %1426 = vmatprep.mubr.f32.mxu1 %v4338_v0 }
 0x119   : > { %2807 = vrot.lane.b32.xlu1 %v5097_v48, %s4351_s19 }
 0x11a   : > { %4145 = vmatmul.mubr.msk.f32.vlgmr.msra.gmra.mxu0 %vm276_vm2, %v4809_v24  ;;  %2805 = vrot.lane.b32.xlu0 %v5110_v51, %s4351_s19 }
 0x11b   : > { %3735 = vmatpush1.msk.msra.mxu0 %vm309_vm1, %v1697_v52  ;;  %3701 = vmatmul.mubr.msk.f32.vlgmr.msra.gmra.mxu1 %vm276_vm2, %v4793_v21  ;;  %v5130_v54 = vpop.permute.xlu1 %1684  ;;  %v5132_v55 = vpop.permute.xlu0 %1682 }
 0x11c   : > { %4147 = vmatprep.mubr.msk.f32.mxu0 %vm276_vm2, %v4807_v23  ;;  %4169 = vmatpush3.msk.msra.mxu1 %vm309_vm1, %v4918_v18 }
 0x11d   : > { %1432 = vmatprep.mubr.f32.mxu1 %v4338_v0  ;;  %2811 = vrot.lane.b32.xlu1 %v5125_v53, %s4351_s19 }
 0x11e   : > { %4148 = vmatmul.mubr.msk.f32.gmra.mxu0 %vm276_vm2, %v4822_v26  ;;  %2809 = vrot.lane.b32.xlu0 %v5137_v56, %s4351_s19 }
 0x11f   : > { %3702 = vmatmul.mubr.msk.f32.gmra.mxu1 %vm276_vm2, %v4809_v24  ;;  %4150 = vmatprep.mubr.msk.f32.mxu0 %vm276_vm2, %v4820_v25  ;;  %v5154_v57 = vpop.permute.xlu1 %1688 }
 0x120   : > { %1436 = vmatprep.mubr.f32.mxu1 %v4338_v0  ;;  %v5162_v59 = vpop.permute.xlu0 %1686 }
 0x121   : > { %3192 = vrot.lane.b32.xlu1 %v4404_v3, %s4352_s28 }
 0x122   : > { %4151 = vmatmul.mubr.msk.f32.gmra.mxu0 %vm276_vm2, %v4836_v28  ;;  %2813 = vrot.lane.b32.xlu0 %v5159_v58, %s4351_s19  ;;  %s4353_s19 = smov 96  }
 0x123   : > { %3703 = vmatmul.mubr.msk.f32.gmra.mxu1 %vm276_vm2, %v4807_v23  ;;  %4153 = vmatprep.mubr.msk.f32.mxu0 %vm276_vm2, %v4834_v27  ;;  %v2070_v60 = vpop.permute.xlu1 %2069 }
 0x124   : > { %1440 = vmatprep.mubr.f32.mxu1 %v4338_v0  ;;  %4194 = vmatprep.subr.msk.mxu0 %vm309_vm1, %v2070_v60  ;;  %v5175_v61 = vpop.permute.xlu0 %2067 }
 0x125   : > { %v2073_v3 = vsel %vm2071_vm6, %v5175_v61, %v2070_v60  ;;  %3190 = vrot.lane.b32.xlu1 %v4398_v2, %s4352_s28 }
 0x126   : > { %4154 = vmatmul.mubr.msk.f32.gmra.mxu0 %vm276_vm2, %v4850_v29  ;;  %3769 = vmatprep.subr.msk.mxu1 %vm309_vm1, %v2073_v3 }
 0x127   : > { %3704 = vmatmul.mubr.msk.f32.gmra.mxu1 %vm276_vm2, %v4822_v26  ;;  %4156 = vmatprep.mubr.msk.f32.mxu0 %vm276_vm2, %v4848_v6  ;;  %v5187_v62 = vpop.permute.xlu1 %2033 }
 0x128   : > { %1444 = vmatprep.mubr.f32.mxu1 %v4338_v0  ;;  %v5190_v63 = vpop.permute.xlu0 %2065  ;;  %3194 = vrot.lane.b32.xlu0 %v4396_v1, %s4352_s28 }
 0x129   : > { %3160 = vrot.lane.b32.xlu1 %v4984_v31, %s4353_s19 }
 0x12a   : > { %4157 = vmatmul.mubr.msk.f32.gmra.mxu0 %vm276_vm2, %v4864_v10 }
 0x12b   : > { %3705 = vmatmul.mubr.msk.f32.gmra.mxu1 %vm276_vm2, %v4820_v25  ;;  %4159 = vmatprep.mubr.msk.f32.mxu0 %vm276_vm2, %v4862_v4  ;;  %v5201_v2 = vpop.permute.xlu1 %2037 }
 0x12c   : > { %1448 = vmatprep.mubr.f32.mxu1 %v4338_v0  ;;  %v5204_v20 = vpop.permute.xlu0 %2035  ;;  %3158 = vrot.lane.b32.xlu0 %v4955_v5, %s4353_s19 }
 0x12d   : > { %3164 = vrot.lane.b32.xlu1 %v5009_v35, %s4353_s19 }
 0x12e   : > { %4160 = vmatmul.mubr.msk.f32.gmra.mxu0 %vm276_vm2, %v4878_v13 }
 0x12f   : > { %3706 = vmatmul.mubr.msk.f32.gmra.mxu1 %vm276_vm2, %v4836_v28  ;;  %4162 = vmatprep.mubr.msk.f32.mxu0 %vm276_vm2, %v4876_v8  ;;  %v5216_v1 = vpop.permute.xlu1 %2041 }
 0x130   : > { %1452 = vmatprep.mubr.f32.mxu1 %v4338_v0  ;;  %v5219_v21 = vpop.permute.xlu0 %2039  ;;  %3162 = vrot.lane.b32.xlu0 %v4972_v11, %s4353_s19 }
 0x131   : > { %3168 = vrot.lane.b32.xlu1 %v5034_v39, %s4353_s19 }
 0x132   : > { %4163 = vmatmul.mubr.msk.f32.gmra.mxu0 %vm276_vm2, %v4890_v12 }
 0x133   : > { %3707 = vmatmul.mubr.msk.f32.gmra.mxu1 %vm276_vm2, %v4834_v27  ;;  %4165 = vmatprep.mubr.msk.f32.mxu0 %vm276_vm2, %v4898_v14  ;;  %v5231_v22 = vpop.permute.xlu1 %2045 }
 0x134   : > { %1456 = vmatprep.mubr.f32.mxu1 %v4338_v0  ;;  %v5234_v23 = vpop.permute.xlu0 %2043  ;;  %3166 = vrot.lane.b32.xlu0 %v4997_v32, %s4353_s19 }
 0x135   : > { %3172 = vrot.lane.b32.xlu1 %v5059_v43, %s4353_s19 }
 0x136   : > { %4166 = vmatmul.mubr.msk.f32.gmra.mxu0 %vm276_vm2, %v4904_v16 }
 0x137   : > { %3708 = vmatmul.mubr.msk.f32.gmra.mxu1 %vm276_vm2, %v4850_v29  ;;  %1801 = vmatprep.mubr.f32.mxu0 %v4338_v0  ;;  %v5245_v24 = vpop.permute.xlu1 %2049 }
 0x138   : > { %1460 = vmatprep.mubr.f32.mxu1 %v4338_v0  ;;  %v5248_v25 = vpop.permute.xlu0 %2047  ;;  %3170 = vrot.lane.b32.xlu0 %v5022_v36, %s4353_s19 }
 0x139   : > { %3176 = vrot.lane.b32.xlu1 %v5084_v47, %s4353_s19 }
 0x13a   : > { %3736 = vmatmul.mubr.msk.f32.vlgmr.msra.gmra.mxu0 %vm276_vm2, %v4979_v30 }
 0x13b   : > { %4195 = vmatpush3.msk.msra.mxu0 %vm309_vm1, %v2070_v60  ;;  %3709 = vmatmul.mubr.msk.f32.gmra.mxu1 %vm276_vm2, %v4848_v6  ;;  %v5259_v26 = vpop.permute.xlu1 %2053 }
 0x13c   : > { %1807 = vmatprep.mubr.f32.mxu0 %v4338_v0  ;;  %1464 = vmatprep.mubr.f32.mxu1 %v4338_v0  ;;  %v5263_v27 = vpop.permute.xlu0 %2051 }
 0x13d   : > { %3174 = vrot.lane.b32.xlu0 %v5047_v40, %s4353_s19  ;;  %3180 = vrot.lane.b32.xlu1 %v5110_v51, %s4353_s19 }
 0x13e   : > { %3737 = vmatmul.mubr.msk.f32.gmra.mxu0 %vm276_vm2, %v4977_v19 }
 0x13f   : > { %3710 = vmatmul.mubr.msk.f32.gmra.mxu1 %vm276_vm2, %v4864_v10  ;;  %1811 = vmatprep.mubr.f32.mxu0 %v4338_v0  ;;  %v5274_v28 = vpop.permute.xlu1 %2057 }
 0x140   : > { %1468 = vmatprep.mubr.f32.mxu1 %v4338_v0  ;;  %v5277_v6 = vpop.permute.xlu0 %2055 }
 0x141   : > { %3178 = vrot.lane.b32.xlu0 %v5072_v44, %s4353_s19  ;;  %3184 = vrot.lane.b32.xlu1 %v5137_v56, %s4353_s19 }
 0x142   : > { %3738 = vmatmul.mubr.msk.f32.gmra.mxu0 %vm276_vm2, %v5004_v34 }
 0x143   : > { %3711 = vmatmul.mubr.msk.f32.gmra.mxu1 %vm276_vm2, %v4862_v4  ;;  %1815 = vmatprep.mubr.f32.mxu0 %v4338_v0  ;;  %v5288_v29 = vpop.permute.xlu1 %2061 }
 0x144   : > { %1472 = vmatprep.mubr.f32.mxu1 %v4338_v0  ;;  %v5291_v10 = vpop.permute.xlu0 %2059 }
 0x145   : > { %3182 = vrot.lane.b32.xlu0 %v5097_v48, %s4353_s19  ;;  %3188 = vrot.lane.b32.xlu1 %v5159_v58, %s4353_s19  ;;  %v2072_v58 = vsel %vm2071_vm6, %v5190_v63, %v5175_v61 }
 0x146   : > { %3739 = vmatmul.mubr.msk.f32.gmra.mxu0 %vm276_vm2, %v5002_v33 }
 0x147   : > { %3712 = vmatmul.mubr.msk.f32.gmra.mxu1 %vm276_vm2, %v4878_v13  ;;  %1819 = vmatprep.mubr.f32.mxu0 %v4338_v0  ;;  %v5302_v4 = vpop.permute.xlu1 %2442 }
 0x148   : > { %1476 = vmatprep.mubr.f32.mxu1 %v4338_v0  ;;  %v5305_v15 = vpop.permute.xlu0 %2063 }
 0x149   : > { %3186 = vrot.lane.b32.xlu0 %v5125_v53, %s4353_s19 }
 0x14a   : > { %v5309_v18 = vpop.f32.mrf.mxu0  ;;  %3740 = vmatmul.mubr.msk.f32.gmra.mxu0 %vm276_vm2, %v5029_v38 }
 0x14b   : > { %v432_v17 = vpop.f32.mrf.mxu1  ;;  %3713 = vmatmul.mubr.msk.f32.gmra.mxu1 %vm276_vm2, %v4876_v8  ;;  %1823 = vmatprep.mubr.f32.mxu0 %v4338_v0  ;;  %v5316_v13 = vpop.permute.xlu1 %2440 }
 0x14c   : > { %v5318_v7 = vpop.f32.mrf.mxu0  ;;  %1480 = vmatprep.mubr.f32.mxu1 %v4338_v0  ;;  %v5321_v5 = vpop.permute.xlu0 %2444 }
 0x14d   : > { %v433_v9 = vpop.f32.mrf.mxu1  ;;  %v2448_v11 = vsel %vm2446_vm7, %v5302_v4, %v5321_v5 }
 0x14e   : > { %v388_v31 = vpop.f32.mrf.mxu0  ;;  %3741 = vmatmul.mubr.msk.f32.gmra.mxu0 %vm276_vm2, %v5027_v37  ;;  %3804 = vmatprep.subr.msk.mxu0 %vm309_vm1, %v2448_v11 }
 0x14f   : > { %v436_v8 = vpop.f32.mrf.mxu1  ;;  %3714 = vmatmul.mubr.msk.f32.gmra.mxu1 %vm276_vm2, %v4890_v12  ;;  %1827 = vmatprep.mubr.f32.mxu0 %v4338_v0  ;;  %v5332_v32 = vpop.permute.xlu1 %2410 }
 0x150   : > { %v389_v35 = vpop.f32.mrf.mxu0  ;;  %1484 = vmatprep.mubr.f32.mxu1 %v4338_v0  ;;  %v5335_v36 = vpop.permute.xlu0 %2408 }
 0x151   : > { %v437_v39 = vpop.f32.mrf.mxu1 }
 0x152   : > { %v392_v40 = vpop.f32.mrf.mxu0  ;;  %3742 = vmatmul.mubr.msk.f32.gmra.mxu0 %vm276_vm2, %v5054_v42 }
 0x153   : > { %v440_v43 = vpop.f32.mrf.mxu1  ;;  %3715 = vmatmul.mubr.msk.f32.gmra.mxu1 %vm276_vm2, %v4898_v14  ;;  %1831 = vmatprep.mubr.f32.mxu0 %v4338_v0  ;;  %v5342_v12 = vpop.permute.xlu1 %2414 }
 0x154   : > { %v393_v44 = vpop.f32.mrf.mxu0  ;;  %1488 = vmatprep.mubr.f32.mxu1 %v4338_v0  ;;  %v5345_v47 = vpop.permute.xlu0 %2412 }
 0x155   : > { %v441_v48 = vpop.f32.mrf.mxu1 }
 0x156   : > { %v396_v51 = vpop.f32.mrf.mxu0  ;;  %3743 = vmatmul.mubr.msk.f32.gmra.mxu0 %vm276_vm2, %v5052_v41 }
 0x157   : > { %v444_v52 = vpop.f32.mrf.mxu1  ;;  %3716 = vmatmul.mubr.msk.f32.gmra.mxu1 %vm276_vm2, %v4904_v16  ;;  %1835 = vmatprep.mubr.f32.mxu0 %v4338_v0  ;;  %v5352_v14 = vpop.permute.xlu1 %2418 }
 0x158   : > { %v397_v53 = vpop.f32.mrf.mxu0  ;;  %4170 = vmatprep.mubr.msk.f32.mxu1 %vm276_vm2, %v4979_v30  ;;  %v5356_v56 = vpop.permute.xlu0 %2416 }
 0x159   : > { %v445_v60 = vpop.f32.mrf.mxu1 }
 0x15a   : > { %v400_v3 = vpop.f32.mrf.mxu0  ;;  %3744 = vmatmul.mubr.msk.f32.gmra.mxu0 %vm276_vm2, %v5079_v46 }
 0x15b   : > { %v4068_v16 = vpop.f32.mrf.mxu1  ;;  %4171 = vmatmul.mubr.msk.f32.vlgmr.msra.gmra.mxu1 %vm276_vm2, %v4977_v19  ;;  %1839 = vmatprep.mubr.f32.mxu0 %v4338_v0  ;;  %v5366_v17 = vpop.permute.xlu1 %2422 }
 0x15c   : > { %3770 = vmatpush1.msk.msra.mxu1 %vm309_vm1, %v2072_v58  ;;  %v401_v30 = vpop.f32.mrf.mxu0  ;;  %4173 = vmatprep.mubr.msk.f32.mxu1 %vm276_vm2, %v5004_v34  ;;  %v5371_v61 = vpop.permute.xlu0 %2420 }
 0x15d   : > { %v5373_v63 = vpop.f32.mrf.mxu1  ;;  %4220 = vmatprep.subr.msk.mxu1 %vm309_vm1, %v5321_v5 }
 0x15e   : > { %v404_v9 = vpop.f32.mrf.mxu0  ;;  %3745 = vmatmul.mubr.msk.f32.gmra.mxu0 %vm276_vm2, %v5077_v45 }
 0x15f   : > { %v4071_v19 = vpop.f32.mrf.mxu1  ;;  %4174 = vmatmul.mubr.msk.f32.gmra.mxu1 %vm276_vm2, %v5002_v33  ;;  %1843 = vmatprep.mubr.f32.mxu0 %v4338_v0  ;;  %v5382_v11 = vpop.permute.xlu1 %2426 }
 0x160   : > { %v405_v34 = vpop.f32.mrf.mxu0  ;;  %4176 = vmatprep.mubr.msk.f32.mxu1 %vm276_vm2, %v5029_v38  ;;  %v5386_v31 = vpop.permute.xlu0 %2424 }
 0x161   : > { %v522_v8 = vpop.f32.mrf.mxu1 }
 0x162   : > { %v408_v35 = vpop.f32.mrf.mxu0  ;;  %3746 = vmatmul.mubr.msk.f32.gmra.mxu0 %vm276_vm2, %v5105_v50 }
 0x163   : > { %v4074_v39 = vpop.f32.mrf.mxu1  ;;  %4177 = vmatmul.mubr.msk.f32.gmra.mxu1 %vm276_vm2, %v5027_v37  ;;  %1847 = vmatprep.mubr.f32.mxu0 %v4338_v0  ;;  %v5393_v33 = vpop.permute.xlu1 %2430 }
 0x164   : > { %v409_v40 = vpop.f32.mrf.mxu0  ;;  %4179 = vmatprep.mubr.msk.f32.mxu1 %vm276_vm2, %v5054_v42  ;;  %v5397_v38 = vpop.permute.xlu0 %2428 }
 0x165   : > { %v530_v43 = vpop.f32.mrf.mxu1 }
 0x166   : > { %v412_v44 = vpop.f32.mrf.mxu0  ;;  %3747 = vmatmul.mubr.msk.f32.gmra.mxu0 %vm276_vm2, %v5103_v49 }
 0x167   : > { %v4077_v48 = vpop.f32.mrf.mxu1  ;;  %4180 = vmatmul.mubr.msk.f32.gmra.mxu1 %vm276_vm2, %v5052_v41  ;;  %1851 = vmatprep.mubr.f32.mxu0 %v4338_v0  ;;  %v5404_v37 = vpop.permute.xlu1 %2434 }
 0x168   : > { %v413_v51 = vpop.f32.mrf.mxu0  ;;  %4182 = vmatprep.mubr.msk.f32.mxu1 %vm276_vm2, %v5079_v46  ;;  %v5408_v42 = vpop.permute.xlu0 %2432 }
 0x169   : > { %v538_v52 = vpop.f32.mrf.mxu1 }
 0x16a   : > { %v416_v53 = vpop.f32.mrf.mxu0  ;;  %3748 = vmatmul.mubr.msk.f32.gmra.mxu0 %vm276_vm2, %v5132_v55 }
 0x16b   : > { %v4080_v58 = vpop.f32.mrf.mxu1  ;;  %4183 = vmatmul.mubr.msk.f32.gmra.mxu1 %vm276_vm2, %v5077_v45  ;;  %1855 = vmatprep.mubr.f32.mxu0 %v4338_v0  ;;  %v5415_v41 = vpop.permute.xlu1 %2438 }
 0x16c   : > { %v417_v60 = vpop.f32.mrf.mxu0  ;;  %4185 = vmatprep.mubr.msk.f32.mxu1 %vm276_vm2, %v5105_v50  ;;  %v5419_v46 = vpop.permute.xlu0 %2436 }
 0x16d   : > { %v546_v3 = vpop.f32.mrf.mxu1 }
 0x16e   : > { %v420_v16 = vpop.f32.mrf.mxu0  ;;  %3749 = vmatmul.mubr.msk.f32.gmra.mxu0 %vm276_vm2, %v5130_v54 }
 0x16f   : > { %v4083_v30 = vpop.f32.mrf.mxu1  ;;  %4186 = vmatmul.mubr.msk.f32.gmra.mxu1 %vm276_vm2, %v5103_v49  ;;  %1859 = vmatprep.mubr.f32.mxu0 %v4338_v0  ;;  %v5426_v45 = vpop.permute.xlu1 %2819 }
 0x170   : > { %v421_v9 = vpop.f32.mrf.mxu0  ;;  %4188 = vmatprep.mubr.msk.f32.mxu1 %vm276_vm2, %v5132_v55  ;;  %v2818_v50 = vpop.permute.xlu0 %2817 }
 0x171   : > { %v554_v19 = vpop.f32.mrf.mxu1  ;;  %v2823_v58 = vsel %vm2821_vm8, %v2818_v50, %v5426_v45 }
 0x172   : > { %v424_v34 = vpop.f32.mrf.mxu0  ;;  %3750 = vmatmul.mubr.msk.f32.gmra.mxu0 %vm276_vm2, %v5162_v59 }
 0x173   : > { %v4086_v8 = vpop.f32.mrf.mxu1  ;;  %4189 = vmatmul.mubr.msk.f32.gmra.mxu1 %vm276_vm2, %v5130_v54  ;;  %1863 = vmatprep.mubr.f32.mxu0 %v4338_v0  ;;  %v5435_v49 = vpop.permute.xlu1 %2783 }
 0x174   : > { %v425_v35 = vpop.f32.mrf.mxu0  ;;  %4191 = vmatprep.mubr.msk.f32.mxu1 %vm276_vm2, %v5162_v59  ;;  %v2816_v55 = vpop.permute.xlu0 %2815  ;;  %v2447_v59 = vsel %vm2446_vm7, %v5316_v13, %v5302_v4 }
 0x175   : > { %v562_v39 = vpop.f32.mrf.mxu1  ;;  %v5440_v40 = vsel %vm2821_vm8, %v2816_v55, %v2818_v50 }
 0x176   : > { %v428_v43 = vpop.f32.mrf.mxu0  ;;  %3751 = vmatmul.mubr.msk.f32.gmra.mxu0 %vm276_vm2, %v5154_v57 }
 0x177   : > { %v4089_v44 = vpop.f32.mrf.mxu1  ;;  %4192 = vmatmul.mubr.msk.f32.gmra.mxu1 %vm276_vm2, %v5154_v57  ;;  %4196 = vmatprep.mubr.msk.f32.mxu0 %vm276_vm2, %v5187_v62  ;;  %v5448_v54 = vpop.permute.xlu1 %2787 }
 0x178   : > { %v429_v48 = vpop.f32.mrf.mxu0  ;;  %2176 = vmatprep.mubr.f32.mxu1 %v4338_v0  ;;  %v5454_v51 = vpop.permute.xlu0 %2785 }
 0x179   : > { %v570_v52 = vpop.f32.mrf.mxu1 }
 0x17a   : > { %v4094_v53 = vpop.f32.mrf.mxu0  ;;  %4197 = vmatmul.mubr.msk.f32.vlgmr.msra.gmra.mxu0 %vm276_vm2, %v5204_v20 }
 0x17b   : > { %3805 = vmatpush1.msk.msra.mxu0 %vm309_vm1, %v2447_v59  ;;  %v681_v57 = vpop.f32.mrf.mxu1  ;;  %3771 = vmatmul.mubr.msk.f32.vlgmr.msra.gmra.mxu1 %vm276_vm2, %v5187_v62  ;;  %v5463_v4 = vpop.permute.xlu1 %2791 }
 0x17c   : > { %v5466_v13 = vadd.f32 %v681_v57, %v5309_v18  ;;  %4199 = vmatprep.mubr.msk.f32.mxu0 %vm276_vm2, %v5201_v2  ;;  %4221 = vmatpush3.msk.msra.mxu1 %vm309_vm1, %v5321_v5  ;;  %v812_v60 = vpop.f32.mrf.mxu0  ;;  %v5472_v3 = vpop.permute.xlu0 %2789 }
 0x17d   : > { %v5475_v16 = vadd.f32 %v812_v60, %v5373_v63  ;;  %v683_v62 = vpop.f32.mrf.mxu1  ;;  %2182 = vmatprep.mubr.f32.mxu1 %v4338_v0  ;;  %4246 = vmatprep.subr.msk.mxu0 %vm309_vm1, %v5426_v45 }
 0x17e   : > { %v5481_v18 = vadd.f32 %v683_v62, %v5318_v7  ;;  %v4097_v30 = vpop.f32.mrf.mxu0  ;;  %4200 = vmatmul.mubr.msk.f32.gmra.mxu0 %vm276_vm2, %v5219_v21  ;;  %3839 = vmatprep.subr.msk.mxu1 %vm309_vm1, %v2823_v58 }
 0x17f   : > { %v687_v5 = vpop.f32.mrf.mxu1  ;;  %3772 = vmatmul.mubr.msk.f32.gmra.mxu1 %vm276_vm2, %v5204_v20  ;;  %4202 = vmatprep.mubr.msk.f32.mxu0 %vm276_vm2, %v5216_v1  ;;  %v5490_v63 = vpop.permute.xlu1 %2795 }
 0x180   : > { %v821_v9 = vpop.f32.mrf.mxu0  ;;  %2186 = vmatprep.mubr.f32.mxu1 %v4338_v0  ;;  %v5493_v7 = vpop.permute.xlu0 %2793 }
 0x181   : > { %v688_v50 = vpop.f32.mrf.mxu1 }
 0x182   : > { %v4100_v19 = vpop.f32.mrf.mxu0  ;;  %4203 = vmatmul.mubr.msk.f32.gmra.mxu0 %vm276_vm2, %v5234_v23 }
 0x183   : > { %v691_v34 = vpop.f32.mrf.mxu1  ;;  %3773 = vmatmul.mubr.msk.f32.gmra.mxu1 %vm276_vm2, %v5201_v2  ;;  %4205 = vmatprep.mubr.msk.f32.mxu0 %vm276_vm2, %v5231_v22  ;;  %v5501_v20 = vpop.permute.xlu1 %2799 }
 0x184   : > { %v829_v8 = vpop.f32.mrf.mxu0  ;;  %2190 = vmatprep.mubr.f32.mxu1 %v4338_v0  ;;  %v5504_v35 = vpop.permute.xlu0 %2797 }
 0x185   : > { %v692_v55 = vpop.f32.mrf.mxu1 }
 0x186   : > { %v4103_v39 = vpop.f32.mrf.mxu0  ;;  %4206 = vmatmul.mubr.msk.f32.gmra.mxu0 %vm276_vm2, %v5248_v25 }
 0x187   : > { %v695_v43 = vpop.f32.mrf.mxu1  ;;  %3774 = vmatmul.mubr.msk.f32.gmra.mxu1 %vm276_vm2, %v5219_v21  ;;  %4208 = vmatprep.mubr.msk.f32.mxu0 %vm276_vm2, %v5245_v24  ;;  %v5512_v2 = vpop.permute.xlu1 %2803 }
 0x188   : > { %v837_v44 = vpop.f32.mrf.mxu0  ;;  %2194 = vmatprep.mubr.f32.mxu1 %v4338_v0  ;;  %v5515_v59 = vpop.permute.xlu0 %2801 }
 0x189   : > { %v696_v48 = vpop.f32.mrf.mxu1 }
 0x18a   : > { %v4106_v52 = vpop.f32.mrf.mxu0  ;;  %4209 = vmatmul.mubr.msk.f32.gmra.mxu0 %vm276_vm2, %v5263_v27 }
 0x18b   : > { %v699_v53 = vpop.f32.mrf.mxu1  ;;  %3775 = vmatmul.mubr.msk.f32.gmra.mxu1 %vm276_vm2, %v5216_v1  ;;  %4211 = vmatprep.mubr.msk.f32.mxu0 %vm276_vm2, %v5259_v26  ;;  %v5526_v60 = vpop.permute.xlu1 %2807 }
 0x18c   : > { %v845_v21 = vpop.f32.mrf.mxu0  ;;  %2198 = vmatprep.mubr.f32.mxu1 %v4338_v0  ;;  %v5524_v57 = vpop.permute.xlu0 %2805 }
 0x18d   : > { %v700_v58 = vpop.f32.mrf.mxu1 }
 0x18e   : > { %v4109_v62 = vpop.f32.mrf.mxu0  ;;  %4212 = vmatmul.mubr.msk.f32.gmra.mxu0 %vm276_vm2, %v5277_v6 }
 0x18f   : > { %v703_v30 = vpop.f32.mrf.mxu1  ;;  %3776 = vmatmul.mubr.msk.f32.gmra.mxu1 %vm276_vm2, %v5234_v23  ;;  %4214 = vmatprep.mubr.msk.f32.mxu0 %vm276_vm2, %v5274_v28  ;;  %v5543_v23 = vpop.permute.xlu1 %2811 }
 0x190   : > { %v853_v1 = vpop.f32.mrf.mxu0  ;;  %2202 = vmatprep.mubr.f32.mxu1 %v4338_v0  ;;  %v5535_v5 = vpop.permute.xlu0 %2809 }
 0x191   : > { %v704_v9 = vpop.f32.mrf.mxu1 }
 0x192   : > { %v4112_v50 = vpop.f32.mrf.mxu0  ;;  %4215 = vmatmul.mubr.msk.f32.gmra.mxu0 %vm276_vm2, %v5291_v10 }
 0x193   : > { %v707_v19 = vpop.f32.mrf.mxu1  ;;  %3777 = vmatmul.mubr.msk.f32.gmra.mxu1 %vm276_vm2, %v5231_v22  ;;  %4217 = vmatprep.mubr.msk.f32.mxu0 %vm276_vm2, %v5288_v29  ;;  %v5554_v48 = vpop.permute.xlu1 %3192 }
 0x194   : > { %v861_v34 = vpop.f32.mrf.mxu0  ;;  %2206 = vmatprep.mubr.f32.mxu1 %v4338_v0  ;;  %v5546_v8 = vpop.permute.xlu0 %2813 }
 0x195   : > { %v708_v55 = vpop.f32.mrf.mxu1 }
 0x196   : > { %v4115_v39 = vpop.f32.mrf.mxu0  ;;  %4218 = vmatmul.mubr.msk.f32.gmra.mxu0 %vm276_vm2, %v5305_v15 }
 0x197   : > { %v711_v43 = vpop.f32.mrf.mxu1  ;;  %3778 = vmatmul.mubr.msk.f32.gmra.mxu1 %vm276_vm2, %v5248_v25  ;;  %2551 = vmatprep.mubr.f32.mxu0 %v4338_v0 }
 0x198   : > { %v869_v22 = vpop.f32.mrf.mxu0  ;;  %2210 = vmatprep.mubr.f32.mxu1 %v4338_v0 }
 0x199   : > { %v712_v44 = vpop.f32.mrf.mxu1 }
 0x19a   : > { %v1053_v52 = vpop.f32.mrf.mxu0  ;;  %3806 = vmatmul.mubr.msk.f32.vlgmr.msra.gmra.mxu0 %vm276_vm2, %v5335_v36  ;;  %v5558_v53 = vpop.permute.xlu0 %3194 }
 0x19b   : > { %v5561_v21 = vadd.f32 %v1053_v52, %v5466_v13  ;;  %4247 = vmatpush3.msk.msra.mxu0 %vm309_vm1, %v5426_v45  ;;  %v715_v25 = vpop.f32.mrf.mxu1  ;;  %3779 = vmatmul.mubr.msk.f32.gmra.mxu1 %vm276_vm2, %v5245_v24  ;;  %v3198_v58 = vsel %vm3196_vm9, %v5554_v48, %v5558_v53 }
 0x19c   : > { %v1055_v62 = vpop.f32.mrf.mxu0  ;;  %2557 = vmatprep.mubr.f32.mxu0 %v4338_v0  ;;  %2214 = vmatprep.mubr.f32.mxu1 %v4338_v0 }
 0x19d   : > { %v5573_v30 = vadd.f32 %v1055_v62, %v5481_v18  ;;  %v716_v13 = vpop.f32.mrf.mxu1  ;;  %3874 = vmatprep.subr.msk.mxu0 %vm309_vm1, %v3198_v58 }
 0x19e   : > { %v1059_v45 = vpop.f32.mrf.mxu0  ;;  %3807 = vmatmul.mubr.msk.f32.gmra.mxu0 %vm276_vm2, %v5332_v32 }
 0x19f   : > { %v719_v24 = vpop.f32.mrf.mxu1  ;;  %3780 = vmatmul.mubr.msk.f32.gmra.mxu1 %vm276_vm2, %v5263_v27  ;;  %2561 = vmatprep.mubr.f32.mxu0 %v4338_v0 }
 0x1a0   : > { %v1060_v1 = vpop.f32.mrf.mxu0  ;;  %2218 = vmatprep.mubr.f32.mxu1 %v4338_v0 }
 0x1a1   : > { %v720_v9 = vpop.f32.mrf.mxu1 }
 0x1a2   : > { %v1063_v50 = vpop.f32.mrf.mxu0  ;;  %3808 = vmatmul.mubr.msk.f32.gmra.mxu0 %vm276_vm2, %v5345_v47 }
 0x1a3   : > { %v723_v18 = vpop.f32.mrf.mxu1  ;;  %3781 = vmatmul.mubr.msk.f32.gmra.mxu1 %vm276_vm2, %v5259_v26  ;;  %2565 = vmatprep.mubr.f32.mxu0 %v4338_v0 }
 0x1a4   : > { %v1064_v19 = vpop.f32.mrf.mxu0  ;;  %2222 = vmatprep.mubr.f32.mxu1 %v4338_v0 }
 0x1a5   : > { %v724_v27 = vpop.f32.mrf.mxu1 }
 0x1a6   : > { %v1067_v34 = vpop.f32.mrf.mxu0  ;;  %3809 = vmatmul.mubr.msk.f32.gmra.mxu0 %vm276_vm2, %v5342_v12 }
 0x1a7   : > { %v727_v55 = vpop.f32.mrf.mxu1  ;;  %3782 = vmatmul.mubr.msk.f32.gmra.mxu1 %vm276_vm2, %v5277_v6  ;;  %2569 = vmatprep.mubr.f32.mxu0 %v4338_v0 }
 0x1a8   : > { %v1068_v39 = vpop.f32.mrf.mxu0  ;;  %2226 = vmatprep.mubr.f32.mxu1 %v4338_v0 }
 0x1a9   : > { %v728_v26 = vpop.f32.mrf.mxu1 }
 0x1aa   : > { %v1071_v43 = vpop.f32.mrf.mxu0  ;;  %3810 = vmatmul.mubr.msk.f32.gmra.mxu0 %vm276_vm2, %v5356_v56  ;;  %v3519_v26 = vld [vmem:[%s5885_s3] sm:$0xff] }
 0x1ab   : > { %v731_v22 = vpop.f32.mrf.mxu1  ;;  %3783 = vmatmul.mubr.msk.f32.gmra.mxu1 %vm276_vm2, %v5274_v28  ;;  %2573 = vmatprep.mubr.f32.mxu0 %v4338_v0 }
 0x1ac   : > { %v1072_v44 = vpop.f32.mrf.mxu0  ;;  %2230 = vmatprep.mubr.f32.mxu1 %v4338_v0 }
 0x1ad   : > { %v732_v6 = vpop.f32.mrf.mxu1 }
 0x1ae   : > { %v1075_v52 = vpop.f32.mrf.mxu0  ;;  %3811 = vmatmul.mubr.msk.f32.gmra.mxu0 %vm276_vm2, %v5352_v14 }
 0x1af   : > { %v735_v25 = vpop.f32.mrf.mxu1  ;;  %3784 = vmatmul.mubr.msk.f32.gmra.mxu1 %vm276_vm2, %v5291_v10  ;;  %2577 = vmatprep.mubr.f32.mxu0 %v4338_v0 }
 0x1b0   : > { %v1076_v58 = vpop.f32.mrf.mxu0  ;;  %2234 = vmatprep.mubr.f32.mxu1 %v4338_v0 }
 0x1b1   : > { %v736_v28 = vpop.f32.mrf.mxu1 }
 0x1b2   : > { %v1079_v62 = vpop.f32.mrf.mxu0  ;;  %3812 = vmatmul.mubr.msk.f32.gmra.mxu0 %vm276_vm2, %v5371_v61 }
 0x1b3   : > { %v739_v13 = vpop.f32.mrf.mxu1  ;;  %3785 = vmatmul.mubr.msk.f32.gmra.mxu1 %vm276_vm2, %v5288_v29  ;;  %2581 = vmatprep.mubr.f32.mxu0 %v4338_v0 }
 0x1b4   : > { %v1080_v45 = vpop.f32.mrf.mxu0  ;;  %2238 = vmatprep.mubr.f32.mxu1 %v4338_v0 }
 0x1b5   : > { %v740_v10 = vpop.f32.mrf.mxu1 }
 0x1b6   : > { %v1083_v24 = vpop.f32.mrf.mxu0  ;;  %3813 = vmatmul.mubr.msk.f32.gmra.mxu0 %vm276_vm2, %v5366_v17 }
 0x1b7   : > { %v743_v1 = vpop.f32.mrf.mxu1  ;;  %3786 = vmatmul.mubr.msk.f32.gmra.mxu1 %vm276_vm2, %v5305_v15  ;;  %2585 = vmatprep.mubr.f32.mxu0 %v4338_v0 }
 0x1b8   : > { %v1084_v9 = vpop.f32.mrf.mxu0  ;;  %4222 = vmatprep.mubr.msk.f32.mxu1 %vm276_vm2, %v5335_v36 }
 0x1b9   : > { %v744_v29 = vpop.f32.mrf.mxu1 }
 0x1ba   : > { %v1087_v50 = vpop.f32.mrf.mxu0  ;;  %3814 = vmatmul.mubr.msk.f32.gmra.mxu0 %vm276_vm2, %v5386_v31 }
 0x1bb   : > { %v4120_v18 = vpop.f32.mrf.mxu1  ;;  %4223 = vmatmul.mubr.msk.f32.vlgmr.msra.gmra.mxu1 %vm276_vm2, %v5332_v32  ;;  %2589 = vmatprep.mubr.f32.mxu0 %v4338_v0 }
 0x1bc   : > { %3840 = vmatpush1.msk.msra.mxu1 %vm309_vm1, %v5440_v40  ;;  %v1088_v15 = vpop.f32.mrf.mxu0  ;;  %4225 = vmatprep.mubr.msk.f32.mxu1 %vm276_vm2, %v5345_v47 }
 0x1bd   : > { %v1184_v19 = vpop.f32.mrf.mxu1  ;;  %4272 = vmatprep.subr.msk.mxu1 %vm309_vm1, %v5558_v53 }
 0x1be   : > { %v5631_v36 = vadd.f32 %v1184_v19, %v5475_v16  ;;  %v1091_v27 = vpop.f32.mrf.mxu0  ;;  %3815 = vmatmul.mubr.msk.f32.gmra.mxu0 %vm276_vm2, %v5382_v11 }
 0x1bf   : > { %v4123_v32 = vpop.f32.mrf.mxu1  ;;  %4226 = vmatmul.mubr.msk.f32.gmra.mxu1 %vm276_vm2, %v5342_v12  ;;  %2593 = vmatprep.mubr.f32.mxu0 %v4338_v0  ;;  %v3510_v12 = vld [vmem:[%s5884_s2] sm:$0xff] }
 0x1c0   : > { %v1092_v40 = vpop.f32.mrf.mxu0  ;;  %4228 = vmatprep.mubr.msk.f32.mxu1 %vm276_vm2, %v5356_v56  ;;  %v4354_v56 = vmov 0  }
 0x1c1   : > { %v1193_v47 = vpop.f32.mrf.mxu1  ;;  %4327 = vset.pattern.permute.xlu0 %v4354_v56  ;;  %4328 = vset.pattern.permute.xlu1 %v4354_v56 }
 0x1c2   : > { %v1095_v34 = vpop.f32.mrf.mxu0  ;;  %3816 = vmatmul.mubr.msk.f32.gmra.mxu0 %vm276_vm2, %v5397_v38  ;;  %3513 = vperm.xlu0 %4327, %v3510_v12  }
 0x1c3   : > { %v4126_v16 = vpop.f32.mrf.mxu1  ;;  %4229 = vmatmul.mubr.msk.f32.gmra.mxu1 %vm276_vm2, %v5352_v14  ;;  %2597 = vmatprep.mubr.f32.mxu0 %v4338_v0 }
 0x1c4   : > { %v1096_v55 = vpop.f32.mrf.mxu0  ;;  %4231 = vmatprep.mubr.msk.f32.mxu1 %vm276_vm2, %v5371_v61  ;;  %3522 = vperm.xlu1 %4328, %v3519_v26  }
 0x1c5   : > { %v1201_v39 = vpop.f32.mrf.mxu1 }
 0x1c6   : > { %v1099_v14 = vpop.f32.mrf.mxu0  ;;  %3817 = vmatmul.mubr.msk.f32.gmra.mxu0 %vm276_vm2, %v5393_v33 }
 0x1c7   : > { %v4129_v43 = vpop.f32.mrf.mxu1  ;;  %4232 = vmatmul.mubr.msk.f32.gmra.mxu1 %vm276_vm2, %v5366_v17  ;;  %2601 = vmatprep.mubr.f32.mxu0 %v4338_v0 }
 0x1c8   : > { %v1100_v61 = vpop.f32.mrf.mxu0  ;;  %4234 = vmatprep.mubr.msk.f32.mxu1 %vm276_vm2, %v5386_v31 }
 0x1c9   : > { %v1209_v22 = vpop.f32.mrf.mxu1  ;;  %v5756_v61 = vpop.permute.xlu0 %3158 }
 0x1ca   : > { %v1103_v44 = vpop.f32.mrf.mxu0  ;;  %3818 = vmatmul.mubr.msk.f32.gmra.mxu0 %vm276_vm2, %v5408_v42 }
 0x1cb   : > { %v4132_v6 = vpop.f32.mrf.mxu1  ;;  %4235 = vmatmul.mubr.msk.f32.gmra.mxu1 %vm276_vm2, %v5382_v11  ;;  %2605 = vmatprep.mubr.f32.mxu0 %v4338_v0 }
 0x1cc   : > { %v1104_v52 = vpop.f32.mrf.mxu0  ;;  %4237 = vmatprep.mubr.msk.f32.mxu1 %vm276_vm2, %v5397_v38 }
 0x1cd   : > { %v1217_v17 = vpop.f32.mrf.mxu1 }
 0x1ce   : > { %v1107_v25 = vpop.f32.mrf.mxu0  ;;  %3819 = vmatmul.mubr.msk.f32.gmra.mxu0 %vm276_vm2, %v5404_v37 }
 0x1cf   : > { %v4135_v31 = vpop.f32.mrf.mxu1  ;;  %4238 = vmatmul.mubr.msk.f32.gmra.mxu1 %vm276_vm2, %v5393_v33  ;;  %2609 = vmatprep.mubr.f32.mxu0 %v4338_v0  ;;  %v3191_v33 = vpop.permute.xlu1 %3190 }
 0x1d0   : > { %v1108_v58 = vpop.f32.mrf.mxu0  ;;  %4240 = vmatprep.mubr.msk.f32.mxu1 %vm276_vm2, %v5408_v42 }
 0x1d1   : > { %v1225_v11 = vpop.f32.mrf.mxu1 }
 0x1d2   : > { %v1111_v28 = vpop.f32.mrf.mxu0  ;;  %3820 = vmatmul.mubr.msk.f32.gmra.mxu0 %vm276_vm2, %v5419_v46 }
 0x1d3   : > { %v4138_v38 = vpop.f32.mrf.mxu1  ;;  %4241 = vmatmul.mubr.msk.f32.gmra.mxu1 %vm276_vm2, %v5404_v37  ;;  %2613 = vmatprep.mubr.f32.mxu0 %v4338_v0  ;;  %v3197_v37 = vsel %vm3196_vm9, %v3191_v33, %v5554_v48 }
 0x1d4   : > { %v1112_v62 = vpop.f32.mrf.mxu0  ;;  %4243 = vmatprep.mubr.msk.f32.mxu1 %vm276_vm2, %v5419_v46 }
 0x1d5   : > { %v1233_v13 = vpop.f32.mrf.mxu1 }
 0x1d6   : > { %v1115_v45 = vpop.f32.mrf.mxu0  ;;  %3821 = vmatmul.mubr.msk.f32.gmra.mxu0 %vm276_vm2, %v5415_v41 }
 0x1d7   : > { %v4141_v42 = vpop.f32.mrf.mxu1  ;;  %4244 = vmatmul.mubr.msk.f32.gmra.mxu1 %vm276_vm2, %v5415_v41  ;;  %4248 = vmatprep.mubr.msk.f32.mxu0 %vm276_vm2, %v5435_v49 }
 0x1d8   : > { %v1116_v10 = vpop.f32.mrf.mxu0  ;;  %2926 = vmatprep.mubr.f32.mxu1 %v4338_v0 }
 0x1d9   : > { %v1241_v46 = vpop.f32.mrf.mxu1 }
 0x1da   : > { %v4146_v24 = vpop.f32.mrf.mxu0  ;;  %4249 = vmatmul.mubr.msk.f32.vlgmr.msra.gmra.mxu0 %vm276_vm2, %v5454_v51 }
 0x1db   : > { %3875 = vmatpush1.msk.msra.mxu0 %vm309_vm1, %v3197_v37  ;;  %v1428_v1 = vpop.f32.mrf.mxu1  ;;  %3841 = vmatmul.mubr.msk.f32.vlgmr.msra.gmra.mxu1 %vm276_vm2, %v5435_v49 }
 0x1dc   : > { %v5696_v41 = vadd.f32 %v1428_v1, %v5561_v21  ;;  %4251 = vmatprep.mubr.msk.f32.mxu0 %vm276_vm2, %v5448_v54  ;;  %4273 = vmatpush3.msk.msra.mxu1 %vm309_vm1, %v5558_v53  ;;  %v1559_v48 = vpop.f32.mrf.mxu0 }
 0x1dd   : > { %v5703_v9 = vadd.f32 %v1559_v48, %v5631_v36  ;;  %v1430_v29 = vpop.f32.mrf.mxu1  ;;  %2932 = vmatprep.mubr.f32.mxu1 %v4338_v0 }
 0x1de   : > { %v5707_v50 = vadd.f32 %v1430_v29, %v5573_v30  ;;  %v4149_v49 = vpop.f32.mrf.mxu0  ;;  %4252 = vmatmul.mubr.msk.f32.gmra.mxu0 %vm276_vm2, %v5472_v3 }
 0x1df   : > { %v1434_v21 = vpop.f32.mrf.mxu1  ;;  %3842 = vmatmul.mubr.msk.f32.gmra.mxu1 %vm276_vm2, %v5454_v51  ;;  %4254 = vmatprep.mubr.msk.f32.mxu0 %vm276_vm2, %v5463_v4 }
 0x1e0   : > { %v1568_v53 = vpop.f32.mrf.mxu0  ;;  %2936 = vmatprep.mubr.f32.mxu1 %v4338_v0 }
 0x1e1   : > { %v1435_v18 = vpop.f32.mrf.mxu1 }
 0x1e2   : > { %v4152_v15 = vpop.f32.mrf.mxu0  ;;  %4255 = vmatmul.mubr.msk.f32.gmra.mxu0 %vm276_vm2, %v5493_v7 }
 0x1e3   : > { %v1438_v30 = vpop.f32.mrf.mxu1  ;;  %3843 = vmatmul.mubr.msk.f32.gmra.mxu1 %vm276_vm2, %v5448_v54  ;;  %4257 = vmatprep.mubr.msk.f32.mxu0 %vm276_vm2, %v5490_v63 }
 0x1e4   : > { %v1576_v19 = vpop.f32.mrf.mxu0  ;;  %2940 = vmatprep.mubr.f32.mxu1 %v4338_v0 }
 0x1e5   : > { %v1439_v51 = vpop.f32.mrf.mxu1 }
 0x1e6   : > { %v4155_v36 = vpop.f32.mrf.mxu0  ;;  %4258 = vmatmul.mubr.msk.f32.gmra.mxu0 %vm276_vm2, %v5504_v35 }
 0x1e7   : > { %v1442_v27 = vpop.f32.mrf.mxu1  ;;  %3844 = vmatmul.mubr.msk.f32.gmra.mxu1 %vm276_vm2, %v5472_v3  ;;  %4260 = vmatprep.mubr.msk.f32.mxu0 %vm276_vm2, %v5501_v20 }
 0x1e8   : > { %v1584_v32 = vpop.f32.mrf.mxu0  ;;  %2944 = vmatprep.mubr.f32.mxu1 %v4338_v0 }
 0x1e9   : > { %v1443_v54 = vpop.f32.mrf.mxu1 }
 0x1ea   : > { %v4158_v40 = vpop.f32.mrf.mxu0  ;;  %4261 = vmatmul.mubr.msk.f32.gmra.mxu0 %vm276_vm2, %v5515_v59 }
 0x1eb   : > { %v1446_v47 = vpop.f32.mrf.mxu1  ;;  %3845 = vmatmul.mubr.msk.f32.gmra.mxu1 %vm276_vm2, %v5463_v4  ;;  %4263 = vmatprep.mubr.msk.f32.mxu0 %vm276_vm2, %v5512_v2 }
 0x1ec   : > { %v1592_v34 = vpop.f32.mrf.mxu0  ;;  %2948 = vmatprep.mubr.f32.mxu1 %v4338_v0 }
 0x1ed   : > { %v1447_v3 = vpop.f32.mrf.mxu1 }
 0x1ee   : > { %v4161_v16 = vpop.f32.mrf.mxu0  ;;  %4264 = vmatmul.mubr.msk.f32.gmra.mxu0 %vm276_vm2, %v5524_v57 }
 0x1ef   : > { %v1450_v12 = vpop.f32.mrf.mxu1  ;;  %3846 = vmatmul.mubr.msk.f32.gmra.mxu1 %vm276_vm2, %v5493_v7  ;;  %4266 = vmatprep.mubr.msk.f32.mxu0 %vm276_vm2, %v5526_v60 }
 0x1f0   : > { %v1600_v55 = vpop.f32.mrf.mxu0  ;;  %2952 = vmatprep.mubr.f32.mxu1 %v4338_v0 }
 0x1f1   : > { %v1451_v4 = vpop.f32.mrf.mxu1 }
 0x1f2   : > { %v4164_v56 = vpop.f32.mrf.mxu0  ;;  %4267 = vmatmul.mubr.msk.f32.gmra.mxu0 %vm276_vm2, %v5535_v5 }
 0x1f3   : > { %v1454_v39 = vpop.f32.mrf.mxu1  ;;  %3847 = vmatmul.mubr.msk.f32.gmra.mxu1 %vm276_vm2, %v5490_v63  ;;  %4269 = vmatprep.mubr.msk.f32.mxu0 %vm276_vm2, %v5543_v23 }
 0x1f4   : > { %v1608_v26 = vpop.f32.mrf.mxu0  ;;  %2956 = vmatprep.mubr.f32.mxu1 %v4338_v0 }
 0x1f5   : > { %v1455_v7 = vpop.f32.mrf.mxu1 }
 0x1f6   : > { %v4167_v14 = vpop.f32.mrf.mxu0  ;;  %4270 = vmatmul.mubr.msk.f32.gmra.mxu0 %vm276_vm2, %v5546_v8 }
 0x1f7   : > { %v1458_v43 = vpop.f32.mrf.mxu1  ;;  %3848 = vmatmul.mubr.msk.f32.gmra.mxu1 %vm276_vm2, %v5504_v35  ;;  %3301 = vmatprep.mubr.f32.mxu0 %v4338_v0  ;;  %v5766_v35 = vpop.permute.xlu1 %3160 }
 0x1f8   : > { %v1616_v63 = vpop.f32.mrf.mxu0  ;;  %2960 = vmatprep.mubr.f32.mxu1 %v4338_v0 }
 0x1f9   : > { %v1459_v22 = vpop.f32.mrf.mxu1 }
 0x1fa   : > { %v1803_v44 = vpop.f32.mrf.mxu0  ;;  %3876 = vmatmul.mubr.msk.f32.vlgmr.msra.gmra.mxu0 %vm276_vm2, %v5756_v61 }
 0x1fb   : > { %v5762_v6 = vadd.f32 %v1803_v44, %v5696_v41  ;;  %v1462_v52 = vpop.f32.mrf.mxu1  ;;  %3849 = vmatmul.mubr.msk.f32.gmra.mxu1 %vm276_vm2, %v5501_v20  ;;  %3307 = vmatprep.mubr.f32.mxu0 %v4338_v0  ;;  %v5778_v20 = vpop.permute.xlu0 %3162 }
 0x1fc   : > { %v1805_v17 = vpop.f32.mrf.mxu0  ;;  %2964 = vmatprep.mubr.f32.mxu1 %v4338_v0  ;;  %v5785_v13 = vpop.permute.xlu1 %3164 }
 0x1fd   : > { %v5771_v25 = vadd.f32 %v1805_v17, %v5707_v50  ;;  %v1463_v31 = vpop.f32.mrf.mxu1 }
 0x1fe   : > { %v1809_v58 = vpop.f32.mrf.mxu0  ;;  %3877 = vmatmul.mubr.msk.f32.gmra.mxu0 %vm276_vm2, %v5766_v35 }
 0x1ff   : > { %v1466_v11 = vpop.f32.mrf.mxu1  ;;  %3850 = vmatmul.mubr.msk.f32.gmra.mxu1 %vm276_vm2, %v5515_v59  ;;  %3311 = vmatprep.mubr.f32.mxu0 %v4338_v0  ;;  %v3167_v10 = vpop.permute.xlu0 %3166 }
 0x200   : > { %v1810_v28 = vpop.f32.mrf.mxu0  ;;  %2968 = vmatprep.mubr.f32.mxu1 %v4338_v0  ;;  %v3169_v41 = vpop.permute.xlu1 %3168 }
 0x201   : > { %v1467_v38 = vpop.f32.mrf.mxu1 }
 0x202   : > { %v1813_v62 = vpop.f32.mrf.mxu0  ;;  %3878 = vmatmul.mubr.msk.f32.gmra.mxu0 %vm276_vm2, %v5778_v20 }
 0x203   : > { %v1470_v33 = vpop.f32.mrf.mxu1  ;;  %3851 = vmatmul.mubr.msk.f32.gmra.mxu1 %vm276_vm2, %v5512_v2  ;;  %3315 = vmatprep.mubr.f32.mxu0 %v4338_v0  ;;  %v3171_v49 = vpop.permute.xlu0 %3170 }
 0x204   : > { %v1814_v59 = vpop.f32.mrf.mxu0  ;;  %2972 = vmatprep.mubr.f32.mxu1 %v4338_v0  ;;  %v3173_v15 = vpop.permute.xlu1 %3172 }
 0x205   : > { %v1471_v45 = vpop.f32.mrf.mxu1 }
 0x206   : > { %v1817_v42 = vpop.f32.mrf.mxu0  ;;  %3879 = vmatmul.mubr.msk.f32.gmra.mxu0 %vm276_vm2, %v5785_v13 }
 0x207   : > { %v1474_v37 = vpop.f32.mrf.mxu1  ;;  %3852 = vmatmul.mubr.msk.f32.gmra.mxu1 %vm276_vm2, %v5524_v57  ;;  %3319 = vmatprep.mubr.f32.mxu0 %v4338_v0  ;;  %v3175_v36 = vpop.permute.xlu0 %3174 }
 0x208   : > { %v1818_v2 = vpop.f32.mrf.mxu0  ;;  %2976 = vmatprep.mubr.f32.mxu1 %v4338_v0  ;;  %v3177_v40 = vpop.permute.xlu1 %3176 }
 0x209   : > { %v1475_v46 = vpop.f32.mrf.mxu1 }
 0x20a   : > { %v1821_v24 = vpop.f32.mrf.mxu0  ;;  %3880 = vmatmul.mubr.msk.f32.gmra.mxu0 %vm276_vm2, %v3167_v10 }
 0x20b   : > { %v1478_v1 = vpop.f32.mrf.mxu1  ;;  %3853 = vmatmul.mubr.msk.f32.gmra.mxu1 %vm276_vm2, %v5526_v60  ;;  %3323 = vmatprep.mubr.f32.mxu0 %v4338_v0  ;;  %v3179_v12 = vpop.permute.xlu0 %3178 }
 0x20c   : > { %v1822_v48 = vpop.f32.mrf.mxu0  ;;  %2980 = vmatprep.mubr.f32.mxu1 %v4338_v0 }
 0x20d   : > { %v1479_v57 = vpop.f32.mrf.mxu1 }
 0x20e   : > { %v1825_v29 = vpop.f32.mrf.mxu0  ;;  %3881 = vmatmul.mubr.msk.f32.gmra.mxu0 %vm276_vm2, %v3169_v41 }
 0x20f   : > { %v1482_v50 = vpop.f32.mrf.mxu1  ;;  %3854 = vmatmul.mubr.msk.f32.gmra.mxu1 %vm276_vm2, %v5535_v5  ;;  %3327 = vmatprep.mubr.f32.mxu0 %v4338_v0 }
 0x210   : > { %v1826_v21 = vpop.f32.mrf.mxu0  ;;  %2984 = vmatprep.mubr.f32.mxu1 %v4338_v0 }
 0x211   : > { %v1483_v60 = vpop.f32.mrf.mxu1 }
 0x212   : > { %v1829_v53 = vpop.f32.mrf.mxu0  ;;  %3882 = vmatmul.mubr.msk.f32.gmra.mxu0 %vm276_vm2, %v3171_v49 }
 0x213   : > { %v1486_v18 = vpop.f32.mrf.mxu1  ;;  %3855 = vmatmul.mubr.msk.f32.gmra.mxu1 %vm276_vm2, %v5543_v23  ;;  %3331 = vmatprep.mubr.f32.mxu0 %v4338_v0 }
 0x214   : > { %v1830_v30 = vpop.f32.mrf.mxu0  ;;  %2988 = vmatprep.mubr.f32.mxu1 %v4338_v0 }
 0x215   : > { %v1487_v5 = vpop.f32.mrf.mxu1 }
 0x216   : > { %v1833_v19 = vpop.f32.mrf.mxu0  ;;  %3883 = vmatmul.mubr.msk.f32.gmra.mxu0 %vm276_vm2, %v3173_v15 }
 0x217   : > { %v1490_v51 = vpop.f32.mrf.mxu1  ;;  %3856 = vmatmul.mubr.msk.f32.gmra.mxu1 %vm276_vm2, %v5546_v8  ;;  %3335 = vmatprep.mubr.f32.mxu0 %v4338_v0 }
 0x218   : > { %v1834_v27 = vpop.f32.mrf.mxu0  ;;  %4274 = vmatprep.mubr.msk.f32.mxu1 %vm276_vm2, %v5756_v61  ;;  %v3183_v61 = vpop.permute.xlu0 %3182 }
 0x219   : > { %v1491_v23 = vpop.f32.mrf.mxu1 }
 0x21a   : > { %v1837_v32 = vpop.f32.mrf.mxu0  ;;  %3884 = vmatmul.mubr.msk.f32.gmra.mxu0 %vm276_vm2, %v3175_v36 }
 0x21b   : > { %v4172_v54 = vpop.f32.mrf.mxu1  ;;  %4275 = vmatmul.mubr.msk.f32.vlgmr.msra.gmra.mxu1 %vm276_vm2, %v5766_v35  ;;  %3339 = vmatprep.mubr.f32.mxu0 %v4338_v0 }
 0x21c   : > { %v1838_v47 = vpop.f32.mrf.mxu0  ;;  %4277 = vmatprep.mubr.msk.f32.mxu1 %vm276_vm2, %v5778_v20  ;;  %v3187_v20 = vpop.permute.xlu0 %3186 }
 0x21d   : > { %v1934_v8 = vpop.f32.mrf.mxu1 }
 0x21e   : > { %v5823_v34 = vadd.f32 %v1934_v8, %v5703_v9  ;;  %v1841_v3 = vpop.f32.mrf.mxu0  ;;  %3885 = vmatmul.mubr.msk.f32.gmra.mxu0 %vm276_vm2, %v3177_v40  ;;  %v3181_v9 = vpop.permute.xlu1 %3180 }
 0x21f   : > { %v4175_v16 = vpop.f32.mrf.mxu1  ;;  %4278 = vmatmul.mubr.msk.f32.gmra.mxu1 %vm276_vm2, %v5785_v13  ;;  %3343 = vmatprep.mubr.f32.mxu0 %v4338_v0 }
 0x220   : > { %v1842_v55 = vpop.f32.mrf.mxu0  ;;  %4280 = vmatprep.mubr.msk.f32.mxu1 %vm276_vm2, %v3167_v10 }
 0x221   : > { %v1943_v4 = vpop.f32.mrf.mxu1 }
 0x222   : > { %v1845_v56 = vpop.f32.mrf.mxu0  ;;  %3886 = vmatmul.mubr.msk.f32.gmra.mxu0 %vm276_vm2, %v3179_v12  ;;  %v3185_v35 = vpop.permute.xlu1 %3184 }
 0x223   : > { %v4178_v39 = vpop.f32.mrf.mxu1  ;;  %4281 = vmatmul.mubr.msk.f32.gmra.mxu1 %vm276_vm2, %v3169_v41  ;;  %3347 = vmatprep.mubr.f32.mxu0 %v4338_v0 }
 0x224   : > { %v1846_v26 = vpop.f32.mrf.mxu0  ;;  %4283 = vmatprep.mubr.msk.f32.mxu1 %vm276_vm2, %v3171_v49 }
 0x225   : > { %v1951_v7 = vpop.f32.mrf.mxu1 }
 0x226   : > { %v1849_v14 = vpop.f32.mrf.mxu0  ;;  %3887 = vmatmul.mubr.msk.f32.gmra.mxu0 %vm276_vm2, %v3181_v9  ;;  %v3189_v13 = vpop.permute.xlu1 %3188 }
 0x227   : > { %v4181_v43 = vpop.f32.mrf.mxu1  ;;  %4284 = vmatmul.mubr.msk.f32.gmra.mxu1 %vm276_vm2, %v3173_v15  ;;  %3351 = vmatprep.mubr.f32.mxu0 %v4338_v0 }
 0x228   : > { %v1850_v63 = vpop.f32.mrf.mxu0  ;;  %4286 = vmatprep.mubr.msk.f32.mxu1 %vm276_vm2, %v3175_v36 }
 0x229   : > { %v1959_v22 = vpop.f32.mrf.mxu1 }
 0x22a   : > { %v1853_v44 = vpop.f32.mrf.mxu0  ;;  %3888 = vmatmul.mubr.msk.f32.gmra.mxu0 %vm276_vm2, %v3183_v61 }
 0x22b   : > { %v4184_v52 = vpop.f32.mrf.mxu1  ;;  %4287 = vmatmul.mubr.msk.f32.gmra.mxu1 %vm276_vm2, %v3177_v40  ;;  %3355 = vmatprep.mubr.f32.mxu0 %v4338_v0 }
 0x22c   : > { %v1854_v17 = vpop.f32.mrf.mxu0  ;;  %4289 = vmatprep.mubr.msk.f32.mxu1 %vm276_vm2, %v3179_v12 }
 0x22d   : > { %v1967_v31 = vpop.f32.mrf.mxu1 }
 0x22e   : > { %v1857_v58 = vpop.f32.mrf.mxu0  ;;  %3889 = vmatmul.mubr.msk.f32.gmra.mxu0 %vm276_vm2, %v3185_v35 }
 0x22f   : > { %v4187_v11 = vpop.f32.mrf.mxu1  ;;  %4290 = vmatmul.mubr.msk.f32.gmra.mxu1 %vm276_vm2, %v3181_v9  ;;  %3359 = vmatprep.mubr.f32.mxu0 %v4338_v0 }
 0x230   : > { %v1858_v28 = vpop.f32.mrf.mxu0  ;;  %4292 = vmatprep.mubr.msk.f32.mxu1 %vm276_vm2, %v3183_v61 }
 0x231   : > { %v1975_v38 = vpop.f32.mrf.mxu1 }
 0x232   : > { %v1861_v62 = vpop.f32.mrf.mxu0  ;;  %3890 = vmatmul.mubr.msk.f32.gmra.mxu0 %vm276_vm2, %v3187_v20 }
 0x233   : > { %v4190_v33 = vpop.f32.mrf.mxu1  ;;  %4293 = vmatmul.mubr.msk.f32.gmra.mxu1 %vm276_vm2, %v3185_v35  ;;  %3363 = vmatprep.mubr.f32.mxu0 %v4338_v0 }
 0x234   : > { %v1862_v59 = vpop.f32.mrf.mxu0  ;;  %4295 = vmatprep.mubr.msk.f32.mxu1 %vm276_vm2, %v3187_v20 }
 0x235   : > { %v1983_v45 = vpop.f32.mrf.mxu1 }
 0x236   : > { %v1865_v42 = vpop.f32.mrf.mxu0  ;;  %3891 = vmatmul.mubr.msk.f32.gmra.mxu0 %vm276_vm2, %v3189_v13 }
 0x237   : > { %v4193_v37 = vpop.f32.mrf.mxu1  ;;  %4296 = vmatmul.mubr.msk.f32.gmra.mxu1 %vm276_vm2, %v3189_v13 }
 0x238   : > { %v1866_v10 = vpop.f32.mrf.mxu0 }
 0x239   : > { %v1991_v2 = vpop.f32.mrf.mxu1 }
 0x23a   : > { %v4198_v46 = vpop.f32.mrf.mxu0 }
 0x23b   : > { %v2178_v24 = vpop.f32.mrf.mxu1 }
 0x23c   : > { %v2373_v1 = vadd.f32 %v2178_v24, %v5762_v6  ;;  %v2309_v41 = vpop.f32.mrf.mxu0 }
 0x23d   : > { %v5854_v48 = vadd.f32 %v2309_v41, %v5823_v34  ;;  %v2180_v0 = vpop.f32.mrf.mxu1 }
 0x23e   : > { %v2374_v57 = vadd.f32 %v2180_v0, %v5771_v25  ;;  %v4201_v29 = vpop.f32.mrf.mxu0 }
 0x23f   : > { %v2184_v50 = vpop.f32.mrf.mxu1 }
 0x240   : > { %v2318_v49 = vpop.f32.mrf.mxu0 }
 0x241   : > { %v2185_v21 = vpop.f32.mrf.mxu1 }
 0x242   : > { %v4204_v60 = vpop.f32.mrf.mxu0 }
 0x243   : > { %v2188_v53 = vpop.f32.mrf.mxu1 }
 0x244   : > { %v2326_v18 = vpop.f32.mrf.mxu0 }
 0x245   : > { %v2189_v15 = vpop.f32.mrf.mxu1 }
 0x246   : > { %v4207_v30 = vpop.f32.mrf.mxu0 }
 0x247   : > { %v2192_v5 = vpop.f32.mrf.mxu1 }
 0x248   : > { %v2334_v19 = vpop.f32.mrf.mxu0 }
 0x249   : > { %v2193_v51 = vpop.f32.mrf.mxu1 }
 0x24a   : > { %v4210_v6 = vpop.f32.mrf.mxu0 }
 0x24b   : > { %v2196_v36 = vpop.f32.mrf.mxu1 }
 0x24c   : > { %v2342_v27 = vpop.f32.mrf.mxu0 }
 0x24d   : > { %v2197_v23 = vpop.f32.mrf.mxu1 }
 0x24e   : > { %v4213_v32 = vpop.f32.mrf.mxu0 }
 0x24f   : > { %v2200_v54 = vpop.f32.mrf.mxu1 }
 0x250   : > { %v2350_v40 = vpop.f32.mrf.mxu0 }
 0x251   : > { %v2201_v25 = vpop.f32.mrf.mxu1 }
 0x252   : > { %v4216_v47 = vpop.f32.mrf.mxu0 }
 0x253   : > { %v2204_v8 = vpop.f32.mrf.mxu1 }
 0x254   : > { %v2358_v34 = vpop.f32.mrf.mxu0 }
 0x255   : > { %v2205_v3 = vpop.f32.mrf.mxu1 }
 0x256   : > { %v4219_v16 = vpop.f32.mrf.mxu0 }
 0x257   : > { %v2208_v12 = vpop.f32.mrf.mxu1 }
 0x258   : > { %v2366_v55 = vpop.f32.mrf.mxu0 }
 0x259   : > { %v2209_v4 = vpop.f32.mrf.mxu1 }
 0x25a   : > { %v2553_v56 = vpop.f32.mrf.mxu0 }
 0x25b   : > { %v5857_v39 = vadd.f32 %v2553_v56, %v2373_v1  ;;  %v2212_v9 = vpop.f32.mrf.mxu1 }
 0x25c   : > { %v2555_v26 = vpop.f32.mrf.mxu0 }
 0x25d   : > { %v5859_v7 = vadd.f32 %v2555_v26, %v2374_v57  ;;  %v2213_v14 = vpop.f32.mrf.mxu1 }
 0x25e   : > { %v2559_v43 = vpop.f32.mrf.mxu0 }
 0x25f   : > { %v2216_v61 = vpop.f32.mrf.mxu1 }
 0x260   : > { %v2560_v63 = vpop.f32.mrf.mxu0 }
 0x261   : > { %v2217_v22 = vpop.f32.mrf.mxu1 }
 0x262   : > { %v2563_v44 = vpop.f32.mrf.mxu0 }
 0x263   : > { %v2220_v52 = vpop.f32.mrf.mxu1 }
 0x264   : > { %v2564_v35 = vpop.f32.mrf.mxu0 }
 0x265   : > { %v2221_v17 = vpop.f32.mrf.mxu1 }
 0x266   : > { %v2567_v31 = vpop.f32.mrf.mxu0 }
 0x267   : > { %v2224_v58 = vpop.f32.mrf.mxu1 }
 0x268   : > { %v2568_v11 = vpop.f32.mrf.mxu0 }
 0x269   : > { %v2225_v20 = vpop.f32.mrf.mxu1 }
 0x26a   : > { %v2571_v28 = vpop.f32.mrf.mxu0 }
 0x26b   : > { %v2228_v38 = vpop.f32.mrf.mxu1 }
 0x26c   : > { %v2572_v62 = vpop.f32.mrf.mxu0 }
 0x26d   : > { %v2229_v33 = vpop.f32.mrf.mxu1 }
 0x26e   : > { %v2575_v13 = vpop.f32.mrf.mxu0 }
 0x26f   : > { %v2232_v59 = vpop.f32.mrf.mxu1 }
 0x270   : > { %v2576_v45 = vpop.f32.mrf.mxu0 }
 0x271   : > { %v2233_v42 = vpop.f32.mrf.mxu1 }
 0x272   : > { %v2579_v37 = vpop.f32.mrf.mxu0 }
 0x273   : > { %v2236_v10 = vpop.f32.mrf.mxu1 }
 0x274   : > { %v2580_v2 = vpop.f32.mrf.mxu0 }
 0x275   : > { %v2237_v46 = vpop.f32.mrf.mxu1 }
 0x276   : > { %v2583_v24 = vpop.f32.mrf.mxu0 }
 0x277   : > { %v2240_v1 = vpop.f32.mrf.mxu1 }
 0x278   : > { %v2584_v41 = vpop.f32.mrf.mxu0 }
 0x279   : > { %v2241_v0 = vpop.f32.mrf.mxu1 }
 0x27a   : > { %v2587_v57 = vpop.f32.mrf.mxu0 }
 0x27b   : > { %v4224_v29 = vpop.f32.mrf.mxu1 }
 0x27c   : > { %v2588_v50 = vpop.f32.mrf.mxu0 }
 0x27d   : > { %v2684_v49 = vpop.f32.mrf.mxu1 }
 0x27e   : > { %v5862_v21 = vadd.f32 %v2684_v49, %v5854_v48  ;;  %v2591_v60 = vpop.f32.mrf.mxu0 }
 0x27f   : > { %v4227_v53 = vpop.f32.mrf.mxu1 }
 0x280   : > { %v2592_v18 = vpop.f32.mrf.mxu0 }
 0x281   : > { %v2693_v15 = vpop.f32.mrf.mxu1 }
 0x282   : > { %v2595_v30 = vpop.f32.mrf.mxu0 }
 0x283   : > { %v4230_v5 = vpop.f32.mrf.mxu1 }
 0x284   : > { %v2596_v19 = vpop.f32.mrf.mxu0 }
 0x285   : > { %v2701_v51 = vpop.f32.mrf.mxu1 }
 0x286   : > { %v2599_v6 = vpop.f32.mrf.mxu0 }
 0x287   : > { %v4233_v36 = vpop.f32.mrf.mxu1  ;;  %v3514_v6 = vpop.permute.xlu0 %3513 }
 0x288   : > { %v2600_v27 = vpop.f32.mrf.mxu0 }
 0x289   : > { %v2709_v23 = vpop.f32.mrf.mxu1 }
 0x28a   : > { %v2603_v32 = vpop.f32.mrf.mxu0 }
 0x28b   : > { %v4236_v54 = vpop.f32.mrf.mxu1 }
 0x28c   : > { %v2604_v40 = vpop.f32.mrf.mxu0  ;;  %v3523_v54 = vpop.permute.xlu1 %3522 }
 0x28d   : > { %v2717_v25 = vpop.f32.mrf.mxu1 }
 0x28e   : > { %v2607_v47 = vpop.f32.mrf.mxu0 }
 0x28f   : > { %v4239_v8 = vpop.f32.mrf.mxu1 }
 0x290   : > { %v2608_v48 = vpop.f32.mrf.mxu0 }
 0x291   : > { %v2725_v34 = vpop.f32.mrf.mxu1 }
 0x292   : > { %v2611_v3 = vpop.f32.mrf.mxu0 }
 0x293   : > { %v4242_v16 = vpop.f32.mrf.mxu1 }
 0x294   : > { %v2612_v12 = vpop.f32.mrf.mxu0 }
 0x295   : > { %v2733_v55 = vpop.f32.mrf.mxu1 }
 0x296   : > { %v2615_v4 = vpop.f32.mrf.mxu0 }
 0x297   : > { %v4245_v56 = vpop.f32.mrf.mxu1 }
 0x298   : > { %v2616_v9 = vpop.f32.mrf.mxu0 }
 0x299   : > { %v2741_v26 = vpop.f32.mrf.mxu1 }
 0x29a   : > { %v4250_v14 = vpop.f32.mrf.mxu0 }
 0x29b   : > { %v2928_v43 = vpop.f32.mrf.mxu1 }
 0x29c   : > { %v5864_v61 = vpop.f32.mrf.mxu0  ;;  %v3123_v50 = vadd.f32 %v2928_v43, %v5857_v39 }
 0x29d   : > { %v2930_v63 = vpop.f32.mrf.mxu1 }
 0x29e   : > { %v4253_v22 = vpop.f32.mrf.mxu0  ;;  %v3124_v53 = vadd.f32 %v2930_v63, %v5859_v7 }
 0x29f   : > { %v2934_v44 = vpop.f32.mrf.mxu1 }
 0x2a0   : > { %v3068_v52 = vpop.f32.mrf.mxu0 }
 0x2a1   : > { %v2935_v35 = vpop.f32.mrf.mxu1 }
 0x2a2   : > { %v4256_v17 = vpop.f32.mrf.mxu0 }
 0x2a3   : > { %v2938_v31 = vpop.f32.mrf.mxu1 }
 0x2a4   : > { %v3076_v58 = vpop.f32.mrf.mxu0 }
 0x2a5   : > { %v2939_v11 = vpop.f32.mrf.mxu1 }
 0x2a6   : > { %v4259_v20 = vpop.f32.mrf.mxu0 }
 0x2a7   : > { %v2942_v28 = vpop.f32.mrf.mxu1 }
 0x2a8   : > { %v3084_v38 = vpop.f32.mrf.mxu0 }
 0x2a9   : > { %v2943_v62 = vpop.f32.mrf.mxu1 }
 0x2aa   : > { %v4262_v33 = vpop.f32.mrf.mxu0 }
 0x2ab   : > { %v2946_v13 = vpop.f32.mrf.mxu1 }
 0x2ac   : > { %v3092_v59 = vpop.f32.mrf.mxu0 }
 0x2ad   : > { %v2947_v45 = vpop.f32.mrf.mxu1  ;;  %v3125_v59 = vadd.f32 %v5864_v61, %v5862_v21 }
 0x2ae   : > { %v4265_v42 = vpop.f32.mrf.mxu0 }
 0x2af   : > { %v2950_v37 = vpop.f32.mrf.mxu1 }
 0x2b0   : > { %v3100_v10 = vpop.f32.mrf.mxu0 }
 0x2b1   : > { %v2951_v2 = vpop.f32.mrf.mxu1 }
 0x2b2   : > { %v4268_v46 = vpop.f32.mrf.mxu0 }
 0x2b3   : > { %v2954_v24 = vpop.f32.mrf.mxu1 }
 0x2b4   : > { %v3108_v1 = vpop.f32.mrf.mxu0 }
 0x2b5   : > { %v2955_v41 = vpop.f32.mrf.mxu1 }
 0x2b6   : > { %v4271_v0 = vpop.f32.mrf.mxu0 }
 0x2b7   : > { %v2958_v57 = vpop.f32.mrf.mxu1 }
 0x2b8   : > { %v3116_v29 = vpop.f32.mrf.mxu0 }
 0x2b9   : > { %v2959_v49 = vpop.f32.mrf.mxu1 }
 0x2ba   : > { %v3303_v60 = vpop.f32.mrf.mxu0 }
 0x2bb   : > { %v3498_v18 = vadd.f32 %v3303_v60, %v3123_v50  ;;  %v2962_v15 = vpop.f32.mrf.mxu1 }
 0x2bc   : > { %v3305_v30 = vpop.f32.mrf.mxu0 }
 0x2bd   : > { %v3504_v5 = vmul.f32 0.1, %v3498_v18  ;;  %v3499_v19 = vadd.f32 %v3305_v30, %v3124_v53  ;;  %v2963_v51 = vpop.f32.mrf.mxu1  ;;  %vm3501_vm10 = vcmp.gt.f32.partialorder %v3498_v18, 0.0 }
 0x2be   : > { %v3309_v36 = vpop.f32.mrf.mxu0 }
 0x2bf   : > { %v3505_v27 = vmul.f32 0.1, %v3499_v19  ;;  %v2966_v23 = vpop.f32.mrf.mxu1  ;;  %vm3502_vm11 = vcmp.gt.f32.partialorder %v3499_v19, 0.0  ;;  %v3507_v32 = vsel %vm3501_vm10, %v3498_v18, %v3504_v5 }
 0x2c0   : > { %v3516_v39 = vmul.f32 %v3514_v6, %v3507_v32  ;;  %v3310_v40 = vpop.f32.mrf.mxu0 }
 0x2c1   : > { %v3508_v25 = vsel %vm3502_vm11, %v3499_v19, %v3505_v27  ;;  %v2967_v7 = vpop.f32.mrf.mxu1 }
 0x2c2   : > { %v3517_v47 = vmul.f32 %v3514_v6, %v3508_v25  ;;  %v3525_v8 = vadd.f32 %v3523_v54, %v3516_v39  ;;  %v3313_v48 = vpop.f32.mrf.mxu0 }
 0x2c3   : > { %v2970_v34 = vpop.f32.mrf.mxu1 }
 0x2c4   : > { %v3526_v3 = vadd.f32 %v3523_v54, %v3517_v47  ;;  %3528 = vst [vmem:[%s5872_s9] sm:$0xff] %v3525_v8  ;;  %v3314_v16 = vpop.f32.mrf.mxu0 }
 0x2c5   : > { %v2971_v12 = vpop.f32.mrf.mxu1 }
 0x2c6   : > { %3529 = vst [vmem:[%s5872_s9 + $0x8] sm:$0xff] %v3526_v3  ;;  %v3317_v55 = vpop.f32.mrf.mxu0 }
 0x2c7   : > { %v2974_v4 = vpop.f32.mrf.mxu1 }
 0x2c8   : > { %v3318_v56 = vpop.f32.mrf.mxu0 }
 0x2c9   : > { %v2975_v9 = vpop.f32.mrf.mxu1 }
 0x2ca   : > { %v3321_v26 = vpop.f32.mrf.mxu0 }
 0x2cb   : > { %v2978_v14 = vpop.f32.mrf.mxu1 }
 0x2cc   : > { %v3322_v43 = vpop.f32.mrf.mxu0 }
 0x2cd   : > { %v2979_v63 = vpop.f32.mrf.mxu1 }
 0x2ce   : > { %v3325_v22 = vpop.f32.mrf.mxu0 }
 0x2cf   : > { %v2982_v44 = vpop.f32.mrf.mxu1 }
 0x2d0   : > { %v3326_v52 = vpop.f32.mrf.mxu0 }
 0x2d1   : > { %v2983_v35 = vpop.f32.mrf.mxu1 }
 0x2d2   : > { %v3329_v17 = vpop.f32.mrf.mxu0 }
 0x2d3   : > { %v2986_v31 = vpop.f32.mrf.mxu1 }
 0x2d4   : > { %v3330_v58 = vpop.f32.mrf.mxu0 }
 0x2d5   : > { %v2987_v11 = vpop.f32.mrf.mxu1 }
 0x2d6   : > { %v3333_v20 = vpop.f32.mrf.mxu0 }
 0x2d7   : > { %v2990_v28 = vpop.f32.mrf.mxu1 }
 0x2d8   : > { %v3334_v38 = vpop.f32.mrf.mxu0 }
 0x2d9   : > { %v2991_v62 = vpop.f32.mrf.mxu1 }
 0x2da   : > { %v3337_v33 = vpop.f32.mrf.mxu0 }
 0x2db   : > { %v4276_v13 = vpop.f32.mrf.mxu1 }
 0x2dc   : > { %v3338_v45 = vpop.f32.mrf.mxu0 }
 0x2dd   : > { %v3434_v42 = vpop.f32.mrf.mxu1 }
 0x2de   : > { %v3500_v37 = vadd.f32 %v3434_v42, %v3125_v59  ;;  %v3341_v10 = vpop.f32.mrf.mxu0 }
 0x2df   : > { %v4279_v2 = vpop.f32.mrf.mxu1 }
 0x2e0   : > { %vm3503_vm12 = vcmp.gt.f32.partialorder %v3500_v37, 0.0  ;;  %v3506_v46 = vmul.f32 0.1, %v3500_v37  ;;  %v3342_v24 = vpop.f32.mrf.mxu0 }
 0x2e1   : > { %v3443_v1 = vpop.f32.mrf.mxu1 }
 0x2e2   : > { %v3509_v41 = vsel %vm3503_vm12, %v3500_v37, %v3506_v46  ;;  %v3345_v0 = vpop.f32.mrf.mxu0 }
 0x2e3   : > { %v3518_v57 = vmul.f32 %v3514_v6, %v3509_v41  ;;  %v4282_v29 = vpop.f32.mrf.mxu1 }
 0x2e4   : > { %v3346_v50 = vpop.f32.mrf.mxu0 }
 0x2e5   : > { %v3527_v49 = vadd.f32 %v3523_v54, %v3518_v57  ;;  %v3451_v60 = vpop.f32.mrf.mxu1 }
 0x2e6   : > { %v3349_v53 = vpop.f32.mrf.mxu0 }
 0x2e7   : > { %3531 = vst.msk [vmem:[%s5872_s9 + $0x10] sm:$0xff] %vm3530_vm13, %v3527_v49  ;;  %v4285_v21 = vpop.f32.mrf.mxu1 }
 0x2e8   : > { %v3350_v61 = vpop.f32.mrf.mxu0 }
 0x2e9   : > { %v3459_v18 = vpop.f32.mrf.mxu1 }
 0x2ea   : > { %v3353_v15 = vpop.f32.mrf.mxu0 }
 0x2eb   : > { %v4288_v30 = vpop.f32.mrf.mxu1 }
 0x2ec   : > { %v3354_v5 = vpop.f32.mrf.mxu0 }
 0x2ed   : > { %v3467_v19 = vpop.f32.mrf.mxu1 }
 0x2ee   : > { %v3357_v51 = vpop.f32.mrf.mxu0 }
 0x2ef   : > { %v4291_v36 = vpop.f32.mrf.mxu1 }
 0x2f0   : > { %v3358_v27 = vpop.f32.mrf.mxu0 }
 0x2f1   : > { %v3475_v23 = vpop.f32.mrf.mxu1 }
 0x2f2   : > { %v3361_v32 = vpop.f32.mrf.mxu0 }
 0x2f3   : > { %v4294_v6 = vpop.f32.mrf.mxu1 }
 0x2f4   : > { %v3362_v39 = vpop.f32.mrf.mxu0 }
 0x2f5   : > { %v3483_v40 = vpop.f32.mrf.mxu1 }
 0x2f6   : > { %v3365_v25 = vpop.f32.mrf.mxu0 }
 0x2f7   : > { %v4297_v54 = vpop.f32.mrf.mxu1 }
 0x2f8   : > { %v3366_v7 = vpop.f32.mrf.mxu0 }
 0x2f9   : > { %v3491_v47 = vpop.f32.mrf.mxu1 }
 0x2fa PF: > { %s14_s15 = sadd.s32 1, %s4336_s15  }
 0x2fb   : > { %p11_p4 = scmp.ge.s32.totalorder %s14_s15, 4  }
 0x2fd   :  { %13 = sbr.rel (!%p11_p4) target bundleno = 1 (0x1), region = 66 }

// kernel: one_node_forward.2
= control target key start
LH: loop header
LB: loop body
LE: loop exit
PB: predicated region body
PF: predicated region fallthrough
CT: control target
= control target key end

     0   :  { %s5566_s15 = smov 0   ;;  %s8403_s0 = inlined_call_operand.vmem [shape: f32[2,4,332], index: 0, kind: input, shape index: {}]   ;;  %s8404_s1 = inlined_call_operand.vmem [shape: f32[128,36], index: 1, kind: input, shape index: {}]   ;;  %s8405_s2 = inlined_call_operand.vmem [shape: f32[1,288], index: 2, kind: input, shape index: {}]   ;;  %s8406_s3 = inlined_call_operand.vmem [shape: f32[2,128,1], index: 3, kind: output, shape index: {0}]   ;;  %s8407_s4 = inlined_call_operand.vmem [shape: f32[2,128,1], index: 4, kind: output, shape index: {1}]  }
   0x1 LB: > { %s4773_s16 = sadd.s32 4294967295, %s5523_s15   ;;  %p4777_p0 = scmp.ge.s32.totalorder %s5523_s15, 1  ;;  %s5523_s15 = sphi %s5566_s15, %s15_s15  }
   0x2   : > { %p165_p1 = scmp.lt.s32.totalorder %s5523_s15, 3 }
   0x4   : > { %p166_p2 = pnand %p4777_p0, %p165_p1 }
   0x6   : > { %169 = sbr.rel (%p166_p2) target bundleno = 969 (0x3c9), region = 32 }
   0xb   : > { %p196_p3 = scmp.lt.s32.totalorder %s4773_s16, 1  ;;  %v8425_v0 = vmov 0.0   ;;  %s5526_s21 = smov 127   ;;  %v5595_v4 = vld [vmem:[%s8404_s1] sm:$0xff]  ;;  %v5608_v6 = vld [vmem:[%s8404_s1 + $0x8] sm:$0xff]  ;;  %v5622_v8 = vld [vmem:[%s8404_s1 + $0x10] sm:$0xff] }
   0xc   : > { %393 = vmatprep.mubr.f32.mxu0 %v8425_v0  ;;  %465 = vmatprep.mubr.f32.mxu1 %v8425_v0  ;;  %s5527_s24 = smov 124   ;;  %v5603_v5 = vld [vmem:[%s8404_s1 + $0x60] sm:$0xff]  ;;  %v5617_v7 = vld [vmem:[%s8404_s1 + $0x68] sm:$0xff]  ;;  %v5631_v9 = vld [vmem:[%s8404_s1 + $0x70] sm:$0xff]  ;;  %s5528_s6 = smov 126   ;;  %vm286_vm0 = vcmask 1039360  }
   0xd   : > { %s8584_s16 = smov (!%p196_p3, %s4773_s16), 1  ;;  %v5636_v10 = vld [vmem:[%s8404_s1 + $0x18] sm:$0xff]  ;;  %v5650_v12 = vld [vmem:[%s8404_s1 + $0x20] sm:$0xff]  ;;  %v5659_v13 = vld [vmem:[%s8404_s1 + $0x28] sm:$0xff]  ;;  %s5529_s7 = smov 120   ;;  %vm322_vm1 = vcmask 1043456  }
   0xe   : > { %s5491_s17 = smul.u32 12, %s8584_s16  ;;  %v5645_v11 = vld [vmem:[%s8404_s1 + $0x78] sm:$0xff]  ;;  %v5664_v14 = vld [vmem:[%s8404_s1 + $0x30] sm:$0xff]  ;;  %v5678_v16 = vld [vmem:[%s8404_s1 + $0x40] sm:$0xff]  ;;  %s5531_s8 = smov 116   ;;  %vm289_vm2 = vcmask 31744  }
   0xf   : > { %v5673_v15 = vld [vmem:[%s8404_s1 + $0x38] sm:$0xff]  ;;  %v5687_v17 = vld [vmem:[%s8404_s1 + $0x48] sm:$0xff]  ;;  %v5692_v18 = vld [vmem:[%s8404_s1 + $0x50] sm:$0xff]  ;;  %s5532_s9 = smov 109   ;;  %s5533_s10 = smov 112   ;;  %vm1049_vm3 = vcmask 1031168  }
  0x10   : > { %s200_s20 = scalar_lea.vmem %s8403_s0, %s5491_s17  ;;  %v5701_v19 = vld [vmem:[%s8404_s1 + $0x58] sm:$0xff]  ;;  %s5534_s11 = smov 108   ;;  %vm1514_vm4 = vcmask 900096   ;;  %vm1979_vm5 = vcmask 891904   ;;  %vm2444_vm6 = vcmask 883712   ;;  %vm2909_vm7 = vcmask 752640  }
  0x11   : > { %v5582_v1 = vld [vmem:[%s200_s20 + $0x8] sm:$0xf]  ;;  %v5584_v2 = vld [vmem:[%s200_s20] sm:$0xff]  ;;  %s5535_s12 = smov 92   ;;  %s5536_s13 = smov 104   ;;  %vm3374_vm8 = vcmask 744448  }
  0x12   : > { %284 = vrot.lane.b32.xlu0 %v5582_v1, %s5526_s21  ;;  %280 = vrot.lane.b32.xlu1 %v5584_v2, %s5526_s21  ;;  %v5590_v3 = vcombine.high %v5584_v2, %v5584_v2  ;;  %s5537_s14 = smov 91   ;;  %s5539_s28 = smov 90   ;;  %vm3839_vm9 = vcmask 736256  }
  0x13   : > { %s5100_s5 = sshll.u32 %s8584_s16, 7 }
  0x16   : > { %282 = vrot.lane.b32.xlu0 %v5590_v3, %s5526_s21  ;;  %245 = vrot.lane.b32.xlu1 %v5595_v4, %s5527_s24  ;;  %s5538_s21 = smov 100  }
  0x1a   : > { %269 = vrot.lane.b32.xlu0 %v5603_v5, %s5527_s24  ;;  %247 = vrot.lane.b32.xlu1 %v5608_v6, %s5527_s24 }
  0x1e   : > { %271 = vrot.lane.b32.xlu0 %v5617_v7, %s5527_s24  ;;  %249 = vrot.lane.b32.xlu1 %v5622_v8, %s5527_s24 }
  0x22   : > { %273 = vrot.lane.b32.xlu0 %v5631_v9, %s5527_s24  ;;  %251 = vrot.lane.b32.xlu1 %v5636_v10, %s5527_s24 }
  0x26   : > { %275 = vrot.lane.b32.xlu0 %v5645_v11, %s5527_s24  ;;  %253 = vrot.lane.b32.xlu1 %v5650_v12, %s5527_s24 }
  0x2a   : > { %255 = vrot.lane.b32.xlu0 %v5659_v13, %s5527_s24  ;;  %257 = vrot.lane.b32.xlu1 %v5664_v14, %s5527_s24 }
  0x2e   : > { %259 = vrot.lane.b32.xlu0 %v5673_v15, %s5527_s24  ;;  %261 = vrot.lane.b32.xlu1 %v5678_v16, %s5527_s24 }
  0x32   : > { %263 = vrot.lane.b32.xlu0 %v5687_v17, %s5527_s24  ;;  %265 = vrot.lane.b32.xlu1 %v5692_v18, %s5527_s24 }
  0x36   : > { %267 = vrot.lane.b32.xlu0 %v5701_v19, %s5527_s24  ;;  %1045 = vrot.lane.b32.xlu1 %v5590_v3, %s5528_s6  ;;  %s5530_s24 = smov 110  }
  0x3a   : > { %1047 = vrot.lane.b32.xlu0 %v5582_v1, %s5528_s6  ;;  %1043 = vrot.lane.b32.xlu1 %v5584_v2, %s5528_s6 }
  0x3e   : > { %1013 = vrot.lane.b32.xlu1 %v5608_v6, %s5529_s7  ;;  %1011 = vrot.lane.b32.xlu0 %v5595_v4, %s5529_s7 }
  0x42   : > { %1017 = vrot.lane.b32.xlu1 %v5636_v10, %s5529_s7  ;;  %1015 = vrot.lane.b32.xlu0 %v5622_v8, %s5529_s7 }
  0x46   : > { %1021 = vrot.lane.b32.xlu1 %v5659_v13, %s5529_s7  ;;  %1019 = vrot.lane.b32.xlu0 %v5650_v12, %s5529_s7 }
  0x4a   : > { %1025 = vrot.lane.b32.xlu1 %v5673_v15, %s5529_s7  ;;  %1023 = vrot.lane.b32.xlu0 %v5664_v14, %s5529_s7 }
  0x4e   : > { %1029 = vrot.lane.b32.xlu1 %v5687_v17, %s5529_s7  ;;  %1027 = vrot.lane.b32.xlu0 %v5678_v16, %s5529_s7 }
  0x52   : > { %1033 = vrot.lane.b32.xlu1 %v5701_v19, %s5529_s7  ;;  %1031 = vrot.lane.b32.xlu0 %v5692_v18, %s5529_s7 }
  0x56   : > { %1037 = vrot.lane.b32.xlu1 %v5617_v7, %s5529_s7  ;;  %1035 = vrot.lane.b32.xlu0 %v5603_v5, %s5529_s7 }
  0x5a   : > { %1041 = vrot.lane.b32.xlu1 %v5645_v11, %s5529_s7  ;;  %1039 = vrot.lane.b32.xlu0 %v5631_v9, %s5529_s7 }
  0x5e   : > { %1512 = vrot.lane.b32.xlu1 %v5582_v1, %s5530_s24  ;;  %1510 = vrot.lane.b32.xlu0 %v5590_v3, %s5530_s24 }
  0x62   : > { %1508 = vrot.lane.b32.xlu1 %v5584_v2, %s5530_s24  ;;  %1476 = vrot.lane.b32.xlu0 %v5595_v4, %s5531_s8  ;;  %s8329_s24 = scalar_lea.vmem %s8406_s3, %s5100_s5 }
  0x66   : > { %1478 = vrot.lane.b32.xlu0 %v5608_v6, %s5531_s8  ;;  %1480 = vrot.lane.b32.xlu1 %v5622_v8, %s5531_s8 }
  0x6a   : > { %1482 = vrot.lane.b32.xlu0 %v5636_v10, %s5531_s8  ;;  %1484 = vrot.lane.b32.xlu1 %v5650_v12, %s5531_s8 }
  0x6e   : > { %1486 = vrot.lane.b32.xlu0 %v5659_v13, %s5531_s8  ;;  %1488 = vrot.lane.b32.xlu1 %v5664_v14, %s5531_s8 }
  0x72   : > { %1490 = vrot.lane.b32.xlu0 %v5673_v15, %s5531_s8  ;;  %1492 = vrot.lane.b32.xlu1 %v5678_v16, %s5531_s8 }
  0x76   : > { %1494 = vrot.lane.b32.xlu0 %v5687_v17, %s5531_s8  ;;  %1496 = vrot.lane.b32.xlu1 %v5692_v18, %s5531_s8 }
  0x7a   : > { %1498 = vrot.lane.b32.xlu0 %v5701_v19, %s5531_s8  ;;  %1500 = vrot.lane.b32.xlu1 %v5603_v5, %s5531_s8 }
  0x7e   : > { %1502 = vrot.lane.b32.xlu0 %v5617_v7, %s5531_s8  ;;  %1504 = vrot.lane.b32.xlu1 %v5631_v9, %s5531_s8 }
  0x82   : > { %1506 = vrot.lane.b32.xlu0 %v5645_v11, %s5531_s8  ;;  %1975 = vrot.lane.b32.xlu1 %v5590_v3, %s5532_s9 }
  0x84   : > { %v285_v20 = vpop.permute.xlu0 %284  ;;  %v281_v21 = vpop.permute.xlu1 %280 }
  0x86   : > { %1977 = vrot.lane.b32.xlu0 %v5582_v1, %s5532_s9  ;;  %1973 = vrot.lane.b32.xlu1 %v5584_v2, %s5532_s9 }
  0x88   : > { %v283_v22 = vpop.permute.xlu0 %282  ;;  %v246_v23 = vpop.permute.xlu1 %245 }
  0x89   : > { %v288_v24 = vsel %vm286_vm0, %v283_v22, %v285_v20  ;;  %v287_v25 = vsel %vm286_vm0, %v281_v21, %v283_v22 }
  0x8a   : > { %4783 = vmatprep.subr.msk.mxu0 %vm322_vm1, %v288_v24  ;;  %5489 = vmatprep.subr.msk.mxu1 %vm322_vm1, %v288_v24 }
  0x8b   : > { %4784 = vmatpush1.msk.msra.mxu0 %vm322_vm1, %v287_v25  ;;  %5490 = vmatpush1.msk.msra.mxu1 %vm322_vm1, %v287_v25 }
  0x8c   : > { %4785 = vmatmul.mubr.msk.f32.vlgmr.msra.gmra.mxu0 %vm289_vm2, %v246_v23  ;;  %5255 = vmatprep.subr.msk.mxu1 %vm322_vm1, %v285_v20  ;;  %v5752_v26 = vpop.permute.xlu0 %269  ;;  %v248_v27 = vpop.permute.xlu1 %247 }
  0x8d   : > { %4797 = vmatmul.mubr.msk.f32.vlgmr.msra.gmra.mxu1 %vm289_vm2, %v5752_v26  ;;  %399 = vmatprep.mubr.f32.mxu0 %v8425_v0 }
  0x8e   : > { %5256 = vmatpush3.msk.msra.mxu1 %vm322_vm1, %v285_v20  ;;  %471 = vmatprep.mubr.f32.mxu1 %v8425_v0 }
  0x8f   : > { %4818 = vmatprep.subr.msk.mxu1 %vm322_vm1, %v5590_v3  ;;  %5281 = vmatprep.subr.msk.mxu0 %vm322_vm1, %v5582_v1 }
  0x90   : > { %4786 = vmatmul.mubr.msk.f32.gmra.mxu0 %vm289_vm2, %v248_v27  ;;  %v5764_v28 = vpop.permute.xlu0 %271  ;;  %v250_v29 = vpop.permute.xlu1 %249  ;;  %1943 = vrot.lane.b32.xlu1 %v5608_v6, %s5533_s10 }
  0x91   : > { %4798 = vmatmul.mubr.msk.f32.gmra.mxu1 %vm289_vm2, %v5764_v28  ;;  %405 = vmatprep.mubr.f32.mxu0 %v8425_v0 }
  0x92   : > { %477 = vmatprep.mubr.f32.mxu1 %v8425_v0  ;;  %5282 = vmatpush3.msk.msra.mxu0 %vm322_vm1, %v5582_v1 }
  0x93   : > { %1941 = vrot.lane.b32.xlu0 %v5595_v4, %s5533_s10 }
  0x94   : > { %4787 = vmatmul.mubr.msk.f32.gmra.mxu0 %vm289_vm2, %v250_v29  ;;  %v5777_v30 = vpop.permute.xlu0 %273  ;;  %v252_v31 = vpop.permute.xlu1 %251  ;;  %1947 = vrot.lane.b32.xlu1 %v5636_v10, %s5533_s10 }
  0x95   : > { %4799 = vmatmul.mubr.msk.f32.gmra.mxu1 %vm289_vm2, %v5777_v30  ;;  %411 = vmatprep.mubr.f32.mxu0 %v8425_v0 }
  0x96   : > { %483 = vmatprep.mubr.f32.mxu1 %v8425_v0 }
  0x97   : > { %1945 = vrot.lane.b32.xlu0 %v5622_v8, %s5533_s10 }
  0x98   : > { %4788 = vmatmul.mubr.msk.f32.gmra.mxu0 %vm289_vm2, %v252_v31  ;;  %v5788_v32 = vpop.permute.xlu0 %275  ;;  %v254_v33 = vpop.permute.xlu1 %253  ;;  %1951 = vrot.lane.b32.xlu1 %v5659_v13, %s5533_s10 }
  0x99   : > { %4800 = vmatmul.mubr.msk.f32.gmra.mxu1 %vm289_vm2, %v5788_v32  ;;  %417 = vmatprep.mubr.f32.mxu0 %v8425_v0 }
  0x9a   : > { %5257 = vmatprep.mubr.msk.f32.mxu1 %vm289_vm2, %v246_v23 }
  0x9b   : > { %1949 = vrot.lane.b32.xlu0 %v5650_v12, %s5533_s10 }
  0x9c   : > { %4789 = vmatmul.mubr.msk.f32.gmra.mxu0 %vm289_vm2, %v254_v33  ;;  %v256_v34 = vpop.permute.xlu0 %255  ;;  %v258_v35 = vpop.permute.xlu1 %257  ;;  %1955 = vrot.lane.b32.xlu1 %v5673_v15, %s5533_s10 }
  0x9d   : > { %5258 = vmatmul.mubr.msk.f32.vlgmr.msra.gmra.mxu1 %vm289_vm2, %v248_v27  ;;  %423 = vmatprep.mubr.f32.mxu0 %v8425_v0 }
  0x9e   : > { %4819 = vmatpush1.msk.msra.mxu1 %vm322_vm1, %v5584_v2  ;;  %5260 = vmatprep.mubr.msk.f32.mxu1 %vm289_vm2, %v250_v29 }
  0x9f   : > { %1953 = vrot.lane.b32.xlu0 %v5664_v14, %s5533_s10 }
  0xa0   : > { %4790 = vmatmul.mubr.msk.f32.gmra.mxu0 %vm289_vm2, %v256_v34  ;;  %v260_v36 = vpop.permute.xlu0 %259  ;;  %v262_v37 = vpop.permute.xlu1 %261  ;;  %1959 = vrot.lane.b32.xlu1 %v5687_v17, %s5533_s10 }
  0xa1   : > { %5261 = vmatmul.mubr.msk.f32.gmra.mxu1 %vm289_vm2, %v252_v31  ;;  %429 = vmatprep.mubr.f32.mxu0 %v8425_v0 }
  0xa2   : > { %5263 = vmatprep.mubr.msk.f32.mxu1 %vm289_vm2, %v254_v33 }
  0xa3   : > { %1957 = vrot.lane.b32.xlu0 %v5678_v16, %s5533_s10 }
  0xa4   : > { %4791 = vmatmul.mubr.msk.f32.gmra.mxu0 %vm289_vm2, %v258_v35  ;;  %v264_v38 = vpop.permute.xlu0 %263  ;;  %v266_v39 = vpop.permute.xlu1 %265  ;;  %1963 = vrot.lane.b32.xlu1 %v5701_v19, %s5533_s10 }
  0xa5   : > { %5264 = vmatmul.mubr.msk.f32.gmra.mxu1 %vm289_vm2, %v256_v34  ;;  %435 = vmatprep.mubr.f32.mxu0 %v8425_v0  ;;  %v6190_v34 = vld [vmem:[%s8404_s1 + $0x18] sm:$0xff] }
  0xa6   : > { %5266 = vmatprep.mubr.msk.f32.mxu1 %vm289_vm2, %v258_v35 }
  0xa7   : > { %1961 = vrot.lane.b32.xlu0 %v5692_v18, %s5533_s10 }
  0xa8   : > { %4792 = vmatmul.mubr.msk.f32.gmra.mxu0 %vm289_vm2, %v260_v36  ;;  %v268_v40 = vpop.permute.xlu0 %267  ;;  %v1046_v41 = vpop.permute.xlu1 %1045  ;;  %1967 = vrot.lane.b32.xlu1 %v5617_v7, %s5533_s10 }
  0xa9   : > { %5267 = vmatmul.mubr.msk.f32.gmra.mxu1 %vm289_vm2, %v260_v36  ;;  %441 = vmatprep.mubr.f32.mxu0 %v8425_v0  ;;  %v6202_v36 = vld [vmem:[%s8404_s1 + $0x30] sm:$0xff] }
  0xaa   : > { %5269 = vmatprep.mubr.msk.f32.mxu1 %vm289_vm2, %v262_v37 }
  0xab   : > { %1965 = vrot.lane.b32.xlu0 %v5603_v5, %s5533_s10 }
  0xac   : > { %4793 = vmatmul.mubr.msk.f32.gmra.mxu0 %vm289_vm2, %v262_v37  ;;  %v1048_v42 = vpop.permute.xlu0 %1047  ;;  %v1044_v43 = vpop.permute.xlu1 %1043  ;;  %1971 = vrot.lane.b32.xlu1 %v5645_v11, %s5533_s10 }
  0xad   : > { %5270 = vmatmul.mubr.msk.f32.gmra.mxu1 %vm289_vm2, %v264_v38  ;;  %447 = vmatprep.mubr.f32.mxu0 %v8425_v0  ;;  %v1051_v44 = vsel %vm1049_vm3, %v1046_v41, %v1048_v42  ;;  %v1050_v51 = vsel %vm1049_vm3, %v1044_v43, %v1046_v41 }
  0xae   : > { %5272 = vmatprep.mubr.msk.f32.mxu1 %vm289_vm2, %v266_v39  ;;  %5307 = vmatprep.subr.msk.mxu1 %vm322_vm1, %v1048_v42 }
  0xaf   : > { %4853 = vmatprep.subr.msk.mxu0 %vm322_vm1, %v1051_v44  ;;  %1969 = vrot.lane.b32.xlu0 %v5631_v9, %s5533_s10  ;;  %v6252_v44 = vld [vmem:[%s8404_s1 + $0x50] sm:$0xff]  ;;  %s8336_s10 = scalar_lea.vmem %s8407_s4, %s5100_s5 }
  0xb0   : > { %4794 = vmatmul.mubr.msk.f32.gmra.mxu0 %vm289_vm2, %v264_v38  ;;  %v5844_v45 = vpop.permute.xlu1 %1013  ;;  %v5846_v46 = vpop.permute.xlu0 %1011  ;;  %2442 = vrot.lane.b32.xlu1 %v5582_v1, %s5534_s11  ;;  %v6215_v38 = vld [vmem:[%s8404_s1 + $0x28] sm:$0xff] }
  0xb1   : > { %5273 = vmatmul.mubr.msk.f32.gmra.mxu1 %vm289_vm2, %v268_v40  ;;  %453 = vmatprep.mubr.f32.mxu0 %v8425_v0 }
  0xb2   : > { %5275 = vmatprep.mubr.msk.f32.mxu1 %vm289_vm2, %v5752_v26 }
  0xb3   : > { %2440 = vrot.lane.b32.xlu0 %v5590_v3, %s5534_s11 }
  0xb4   : > { %4795 = vmatmul.mubr.msk.f32.gmra.mxu0 %vm289_vm2, %v266_v39  ;;  %v5857_v47 = vpop.permute.xlu1 %1017  ;;  %v5859_v48 = vpop.permute.xlu0 %1015  ;;  %2438 = vrot.lane.b32.xlu1 %v5584_v2, %s5534_s11 }
  0xb5   : > { %5276 = vmatmul.mubr.msk.f32.gmra.mxu1 %vm289_vm2, %v5764_v28  ;;  %459 = vmatprep.mubr.f32.mxu0 %v8425_v0 }
  0xb6   : > { %5278 = vmatprep.mubr.msk.f32.mxu1 %vm289_vm2, %v5777_v30  ;;  %v6165_v30 = vld [vmem:[%s8404_s1 + $0x8] sm:$0xff] }
  0xb7   : > { %2406 = vrot.lane.b32.xlu0 %v5595_v4, %s5534_s11 }
  0xb8   : > { %4796 = vmatmul.mubr.msk.f32.gmra.mxu0 %vm289_vm2, %v268_v40  ;;  %v5871_v49 = vpop.permute.xlu1 %1021  ;;  %v5873_v50 = vpop.permute.xlu0 %1019  ;;  %2410 = vrot.lane.b32.xlu1 %v5622_v8, %s5534_s11  ;;  %v6227_v40 = vld [vmem:[%s8404_s1 + $0x40] sm:$0xff] }
  0xb9   : > { %5279 = vmatmul.mubr.msk.f32.gmra.mxu1 %vm289_vm2, %v5788_v32  ;;  %5283 = vmatprep.mubr.msk.f32.mxu0 %vm289_vm2, %v5595_v4  ;;  %v6177_v32 = vld [vmem:[%s8404_s1 + $0x20] sm:$0xff] }
  0xba   : > { %737 = vmatprep.mubr.f32.mxu1 %v8425_v0 }
  0xbb   : > { %2408 = vrot.lane.b32.xlu0 %v5608_v6, %s5534_s11 }
  0xbc   : > { %5284 = vmatmul.mubr.msk.f32.vlgmr.msra.gmra.mxu0 %vm289_vm2, %v5608_v6  ;;  %v5887_v52 = vpop.permute.xlu1 %1025  ;;  %v5889_v53 = vpop.permute.xlu0 %1023  ;;  %2414 = vrot.lane.b32.xlu1 %v5650_v12, %s5534_s11 }
  0xbd   : > { %4820 = vmatmul.mubr.msk.f32.vlgmr.msra.gmra.mxu1 %vm289_vm2, %v5595_v4  ;;  %5286 = vmatprep.mubr.msk.f32.mxu0 %vm289_vm2, %v5622_v8 }
  0xbe   : > { %5308 = vmatpush3.msk.msra.mxu1 %vm322_vm1, %v1048_v42  ;;  %743 = vmatprep.mubr.f32.mxu1 %v8425_v0  ;;  %v6240_v42 = vld [vmem:[%s8404_s1 + $0x38] sm:$0xff] }
  0xbf   : > { %4854 = vmatpush1.msk.msra.mxu0 %vm322_vm1, %v1050_v51  ;;  %2412 = vrot.lane.b32.xlu0 %v5636_v10, %s5534_s11 }
  0xc0   : > { %5287 = vmatmul.mubr.msk.f32.gmra.mxu0 %vm289_vm2, %v5636_v10  ;;  %v5904_v54 = vpop.permute.xlu1 %1029  ;;  %v5906_v55 = vpop.permute.xlu0 %1027  ;;  %2418 = vrot.lane.b32.xlu1 %v5664_v14, %s5534_s11 }
  0xc1   : > { %4821 = vmatmul.mubr.msk.f32.gmra.mxu1 %vm289_vm2, %v5608_v6  ;;  %5289 = vmatprep.mubr.msk.f32.mxu0 %vm289_vm2, %v5650_v12 }
  0xc2   : > { %749 = vmatprep.mubr.f32.mxu1 %v8425_v0 }
  0xc3   : > { %2416 = vrot.lane.b32.xlu0 %v5659_v13, %s5534_s11 }
  0xc4   : > { %5290 = vmatmul.mubr.msk.f32.gmra.mxu0 %vm289_vm2, %v5659_v13  ;;  %v5919_v56 = vpop.permute.xlu1 %1033  ;;  %v5921_v57 = vpop.permute.xlu0 %1031  ;;  %2422 = vrot.lane.b32.xlu1 %v5678_v16, %s5534_s11 }
  0xc5   : > { %4822 = vmatmul.mubr.msk.f32.gmra.mxu1 %vm289_vm2, %v5622_v8  ;;  %5292 = vmatprep.mubr.msk.f32.mxu0 %vm289_vm2, %v5664_v14 }
  0xc6   : > { %755 = vmatprep.mubr.f32.mxu1 %v8425_v0 }
  0xc7   : > { %2420 = vrot.lane.b32.xlu0 %v5673_v15, %s5534_s11 }
  0xc8   : > { %5293 = vmatmul.mubr.msk.f32.gmra.mxu0 %vm289_vm2, %v5673_v15  ;;  %v5934_v58 = vpop.permute.xlu1 %1037  ;;  %v5936_v59 = vpop.permute.xlu0 %1035  ;;  %2426 = vrot.lane.b32.xlu1 %v5692_v18, %s5534_s11 }
  0xc9   : > { %4823 = vmatmul.mubr.msk.f32.gmra.mxu1 %vm289_vm2, %v5636_v10  ;;  %5295 = vmatprep.mubr.msk.f32.mxu0 %vm289_vm2, %v5678_v16 }
  0xca   : > { %761 = vmatprep.mubr.f32.mxu1 %v8425_v0 }
  0xcb   : > { %2424 = vrot.lane.b32.xlu0 %v5687_v17, %s5534_s11 }
  0xcc   : > { %5296 = vmatmul.mubr.msk.f32.gmra.mxu0 %vm289_vm2, %v5687_v17  ;;  %v5949_v60 = vpop.permute.xlu1 %1041  ;;  %v5951_v61 = vpop.permute.xlu0 %1039  ;;  %2430 = vrot.lane.b32.xlu1 %v5603_v5, %s5534_s11 }
  0xcd   : > { %4824 = vmatmul.mubr.msk.f32.gmra.mxu1 %vm289_vm2, %v5650_v12  ;;  %5298 = vmatprep.mubr.msk.f32.mxu0 %vm289_vm2, %v5692_v18 }
  0xce   : > { %767 = vmatprep.mubr.f32.mxu1 %v8425_v0 }
  0xcf   : > { %2428 = vrot.lane.b32.xlu0 %v5701_v19, %s5534_s11 }
  0xd0   : > { %5299 = vmatmul.mubr.msk.f32.gmra.mxu0 %vm289_vm2, %v5701_v19  ;;  %v1513_v62 = vpop.permute.xlu1 %1512  ;;  %v5964_v63 = vpop.permute.xlu0 %1510  ;;  %2434 = vrot.lane.b32.xlu1 %v5631_v9, %s5534_s11 }
  0xd1   : > { %4825 = vmatmul.mubr.msk.f32.gmra.mxu1 %vm289_vm2, %v5659_v13  ;;  %5301 = vmatprep.mubr.msk.f32.mxu0 %vm289_vm2, %v5603_v5  ;;  %v1516_v20 = vsel %vm1514_vm4, %v5964_v63, %v1513_v62 }
  0xd2   : > { %773 = vmatprep.mubr.f32.mxu1 %v8425_v0  ;;  %4888 = vmatprep.subr.msk.mxu1 %vm322_vm1, %v1516_v20 }
  0xd3   : > { %5333 = vmatprep.subr.msk.mxu0 %vm322_vm1, %v1513_v62  ;;  %2432 = vrot.lane.b32.xlu0 %v5617_v7, %s5534_s11 }
  0xd4   : > { %5302 = vmatmul.mubr.msk.f32.gmra.mxu0 %vm289_vm2, %v5617_v7  ;;  %v5981_v21 = vpop.permute.xlu1 %1508  ;;  %v5983_v22 = vpop.permute.xlu0 %1476  ;;  %2905 = vrot.lane.b32.xlu1 %v5590_v3, %s5535_s12 }
  0xd5   : > { %4826 = vmatmul.mubr.msk.f32.gmra.mxu1 %vm289_vm2, %v5664_v14  ;;  %5304 = vmatprep.mubr.msk.f32.mxu0 %vm289_vm2, %v5631_v9 }
  0xd6   : > { %779 = vmatprep.mubr.f32.mxu1 %v8425_v0 }
  0xd7   : > { %2436 = vrot.lane.b32.xlu0 %v5645_v11, %s5534_s11 }
  0xd8   : > { %5305 = vmatmul.mubr.msk.f32.gmra.mxu0 %vm289_vm2, %v5645_v11  ;;  %v5995_v23 = vpop.permute.xlu0 %1478  ;;  %v5997_v24 = vpop.permute.xlu1 %1480  ;;  %2903 = vrot.lane.b32.xlu1 %v5584_v2, %s5535_s12 }
  0xd9   : > { %4827 = vmatmul.mubr.msk.f32.gmra.mxu1 %vm289_vm2, %v5673_v15  ;;  %1154 = vmatprep.mubr.f32.mxu0 %v8425_v0 }
  0xda   : > { %785 = vmatprep.mubr.f32.mxu1 %v8425_v0 }
  0xdb   : > { %2907 = vrot.lane.b32.xlu0 %v5582_v1, %s5535_s12 }
  0xdc   : > { %4855 = vmatmul.mubr.msk.f32.vlgmr.msra.gmra.mxu0 %vm289_vm2, %v5846_v46  ;;  %v6007_v25 = vpop.permute.xlu0 %1482  ;;  %v6009_v26 = vpop.permute.xlu1 %1484  ;;  %2873 = vrot.lane.b32.xlu1 %v5608_v6, %s5536_s13 }
  0xdd   : > { %4828 = vmatmul.mubr.msk.f32.gmra.mxu1 %vm289_vm2, %v5678_v16  ;;  %1160 = vmatprep.mubr.f32.mxu0 %v8425_v0 }
  0xde   : > { %791 = vmatprep.mubr.f32.mxu1 %v8425_v0  ;;  %5334 = vmatpush3.msk.msra.mxu0 %vm322_vm1, %v1513_v62 }
  0xdf   : > { %2871 = vrot.lane.b32.xlu0 %v5595_v4, %s5536_s13 }
  0xe0   : > { %4856 = vmatmul.mubr.msk.f32.gmra.mxu0 %vm289_vm2, %v5844_v45  ;;  %v6022_v27 = vpop.permute.xlu0 %1486  ;;  %v6024_v28 = vpop.permute.xlu1 %1488  ;;  %2877 = vrot.lane.b32.xlu1 %v5636_v10, %s5536_s13 }
  0xe1   : > { %4829 = vmatmul.mubr.msk.f32.gmra.mxu1 %vm289_vm2, %v5687_v17  ;;  %1166 = vmatprep.mubr.f32.mxu0 %v8425_v0 }
  0xe2   : > { %797 = vmatprep.mubr.f32.mxu1 %v8425_v0 }
  0xe3   : > { %2875 = vrot.lane.b32.xlu0 %v5622_v8, %s5536_s13 }
  0xe4   : > { %4857 = vmatmul.mubr.msk.f32.gmra.mxu0 %vm289_vm2, %v5859_v48  ;;  %v6036_v4 = vpop.permute.xlu0 %1490  ;;  %v6038_v6 = vpop.permute.xlu1 %1492  ;;  %2881 = vrot.lane.b32.xlu1 %v5659_v13, %s5536_s13 }
  0xe5   : > { %4830 = vmatmul.mubr.msk.f32.gmra.mxu1 %vm289_vm2, %v5692_v18  ;;  %1172 = vmatprep.mubr.f32.mxu0 %v8425_v0 }
  0xe6   : > { %803 = vmatprep.mubr.f32.mxu1 %v8425_v0 }
  0xe7   : > { %2879 = vrot.lane.b32.xlu0 %v5650_v12, %s5536_s13 }
  0xe8   : > { %4858 = vmatmul.mubr.msk.f32.gmra.mxu0 %vm289_vm2, %v5857_v47  ;;  %v6050_v8 = vpop.permute.xlu0 %1494  ;;  %v6052_v10 = vpop.permute.xlu1 %1496  ;;  %2885 = vrot.lane.b32.xlu1 %v5673_v15, %s5536_s13 }
  0xe9   : > { %4831 = vmatmul.mubr.msk.f32.gmra.mxu1 %vm289_vm2, %v5701_v19  ;;  %1178 = vmatprep.mubr.f32.mxu0 %v8425_v0 }
  0xea   : > { %809 = vmatprep.mubr.f32.mxu1 %v8425_v0 }
  0xeb   : > { %2883 = vrot.lane.b32.xlu0 %v5664_v14, %s5536_s13 }
  0xec   : > { %4859 = vmatmul.mubr.msk.f32.gmra.mxu0 %vm289_vm2, %v5873_v50  ;;  %v6064_v12 = vpop.permute.xlu0 %1498  ;;  %v6066_v13 = vpop.permute.xlu1 %1500  ;;  %2889 = vrot.lane.b32.xlu1 %v5687_v17, %s5536_s13 }
  0xed   : > { %4832 = vmatmul.mubr.msk.f32.gmra.mxu1 %vm289_vm2, %v5603_v5  ;;  %1184 = vmatprep.mubr.f32.mxu0 %v8425_v0 }
  0xee   : > { %815 = vmatprep.mubr.f32.mxu1 %v8425_v0 }
  0xef   : > { %2887 = vrot.lane.b32.xlu0 %v5678_v16, %s5536_s13 }
  0xf0   : > { %4860 = vmatmul.mubr.msk.f32.gmra.mxu0 %vm289_vm2, %v5871_v49  ;;  %v6078_v14 = vpop.permute.xlu0 %1502  ;;  %2893 = vrot.lane.b32.xlu1 %v5701_v19, %s5536_s13  ;;  %v6086_v15 = vpop.permute.xlu1 %1504  ;;  %v6152_v19 = vld [vmem:[%s8404_s1 + $0x10] sm:$0xff] }
  0xf1   : > { %4833 = vmatmul.mubr.msk.f32.gmra.mxu1 %vm289_vm2, %v5617_v7  ;;  %1190 = vmatprep.mubr.f32.mxu0 %v8425_v0 }
  0xf2   : > { %821 = vmatprep.mubr.f32.mxu1 %v8425_v0 }
  0xf3   : > { %2891 = vrot.lane.b32.xlu0 %v5692_v18, %s5536_s13 }
  0xf4   : > { %4861 = vmatmul.mubr.msk.f32.gmra.mxu0 %vm289_vm2, %v5889_v53  ;;  %v6092_v16 = vpop.permute.xlu0 %1506  ;;  %2897 = vrot.lane.b32.xlu1 %v5617_v7, %s5536_s13  ;;  %v6104_v17 = vpop.permute.xlu1 %1975 }
  0xf5   : > { %4834 = vmatmul.mubr.msk.f32.gmra.mxu1 %vm289_vm2, %v5631_v9  ;;  %1196 = vmatprep.mubr.f32.mxu0 %v8425_v0 }
  0xf6   : > { %827 = vmatprep.mubr.f32.mxu1 %v8425_v0 }
  0xf7   : > { %2895 = vrot.lane.b32.xlu0 %v5603_v5, %s5536_s13  ;;  %v1515_v5 = vsel %vm1514_vm4, %v5981_v21, %v5964_v63 }
  0xf8   : > { %4862 = vmatmul.mubr.msk.f32.gmra.mxu0 %vm289_vm2, %v5887_v52  ;;  %v6106_v18 = vpop.permute.xlu0 %1977  ;;  %2901 = vrot.lane.b32.xlu1 %v5645_v11, %s5536_s13 }
  0xf9   : > { %4835 = vmatmul.mubr.msk.f32.gmra.mxu1 %vm289_vm2, %v5645_v11  ;;  %1202 = vmatprep.mubr.f32.mxu0 %v8425_v0  ;;  %v1981_v7 = vsel %vm1979_vm5, %v6104_v17, %v6106_v18  ;;  %v6133_v11 = vpop.permute.xlu1 %1973 }
  0xfa   : > { %5309 = vmatprep.mubr.msk.f32.mxu1 %vm289_vm2, %v5846_v46  ;;  %4923 = vmatprep.subr.msk.mxu0 %vm322_vm1, %v1981_v7  ;;  %v6265_v46 = vld [vmem:[%s8404_s1 + $0x48] sm:$0xff] }
  0xfb   : > { %2899 = vrot.lane.b32.xlu0 %v5631_v9, %s5536_s13  ;;  %v6144_v9 = vld [vmem:[%s8404_s1] sm:$0xff] }
  0xfc   : > { %4863 = vmatmul.mubr.msk.f32.gmra.mxu0 %vm289_vm2, %v5906_v55  ;;  %3372 = vrot.lane.b32.xlu1 %v5582_v1, %s5537_s14 }
  0xfd   : > { %5310 = vmatmul.mubr.msk.f32.vlgmr.msra.gmra.mxu1 %vm289_vm2, %v5844_v45  ;;  %1208 = vmatprep.mubr.f32.mxu0 %v8425_v0 }
  0xfe   : > { %4889 = vmatpush1.msk.msra.mxu1 %vm322_vm1, %v1515_v5  ;;  %5312 = vmatprep.mubr.msk.f32.mxu1 %vm289_vm2, %v5859_v48  ;;  %v6277_v48 = vld [vmem:[%s8404_s1 + $0x60] sm:$0xff] }
  0xff   : > { %5359 = vmatprep.subr.msk.mxu1 %vm322_vm1, %v6106_v18  ;;  %3370 = vrot.lane.b32.xlu0 %v5590_v3, %s5537_s14 }
 0x100   : > { %4864 = vmatmul.mubr.msk.f32.gmra.mxu0 %vm289_vm2, %v5904_v54  ;;  %3368 = vrot.lane.b32.xlu1 %v5584_v2, %s5537_s14 }
 0x101   : > { %5313 = vmatmul.mubr.msk.f32.gmra.mxu1 %vm289_vm2, %v5857_v47  ;;  %1214 = vmatprep.mubr.f32.mxu0 %v8425_v0 }
 0x102   : > { %5315 = vmatprep.mubr.msk.f32.mxu1 %vm289_vm2, %v5873_v50  ;;  %v6156_v29 = vpop.permute.xlu1 %1943  ;;  %v6290_v50 = vld [vmem:[%s8404_s1 + $0x58] sm:$0xff] }
 0x103   : > { %3336 = vrot.lane.b32.xlu0 %v6144_v9, %s5538_s21 }
 0x104   : > { %4865 = vmatmul.mubr.msk.f32.gmra.mxu0 %vm289_vm2, %v5921_v57  ;;  %3340 = vrot.lane.b32.xlu1 %v6152_v19, %s5538_s21 }
 0x105   : > { %5316 = vmatmul.mubr.msk.f32.gmra.mxu1 %vm289_vm2, %v5871_v49  ;;  %1220 = vmatprep.mubr.f32.mxu0 %v8425_v0  ;;  %v6172_v31 = vpop.permute.xlu0 %1941 }
 0x106   : > { %5318 = vmatprep.mubr.msk.f32.mxu1 %vm289_vm2, %v5889_v53  ;;  %v6181_v33 = vpop.permute.xlu1 %1947 }
 0x107   : > { %3338 = vrot.lane.b32.xlu0 %v6165_v30, %s5538_s21 }
 0x108   : > { %4866 = vmatmul.mubr.msk.f32.gmra.mxu0 %vm289_vm2, %v5919_v56  ;;  %3344 = vrot.lane.b32.xlu1 %v6177_v32, %s5538_s21 }
 0x109   : > { %5319 = vmatmul.mubr.msk.f32.gmra.mxu1 %vm289_vm2, %v5887_v52  ;;  %1226 = vmatprep.mubr.f32.mxu0 %v8425_v0  ;;  %v6197_v35 = vpop.permute.xlu0 %1945  ;;  %v6303_v52 = vld [vmem:[%s8404_s1 + $0x70] sm:$0xff] }
 0x10a   : > { %5321 = vmatprep.mubr.msk.f32.mxu1 %vm289_vm2, %v5906_v55  ;;  %v6206_v37 = vpop.permute.xlu1 %1951  ;;  %v6318_v55 = vld [vmem:[%s8404_s1 + $0x68] sm:$0xff] }
 0x10b   : > { %3342 = vrot.lane.b32.xlu0 %v6190_v34, %s5538_s21 }
 0x10c   : > { %4867 = vmatmul.mubr.msk.f32.gmra.mxu0 %vm289_vm2, %v5936_v59  ;;  %3348 = vrot.lane.b32.xlu1 %v6202_v36, %s5538_s21 }
 0x10d   : > { %5322 = vmatmul.mubr.msk.f32.gmra.mxu1 %vm289_vm2, %v5904_v54  ;;  %1232 = vmatprep.mubr.f32.mxu0 %v8425_v0  ;;  %v6222_v39 = vpop.permute.xlu0 %1949  ;;  %v1980_v54 = vsel %vm1979_vm5, %v6133_v11, %v6104_v17 }
 0x10e   : > { %5324 = vmatprep.mubr.msk.f32.mxu1 %vm289_vm2, %v5921_v57  ;;  %v6231_v41 = vpop.permute.xlu1 %1955 }
 0x10f   : > { %3346 = vrot.lane.b32.xlu0 %v6215_v38, %s5538_s21 }
 0x110   : > { %4868 = vmatmul.mubr.msk.f32.gmra.mxu0 %vm289_vm2, %v5934_v58  ;;  %3352 = vrot.lane.b32.xlu1 %v6227_v40, %s5538_s21 }
 0x111   : > { %5325 = vmatmul.mubr.msk.f32.gmra.mxu1 %vm289_vm2, %v5919_v56  ;;  %1238 = vmatprep.mubr.f32.mxu0 %v8425_v0  ;;  %v6247_v43 = vpop.permute.xlu0 %1953 }
 0x112   : > { %5327 = vmatprep.mubr.msk.f32.mxu1 %vm289_vm2, %v5936_v59  ;;  %v6256_v45 = vpop.permute.xlu1 %1959 }
 0x113   : > { %3350 = vrot.lane.b32.xlu0 %v6240_v42, %s5538_s21 }
 0x114   : > { %4869 = vmatmul.mubr.msk.f32.gmra.mxu0 %vm289_vm2, %v5951_v61  ;;  %3356 = vrot.lane.b32.xlu1 %v6252_v44, %s5538_s21 }
 0x115   : > { %5328 = vmatmul.mubr.msk.f32.gmra.mxu1 %vm289_vm2, %v5934_v58  ;;  %1244 = vmatprep.mubr.f32.mxu0 %v8425_v0  ;;  %v6272_v47 = vpop.permute.xlu0 %1957  ;;  %v6341_v58 = vld [vmem:[%s8404_s1 + $0x78] sm:$0xff] }
 0x116   : > { %5330 = vmatprep.mubr.msk.f32.mxu1 %vm289_vm2, %v5951_v61  ;;  %v6281_v49 = vpop.permute.xlu1 %1963 }
 0x117   : > { %3354 = vrot.lane.b32.xlu0 %v6265_v46, %s5538_s21 }
 0x118   : > { %4870 = vmatmul.mubr.msk.f32.gmra.mxu0 %vm289_vm2, %v5949_v60  ;;  %3360 = vrot.lane.b32.xlu1 %v6277_v48, %s5538_s21 }
 0x119   : > { %5331 = vmatmul.mubr.msk.f32.gmra.mxu1 %vm289_vm2, %v5949_v60  ;;  %5335 = vmatprep.mubr.msk.f32.mxu0 %vm289_vm2, %v5983_v22  ;;  %v6298_v51 = vpop.permute.xlu0 %1961 }
 0x11a   : > { %1619 = vmatprep.mubr.f32.mxu1 %v8425_v0  ;;  %v6306_v53 = vpop.permute.xlu1 %1967 }
 0x11b   : > { %3358 = vrot.lane.b32.xlu0 %v6290_v50, %s5538_s21 }
 0x11c   : > { %5336 = vmatmul.mubr.msk.f32.vlgmr.msra.gmra.mxu0 %vm289_vm2, %v5995_v23  ;;  %3364 = vrot.lane.b32.xlu1 %v6303_v52, %s5538_s21 }
 0x11d   : > { %4890 = vmatmul.mubr.msk.f32.vlgmr.msra.gmra.mxu1 %vm289_vm2, %v5983_v22  ;;  %5338 = vmatprep.mubr.msk.f32.mxu0 %vm289_vm2, %v5997_v24  ;;  %v6326_v56 = vpop.permute.xlu0 %1965 }
 0x11e   : > { %5360 = vmatpush3.msk.msra.mxu1 %vm322_vm1, %v6106_v18  ;;  %1625 = vmatprep.mubr.f32.mxu1 %v8425_v0  ;;  %v6331_v57 = vpop.permute.xlu1 %1971 }
 0x11f   : > { %4924 = vmatpush1.msk.msra.mxu0 %vm322_vm1, %v1980_v54  ;;  %3362 = vrot.lane.b32.xlu0 %v6318_v55, %s5538_s21 }
 0x120   : > { %5339 = vmatmul.mubr.msk.f32.gmra.mxu0 %vm289_vm2, %v6007_v25  ;;  %3835 = vrot.lane.b32.xlu1 %v5590_v3, %s5539_s28 }
 0x121   : > { %4891 = vmatmul.mubr.msk.f32.gmra.mxu1 %vm289_vm2, %v5995_v23  ;;  %5341 = vmatprep.mubr.msk.f32.mxu0 %vm289_vm2, %v6009_v26  ;;  %v6348_v59 = vpop.permute.xlu0 %1969 }
 0x122   : > { %1631 = vmatprep.mubr.f32.mxu1 %v8425_v0  ;;  %v2443_v60 = vpop.permute.xlu1 %2442 }
 0x123   : > { %5385 = vmatprep.subr.msk.mxu0 %vm322_vm1, %v2443_v60  ;;  %3366 = vrot.lane.b32.xlu0 %v6341_v58, %s5538_s21  ;;  %s5540_s21 = smov 96  }
 0x124   : > { %5342 = vmatmul.mubr.msk.f32.gmra.mxu0 %vm289_vm2, %v6022_v27  ;;  %3833 = vrot.lane.b32.xlu1 %v5584_v2, %s5539_s28 }
 0x125   : > { %4892 = vmatmul.mubr.msk.f32.gmra.mxu1 %vm289_vm2, %v5997_v24  ;;  %5344 = vmatprep.mubr.msk.f32.mxu0 %vm289_vm2, %v6024_v28  ;;  %v6361_v3 = vpop.permute.xlu0 %2440 }
 0x126   : > { %1637 = vmatprep.mubr.f32.mxu1 %v8425_v0  ;;  %v6364_v61 = vpop.permute.xlu1 %2438  ;;  %v2446_v62 = vsel %vm2444_vm6, %v6361_v3, %v2443_v60 }
 0x127   : > { %4958 = vmatprep.subr.msk.mxu1 %vm322_vm1, %v2446_v62  ;;  %3837 = vrot.lane.b32.xlu0 %v5582_v1, %s5539_s28 }
 0x128   : > { %5345 = vmatmul.mubr.msk.f32.gmra.mxu0 %vm289_vm2, %v6036_v4  ;;  %3803 = vrot.lane.b32.xlu1 %v6165_v30, %s5540_s21 }
 0x129   : > { %4893 = vmatmul.mubr.msk.f32.gmra.mxu1 %vm289_vm2, %v6007_v25  ;;  %5347 = vmatprep.mubr.msk.f32.mxu0 %vm289_vm2, %v6038_v6  ;;  %v6378_v2 = vpop.permute.xlu0 %2406 }
 0x12a   : > { %1643 = vmatprep.mubr.f32.mxu1 %v8425_v0  ;;  %v6381_v63 = vpop.permute.xlu1 %2410 }
 0x12b   : > { %3801 = vrot.lane.b32.xlu0 %v6144_v9, %s5540_s21 }
 0x12c   : > { %5348 = vmatmul.mubr.msk.f32.gmra.mxu0 %vm289_vm2, %v6050_v8  ;;  %3807 = vrot.lane.b32.xlu1 %v6190_v34, %s5540_s21 }
 0x12d   : > { %4894 = vmatmul.mubr.msk.f32.gmra.mxu1 %vm289_vm2, %v6009_v26  ;;  %5350 = vmatprep.mubr.msk.f32.mxu0 %vm289_vm2, %v6052_v10  ;;  %v6393_v1 = vpop.permute.xlu0 %2408 }
 0x12e   : > { %1649 = vmatprep.mubr.f32.mxu1 %v8425_v0  ;;  %v6396_v20 = vpop.permute.xlu1 %2414 }
 0x12f   : > { %3805 = vrot.lane.b32.xlu0 %v6152_v19, %s5540_s21 }
 0x130   : > { %5351 = vmatmul.mubr.msk.f32.gmra.mxu0 %vm289_vm2, %v6064_v12  ;;  %3811 = vrot.lane.b32.xlu1 %v6215_v38, %s5540_s21 }
 0x131   : > { %4895 = vmatmul.mubr.msk.f32.gmra.mxu1 %vm289_vm2, %v6022_v27  ;;  %5353 = vmatprep.mubr.msk.f32.mxu0 %vm289_vm2, %v6066_v13  ;;  %v6408_v21 = vpop.permute.xlu0 %2412 }
 0x132   : > { %1655 = vmatprep.mubr.f32.mxu1 %v8425_v0  ;;  %v6411_v22 = vpop.permute.xlu1 %2418 }
 0x133   : > { %3809 = vrot.lane.b32.xlu0 %v6177_v32, %s5540_s21 }
 0x134   : > { %5354 = vmatmul.mubr.msk.f32.gmra.mxu0 %vm289_vm2, %v6078_v14  ;;  %3815 = vrot.lane.b32.xlu1 %v6240_v42, %s5540_s21 }
 0x135   : > { %4896 = vmatmul.mubr.msk.f32.gmra.mxu1 %vm289_vm2, %v6024_v28  ;;  %5356 = vmatprep.mubr.msk.f32.mxu0 %vm289_vm2, %v6086_v15  ;;  %v6423_v23 = vpop.permute.xlu0 %2416 }
 0x136   : > { %1661 = vmatprep.mubr.f32.mxu1 %v8425_v0  ;;  %v6426_v24 = vpop.permute.xlu1 %2422 }
 0x137   : > { %3813 = vrot.lane.b32.xlu0 %v6202_v36, %s5540_s21 }
 0x138   : > { %5357 = vmatmul.mubr.msk.f32.gmra.mxu0 %vm289_vm2, %v6092_v16  ;;  %3819 = vrot.lane.b32.xlu1 %v6265_v46, %s5540_s21 }
 0x139   : > { %4897 = vmatmul.mubr.msk.f32.gmra.mxu1 %vm289_vm2, %v6036_v4  ;;  %2084 = vmatprep.mubr.f32.mxu0 %v8425_v0  ;;  %v6437_v25 = vpop.permute.xlu0 %2420 }
 0x13a   : > { %1667 = vmatprep.mubr.f32.mxu1 %v8425_v0  ;;  %v6440_v26 = vpop.permute.xlu1 %2426 }
 0x13b   : > { %3817 = vrot.lane.b32.xlu0 %v6227_v40, %s5540_s21 }
 0x13c   : > { %4925 = vmatmul.mubr.msk.f32.vlgmr.msra.gmra.mxu0 %vm289_vm2, %v6172_v31  ;;  %3823 = vrot.lane.b32.xlu1 %v6290_v50, %s5540_s21 }
 0x13d   : > { %4898 = vmatmul.mubr.msk.f32.gmra.mxu1 %vm289_vm2, %v6038_v6  ;;  %2090 = vmatprep.mubr.f32.mxu0 %v8425_v0  ;;  %v6451_v27 = vpop.permute.xlu0 %2424 }
 0x13e   : > { %1673 = vmatprep.mubr.f32.mxu1 %v8425_v0  ;;  %5386 = vmatpush3.msk.msra.mxu0 %vm322_vm1, %v2443_v60  ;;  %v6455_v28 = vpop.permute.xlu1 %2430  ;;  %v2445_v60 = vsel %vm2444_vm6, %v6364_v61, %v6361_v3 }
 0x13f   : > { %3821 = vrot.lane.b32.xlu0 %v6252_v44, %s5540_s21 }
 0x140   : > { %4926 = vmatmul.mubr.msk.f32.gmra.mxu0 %vm289_vm2, %v6156_v29  ;;  %3827 = vrot.lane.b32.xlu1 %v6318_v55, %s5540_s21 }
 0x141   : > { %4899 = vmatmul.mubr.msk.f32.gmra.mxu1 %vm289_vm2, %v6050_v8  ;;  %2096 = vmatprep.mubr.f32.mxu0 %v8425_v0  ;;  %v6466_v4 = vpop.permute.xlu0 %2428 }
 0x142   : > { %1679 = vmatprep.mubr.f32.mxu1 %v8425_v0  ;;  %v6469_v6 = vpop.permute.xlu1 %2434 }
 0x143   : > { %3825 = vrot.lane.b32.xlu0 %v6277_v48, %s5540_s21 }
 0x144   : > { %4927 = vmatmul.mubr.msk.f32.gmra.mxu0 %vm289_vm2, %v6197_v35  ;;  %3831 = vrot.lane.b32.xlu1 %v6341_v58, %s5540_s21 }
 0x145   : > { %4900 = vmatmul.mubr.msk.f32.gmra.mxu1 %vm289_vm2, %v6052_v10  ;;  %2102 = vmatprep.mubr.f32.mxu0 %v8425_v0  ;;  %v6480_v8 = vpop.permute.xlu0 %2432 }
 0x146   : > { %1685 = vmatprep.mubr.f32.mxu1 %v8425_v0  ;;  %v6483_v17 = vpop.permute.xlu1 %2905 }
 0x147   : > { %3829 = vrot.lane.b32.xlu0 %v6303_v52, %s5540_s21 }
 0x148   : > { %4928 = vmatmul.mubr.msk.f32.gmra.mxu0 %vm289_vm2, %v6181_v33 }
 0x149   : > { %4901 = vmatmul.mubr.msk.f32.gmra.mxu1 %vm289_vm2, %v6064_v12  ;;  %2108 = vmatprep.mubr.f32.mxu0 %v8425_v0  ;;  %v6492_v10 = vpop.permute.xlu0 %2436 }
 0x14a   : > { %1691 = vmatprep.mubr.f32.mxu1 %v8425_v0  ;;  %v6495_v18 = vpop.permute.xlu1 %2903 }
 0x14c   : > { %v6497_v7 = vpop.f32.mrf.mxu0  ;;  %4929 = vmatmul.mubr.msk.f32.gmra.mxu0 %vm289_vm2, %v6222_v39 }
 0x14d   : > { %v6501_v5 = vpop.f32.mrf.mxu1  ;;  %4902 = vmatmul.mubr.msk.f32.gmra.mxu1 %vm289_vm2, %v6066_v13  ;;  %2114 = vmatprep.mubr.f32.mxu0 %v8425_v0  ;;  %v6506_v12 = vpop.permute.xlu0 %2907 }
 0x14e   : > { %8440 = vst [vmem:[#allocation2_spill] sm:$0xff] %v6501_v5  ;;  %v6508_v11 = vpop.f32.mrf.mxu0  ;;  %1697 = vmatprep.mubr.f32.mxu1 %v8425_v0  ;;  %v2911_v9 = vsel %vm2909_vm7, %v6483_v17, %v6506_v12  ;;  %v6514_v19 = vpop.permute.xlu1 %2873 }
 0x14f   : > { %v6516_v30 = vpop.f32.mrf.mxu1  ;;  %4993 = vmatprep.subr.msk.mxu0 %vm322_vm1, %v2911_v9 }
 0x150   : > { %8441 = vst [vmem:[#allocation3_spill] sm:$0xff] %v6516_v30  ;;  %v6519_v32 = vpop.f32.mrf.mxu0  ;;  %4930 = vmatmul.mubr.msk.f32.gmra.mxu0 %vm289_vm2, %v6206_v37 }
 0x151   : > { %v6523_v13 = vpop.f32.mrf.mxu1  ;;  %4903 = vmatmul.mubr.msk.f32.gmra.mxu1 %vm289_vm2, %v6078_v14  ;;  %2120 = vmatprep.mubr.f32.mxu0 %v8425_v0  ;;  %v6528_v34 = vpop.permute.xlu0 %2871 }
 0x152   : > { %8442 = vst [vmem:[#allocation4_spill] sm:$0xff] %v6523_v13  ;;  %v6530_v36 = vpop.f32.mrf.mxu0  ;;  %1703 = vmatprep.mubr.f32.mxu1 %v8425_v0  ;;  %v6533_v38 = vpop.permute.xlu1 %2877 }
 0x153   : > { %8443 = vst [vmem:[#allocation5_spill] sm:$0xff] %v6533_v38  ;;  %v6535_v40 = vpop.f32.mrf.mxu1 }
 0x154   : > { %8444 = vst [vmem:[#allocation6_spill] sm:$0xff] %v6535_v40  ;;  %v6537_v42 = vpop.f32.mrf.mxu0  ;;  %4931 = vmatmul.mubr.msk.f32.gmra.mxu0 %vm289_vm2, %v6247_v43 }
 0x155   : > { %v6541_v44 = vpop.f32.mrf.mxu1  ;;  %4904 = vmatmul.mubr.msk.f32.gmra.mxu1 %vm289_vm2, %v6086_v15  ;;  %2126 = vmatprep.mubr.f32.mxu0 %v8425_v0  ;;  %v6546_v14 = vpop.permute.xlu0 %2875 }
 0x156   : > { %8445 = vst [vmem:[#allocation7_spill] sm:$0xff] %v6541_v44  ;;  %8446 = vst [vmem:[#allocation8_spill] sm:$0xff] %v6546_v14  ;;  %v6548_v46 = vpop.f32.mrf.mxu0  ;;  %1709 = vmatprep.mubr.f32.mxu1 %v8425_v0  ;;  %v6551_v48 = vpop.permute.xlu1 %2881 }
 0x157   : > { %8447 = vst [vmem:[#allocation9_spill] sm:$0xff] %v6551_v48  ;;  %v6553_v50 = vpop.f32.mrf.mxu1 }
 0x158   : > { %8448 = vst [vmem:[#allocation10_spill] sm:$0xff] %v6553_v50  ;;  %v6555_v52 = vpop.f32.mrf.mxu0  ;;  %4932 = vmatmul.mubr.msk.f32.gmra.mxu0 %vm289_vm2, %v6231_v41 }
 0x159   : > { %v6559_v54 = vpop.f32.mrf.mxu1  ;;  %4905 = vmatmul.mubr.msk.f32.gmra.mxu1 %vm289_vm2, %v6092_v16  ;;  %2132 = vmatprep.mubr.f32.mxu0 %v8425_v0  ;;  %v6564_v15 = vpop.permute.xlu0 %2879 }
 0x15a   : > { %8449 = vst [vmem:[#allocation11_spill] sm:$0xff] %v6559_v54  ;;  %8450 = vst [vmem:[#allocation12_spill] sm:$0xff] %v6564_v15  ;;  %v6566_v55 = vpop.f32.mrf.mxu0  ;;  %5361 = vmatprep.mubr.msk.f32.mxu1 %vm289_vm2, %v6172_v31  ;;  %v6570_v58 = vpop.permute.xlu1 %2885 }
 0x15b   : > { %8451 = vst [vmem:[#allocation13_spill] sm:$0xff] %v6570_v58  ;;  %v6575_v62 = vpop.f32.mrf.mxu1 }
 0x15c   : > { %8452 = vst [vmem:[#allocation14_spill] sm:$0xff] %v6575_v62  ;;  %v6577_v9 = vpop.f32.mrf.mxu0  ;;  %4933 = vmatmul.mubr.msk.f32.gmra.mxu0 %vm289_vm2, %v6272_v47 }
 0x15d   : > { %v6581_v16 = vpop.f32.mrf.mxu1  ;;  %5362 = vmatmul.mubr.msk.f32.vlgmr.msra.gmra.mxu1 %vm289_vm2, %v6156_v29  ;;  %2138 = vmatprep.mubr.f32.mxu0 %v8425_v0  ;;  %v6586_v31 = vpop.permute.xlu0 %2883 }
 0x15e   : > { %8453 = vst [vmem:[#allocation15_spill] sm:$0xff] %v6586_v31  ;;  %4959 = vmatpush1.msk.msra.mxu1 %vm322_vm1, %v2445_v60  ;;  %v6589_v54 = vpop.f32.mrf.mxu0  ;;  %5364 = vmatprep.mubr.msk.f32.mxu1 %vm289_vm2, %v6197_v35  ;;  %v6593_v3 = vpop.permute.xlu1 %2889 }
 0x15f   : > { %8454 = vst [vmem:[#allocation16_spill] sm:$0xff] %v6593_v3  ;;  %v6595_v61 = vpop.f32.mrf.mxu1  ;;  %5411 = vmatprep.subr.msk.mxu1 %vm322_vm1, %v6506_v12 }
 0x160   : > { %v6599_v62 = vpop.f32.mrf.mxu0  ;;  %4934 = vmatmul.mubr.msk.f32.gmra.mxu0 %vm289_vm2, %v6256_v45 }
 0x161   : > { %v6603_v29 = vpop.f32.mrf.mxu1  ;;  %5365 = vmatmul.mubr.msk.f32.gmra.mxu1 %vm289_vm2, %v6181_v33  ;;  %2144 = vmatprep.mubr.f32.mxu0 %v8425_v0  ;;  %v6608_v35 = vpop.permute.xlu0 %2887 }
 0x162   : > { %8455 = vst [vmem:[#allocation17_spill] sm:$0xff] %v6608_v35  ;;  %v6610_v60 = vpop.f32.mrf.mxu0  ;;  %5367 = vmatprep.mubr.msk.f32.mxu1 %vm289_vm2, %v6222_v39  ;;  %v6614_v50 = vpop.permute.xlu1 %2893 }
 0x163   : > { %8456 = vst [vmem:[#allocation18_spill] sm:$0xff] %v6614_v50  ;;  %v6616_v44 = vpop.f32.mrf.mxu1 }
 0x164   : > { %v6618_v40 = vpop.f32.mrf.mxu0  ;;  %4935 = vmatmul.mubr.msk.f32.gmra.mxu0 %vm289_vm2, %v6298_v51 }
 0x165   : > { %v6622_v13 = vpop.f32.mrf.mxu1  ;;  %5368 = vmatmul.mubr.msk.f32.gmra.mxu1 %vm289_vm2, %v6206_v37  ;;  %2150 = vmatprep.mubr.f32.mxu0 %v8425_v0  ;;  %v6627_v33 = vpop.permute.xlu0 %2891 }
 0x166   : > { %8457 = vst [vmem:[#allocation19_spill] sm:$0xff] %v6627_v33  ;;  %v6629_v30 = vpop.f32.mrf.mxu0  ;;  %5370 = vmatprep.mubr.msk.f32.mxu1 %vm289_vm2, %v6247_v43  ;;  %v6633_v39 = vpop.permute.xlu1 %2897 }
 0x167   : > { %8458 = vst [vmem:[#allocation20_spill] sm:$0xff] %v6633_v39  ;;  %v6635_v5 = vpop.f32.mrf.mxu1 }
 0x168   : > { %v6637_v50 = vpop.f32.mrf.mxu0  ;;  %4936 = vmatmul.mubr.msk.f32.gmra.mxu0 %vm289_vm2, %v6281_v49 }
 0x169   : > { %v6641_v3 = vpop.f32.mrf.mxu1  ;;  %5371 = vmatmul.mubr.msk.f32.gmra.mxu1 %vm289_vm2, %v6231_v41  ;;  %2156 = vmatprep.mubr.f32.mxu0 %v8425_v0  ;;  %v6646_v37 = vpop.permute.xlu0 %2895 }
 0x16a   : > { %8459 = vst [vmem:[#allocation21_spill] sm:$0xff] %v6646_v37  ;;  %v6648_v33 = vpop.f32.mrf.mxu0  ;;  %5373 = vmatprep.mubr.msk.f32.mxu1 %vm289_vm2, %v6272_v47  ;;  %v6652_v43 = vpop.permute.xlu1 %2901 }
 0x16b   : > { %8460 = vst [vmem:[#allocation22_spill] sm:$0xff] %v6652_v43  ;;  %v6654_v39 = vpop.f32.mrf.mxu1 }
 0x16c   : > { %v6656_v35 = vpop.f32.mrf.mxu0  ;;  %4937 = vmatmul.mubr.msk.f32.gmra.mxu0 %vm289_vm2, %v6326_v56 }
 0x16d   : > { %v6660_v58 = vpop.f32.mrf.mxu1  ;;  %5374 = vmatmul.mubr.msk.f32.gmra.mxu1 %vm289_vm2, %v6256_v45  ;;  %2162 = vmatprep.mubr.f32.mxu0 %v8425_v0  ;;  %v6665_v41 = vpop.permute.xlu0 %2899 }
 0x16e   : > { %8461 = vst [vmem:[#allocation23_spill] sm:$0xff] %v6665_v41  ;;  %v6667_v37 = vpop.f32.mrf.mxu0  ;;  %5376 = vmatprep.mubr.msk.f32.mxu1 %vm289_vm2, %v6298_v51  ;;  %v6671_v47 = vpop.permute.xlu1 %3372 }
 0x16f   : > { %v6673_v43 = vpop.f32.mrf.mxu1 }
 0x170   : > { %v6675_v31 = vpop.f32.mrf.mxu0  ;;  %4938 = vmatmul.mubr.msk.f32.gmra.mxu0 %vm289_vm2, %v6306_v53 }
 0x171   : > { %8462 = vst [vmem:[#allocation24_spill] sm:$0xff] %v6675_v31  ;;  %v6679_v48 = vpop.f32.mrf.mxu1  ;;  %5377 = vmatmul.mubr.msk.f32.gmra.mxu1 %vm289_vm2, %v6281_v49  ;;  %2168 = vmatprep.mubr.f32.mxu0 %v8425_v0  ;;  %v6684_v45 = vpop.permute.xlu0 %3370 }
 0x172   : > { %v6686_v41 = vpop.f32.mrf.mxu0  ;;  %5379 = vmatprep.mubr.msk.f32.mxu1 %vm289_vm2, %v6326_v56  ;;  %v6690_v51 = vpop.permute.xlu1 %3368 }
 0x173   : > { %8463 = vst [vmem:[#allocation25_spill] sm:$0xff] %v6686_v41  ;;  %8464 = vst [vmem:[#allocation26_spill] sm:$0xff] %v6690_v51  ;;  %v6692_v15 = vpop.f32.mrf.mxu1 }
 0x174   : > { %v6694_v38 = vpop.f32.mrf.mxu0  ;;  %4939 = vmatmul.mubr.msk.f32.gmra.mxu0 %vm289_vm2, %v6348_v59 }
 0x175   : > { %8465 = vst [vmem:[#allocation27_spill] sm:$0xff] %v6694_v38  ;;  %v6698_v14 = vpop.f32.mrf.mxu1  ;;  %5380 = vmatmul.mubr.msk.f32.gmra.mxu1 %vm289_vm2, %v6306_v53  ;;  %2174 = vmatprep.mubr.f32.mxu0 %v8425_v0  ;;  %v6703_v49 = vpop.permute.xlu0 %3336 }
 0x176   : > { %8466 = vst [vmem:[#allocation28_spill] sm:$0xff] %v6703_v49  ;;  %v6705_v41 = vpop.f32.mrf.mxu0  ;;  %5382 = vmatprep.mubr.msk.f32.mxu1 %vm289_vm2, %v6348_v59  ;;  %v6709_v56 = vpop.permute.xlu1 %3340 }
 0x177   : > { %8467 = vst [vmem:[#allocation29_spill] sm:$0xff] %v6705_v41  ;;  %8468 = vst [vmem:[#allocation30_spill] sm:$0xff] %v6709_v56  ;;  %v6711_v51 = vpop.f32.mrf.mxu1 }
 0x178   : > { %v6713_v38 = vpop.f32.mrf.mxu0  ;;  %4940 = vmatmul.mubr.msk.f32.gmra.mxu0 %vm289_vm2, %v6331_v57 }
 0x179   : > { %8469 = vst [vmem:[#allocation31_spill] sm:$0xff] %v6713_v38  ;;  %v6717_v31 = vpop.f32.mrf.mxu1  ;;  %5383 = vmatmul.mubr.msk.f32.gmra.mxu1 %vm289_vm2, %v6331_v57  ;;  %5387 = vmatprep.mubr.msk.f32.mxu0 %vm289_vm2, %v6378_v2  ;;  %v6723_v53 = vpop.permute.xlu0 %3338  ;;  %v2910_v57 = vsel %vm2909_vm7, %v6495_v18, %v6483_v17  ;;  %v8474_v18 = vmov 0.0  }
 0x17a   : > { %8470 = vst [vmem:[#allocation32_spill] sm:$0xff] %v6723_v53  ;;  %v6725_v59 = vpop.f32.mrf.mxu0  ;;  %2549 = vmatprep.mubr.f32.mxu1 %v8425_v0  ;;  %v6728_v56 = vpop.permute.xlu1 %3344  ;;  %v3376_v53 = vsel %vm3374_vm8, %v6684_v45, %v6671_v47 }
 0x17b   : > { %8471 = vst [vmem:[#allocation33_spill] sm:$0xff] %v6725_v59  ;;  %8472 = vst [vmem:[#allocation34_spill] sm:$0xff] %v6728_v56  ;;  %v6730_v49 = vpop.f32.mrf.mxu1 }
 0x17c   : > { %v5285_v38 = vpop.f32.mrf.mxu0  ;;  %5388 = vmatmul.mubr.msk.f32.vlgmr.msra.gmra.mxu0 %vm289_vm2, %v6393_v1 }
 0x17d   : > { %v6741_v59 = vadd.f32 %v5285_v38, %v6581_v16  ;;  %v739_v0 = vpop.f32.mrf.mxu1  ;;  %4960 = vmatmul.mubr.msk.f32.vlgmr.msra.gmra.mxu1 %vm289_vm2, %v6378_v2  ;;  %5390 = vmatprep.mubr.msk.f32.mxu0 %vm289_vm2, %v6381_v63  ;;  %v6747_v56 = vpop.permute.xlu0 %3342 }
 0x17e   : > { %8473 = vst [vmem:[#allocation35_spill] sm:$0xff] %v6747_v56  ;;  %v6750_v41 = vadd.f32 %v739_v0, %v6497_v7  ;;  %5412 = vmatpush3.msk.msra.mxu1 %vm322_vm1, %v6506_v12  ;;  %v900_v17 = vpop.f32.mrf.mxu0  ;;  %2555 = vmatprep.mubr.f32.mxu1 %v8474_v18  ;;  %v6755_v38 = vpop.permute.xlu1 %3348 }
 0x17f   : > { %v6758_v16 = vadd.f32 %v900_v17, %v6595_v61  ;;  %v741_v2 = vpop.f32.mrf.mxu1  ;;  %4994 = vmatpush1.msk.msra.mxu0 %vm322_vm1, %v2910_v57  ;;  %5028 = vmatprep.subr.msk.mxu1 %vm322_vm1, %v3376_v53 }
 0x180   : > { %v6763_v56 = vadd.f32 %v741_v2, %v6508_v11  ;;  %v5288_v0 = vpop.f32.mrf.mxu0  ;;  %5391 = vmatmul.mubr.msk.f32.gmra.mxu0 %vm289_vm2, %v6408_v21  ;;  %5437 = vmatprep.subr.msk.mxu0 %vm322_vm1, %v6671_v47 }
 0x181   : > { %v6770_v7 = vadd.f32 %v5288_v0, %v6603_v29  ;;  %v745_v12 = vpop.f32.mrf.mxu1  ;;  %4961 = vmatmul.mubr.msk.f32.gmra.mxu1 %vm289_vm2, %v6393_v1  ;;  %5393 = vmatprep.mubr.msk.f32.mxu0 %vm289_vm2, %v6396_v20  ;;  %v6776_v61 = vpop.permute.xlu0 %3346 }
 0x182   : > { %v6779_v11 = vadd.f32 %v745_v12, %v6519_v32  ;;  %v910_v53 = vpop.f32.mrf.mxu0  ;;  %2561 = vmatprep.mubr.f32.mxu1 %v8474_v18  ;;  %v6782_v57 = vpop.permute.xlu1 %3352 }
 0x183   : > { %8475 = vst [vmem:[#allocation36_spill] sm:$0xff] %v6782_v57  ;;  %v6785_v29 = vadd.f32 %v910_v53, %v6616_v44  ;;  %v747_v17 = vpop.f32.mrf.mxu1 }
 0x184   : > { %v6788_v2 = vadd.f32 %v747_v17, %v6530_v36  ;;  %v5291_v1 = vpop.f32.mrf.mxu0  ;;  %5394 = vmatmul.mubr.msk.f32.gmra.mxu0 %vm289_vm2, %v6423_v23 }
 0x185   : > { %v6793_v0 = vadd.f32 %v5291_v1, %v6622_v13  ;;  %v751_v32 = vpop.f32.mrf.mxu1  ;;  %4962 = vmatmul.mubr.msk.f32.gmra.mxu1 %vm289_vm2, %v6381_v63  ;;  %5396 = vmatprep.mubr.msk.f32.mxu0 %vm289_vm2, %v6411_v22  ;;  %v6799_v44 = vpop.permute.xlu0 %3350 }
 0x186   : > { %v6802_v12 = vadd.f32 %v751_v32, %v6537_v42  ;;  %v920_v36 = vpop.f32.mrf.mxu0  ;;  %2567 = vmatprep.mubr.f32.mxu1 %v8474_v18  ;;  %v6805_v53 = vpop.permute.xlu1 %3356 }
 0x187   : > { %8476 = vst [vmem:[#allocation37_spill] sm:$0xff] %v6805_v53  ;;  %v6808_v13 = vadd.f32 %v920_v36, %v6635_v5  ;;  %v753_v17 = vpop.f32.mrf.mxu1 }
 0x188   : > { %v6811_v1 = vadd.f32 %v753_v17, %v6548_v46  ;;  %v5294_v63 = vpop.f32.mrf.mxu0  ;;  %5397 = vmatmul.mubr.msk.f32.gmra.mxu0 %vm289_vm2, %v6437_v25 }
 0x189   : > { %v6816_v57 = vadd.f32 %v5294_v63, %v6641_v3  ;;  %v757_v42 = vpop.f32.mrf.mxu1  ;;  %4963 = vmatmul.mubr.msk.f32.gmra.mxu1 %vm289_vm2, %v6408_v21  ;;  %5399 = vmatprep.mubr.msk.f32.mxu0 %vm289_vm2, %v6426_v24  ;;  %v6822_v5 = vpop.permute.xlu0 %3354 }
 0x18a   : > { %8477 = vst [vmem:[#allocation38_spill] sm:$0xff] %v6822_v5  ;;  %v6825_v32 = vadd.f32 %v757_v42, %v6555_v52  ;;  %v930_v46 = vpop.f32.mrf.mxu0  ;;  %2573 = vmatprep.mubr.f32.mxu1 %v8474_v18  ;;  %v6828_v36 = vpop.permute.xlu1 %3360 }
 0x18b   : > { %8478 = vst [vmem:[#allocation39_spill] sm:$0xff] %v6828_v36  ;;  %v6831_v3 = vadd.f32 %v930_v46, %v6654_v39  ;;  %v759_v17 = vpop.f32.mrf.mxu1 }
 0x18c   : > { %v6834_v63 = vadd.f32 %v759_v17, %v6566_v55  ;;  %v5297_v21 = vpop.f32.mrf.mxu0  ;;  %5400 = vmatmul.mubr.msk.f32.gmra.mxu0 %vm289_vm2, %v6451_v27 }
 0x18d   : > { %v6839_v53 = vadd.f32 %v5297_v21, %v6660_v58  ;;  %v763_v52 = vpop.f32.mrf.mxu1  ;;  %4964 = vmatmul.mubr.msk.f32.gmra.mxu1 %vm289_vm2, %v6396_v20  ;;  %5402 = vmatprep.mubr.msk.f32.mxu0 %vm289_vm2, %v6440_v26  ;;  %v6845_v39 = vpop.permute.xlu0 %3358 }
 0x18e   : > { %8479 = vst [vmem:[#allocation40_spill] sm:$0xff] %v6845_v39  ;;  %v6848_v42 = vadd.f32 %v763_v52, %v6577_v9  ;;  %v940_v55 = vpop.f32.mrf.mxu0  ;;  %2579 = vmatprep.mubr.f32.mxu1 %v8474_v18  ;;  %v6851_v46 = vpop.permute.xlu1 %3364 }
 0x18f   : > { %8480 = vst [vmem:[#allocation41_spill] sm:$0xff] %v6851_v46  ;;  %v6854_v58 = vadd.f32 %v940_v55, %v6673_v43  ;;  %v765_v17 = vpop.f32.mrf.mxu1 }
 0x190   : > { %v6857_v21 = vadd.f32 %v765_v17, %v6589_v54  ;;  %v5300_v20 = vpop.f32.mrf.mxu0  ;;  %5403 = vmatmul.mubr.msk.f32.gmra.mxu0 %vm289_vm2, %v6466_v4 }
 0x191   : > { %v6862_v36 = vadd.f32 %v5300_v20, %v6679_v48  ;;  %v769_v9 = vpop.f32.mrf.mxu1  ;;  %4965 = vmatmul.mubr.msk.f32.gmra.mxu1 %vm289_vm2, %v6423_v23  ;;  %5405 = vmatprep.mubr.msk.f32.mxu0 %vm289_vm2, %v6455_v28  ;;  %v6868_v43 = vpop.permute.xlu0 %3362 }
 0x192   : > { %8481 = vst [vmem:[#allocation42_spill] sm:$0xff] %v6868_v43  ;;  %v6871_v52 = vadd.f32 %v769_v9, %v6599_v62  ;;  %v950_v54 = vpop.f32.mrf.mxu0  ;;  %2585 = vmatprep.mubr.f32.mxu1 %v8474_v18  ;;  %v3836_v55 = vpop.permute.xlu1 %3835 }
 0x193   : > { %v6875_v17 = vadd.f32 %v950_v54, %v6692_v15  ;;  %v771_v48 = vpop.f32.mrf.mxu1 }
 0x194   : > { %v6878_v20 = vadd.f32 %v771_v48, %v6610_v60  ;;  %v5303_v23 = vpop.f32.mrf.mxu0  ;;  %5406 = vmatmul.mubr.msk.f32.gmra.mxu0 %vm289_vm2, %v6480_v8 }
 0x195   : > { %v6883_v46 = vadd.f32 %v5303_v23, %v6698_v14  ;;  %v775_v62 = vpop.f32.mrf.mxu1  ;;  %4966 = vmatmul.mubr.msk.f32.gmra.mxu1 %vm289_vm2, %v6411_v22  ;;  %5408 = vmatprep.mubr.msk.f32.mxu0 %vm289_vm2, %v6469_v6  ;;  %v6889_v15 = vpop.permute.xlu0 %3366 }
 0x196   : > { %8482 = vst [vmem:[#allocation43_spill] sm:$0xff] %v6889_v15  ;;  %v6892_v60 = vadd.f32 %v775_v62, %v6618_v40  ;;  %v960_v9 = vpop.f32.mrf.mxu0  ;;  %2591 = vmatprep.mubr.f32.mxu1 %v8474_v18  ;;  %v3834_v54 = vpop.permute.xlu1 %3833 }
 0x197   : > { %v6896_v48 = vadd.f32 %v960_v9, %v6711_v51  ;;  %v777_v14 = vpop.f32.mrf.mxu1  ;;  %v6899_v23 = vsel %vm3839_vm9, %v3834_v54, %v3836_v55 }
 0x198   : > { %v6902_v22 = vadd.f32 %v777_v14, %v6629_v30  ;;  %v5306_v43 = vpop.f32.mrf.mxu0  ;;  %5409 = vmatmul.mubr.msk.f32.gmra.mxu0 %vm289_vm2, %v6492_v10 }
 0x199   : > { %v6907_v40 = vadd.f32 %v5306_v43, %v6717_v31  ;;  %v781_v62 = vpop.f32.mrf.mxu1  ;;  %4967 = vmatmul.mubr.msk.f32.gmra.mxu1 %vm289_vm2, %v6437_v25  ;;  %3014 = vmatprep.mubr.f32.mxu0 %v8474_v18  ;;  %v6912_v51 = vpop.permute.xlu0 %3837 }
 0x19a   : > { %v6915_v9 = vadd.f32 %v781_v62, %v6637_v50  ;;  %v970_v30 = vpop.f32.mrf.mxu0  ;;  %2597 = vmatprep.mubr.f32.mxu1 %v8474_v18  ;;  %v3841_v25 = vsel %vm3839_vm9, %v3836_v55, %v6912_v51 }
 0x19b   : > { %v6919_v54 = vadd.f32 %v970_v30, %v6730_v49  ;;  %v783_v14 = vpop.f32.mrf.mxu1 }
 0x19c   : > { %v6922_v31 = vadd.f32 %v783_v14, %v6648_v33  ;;  %v1156_v43 = vpop.f32.mrf.mxu0  ;;  %4995 = vmatmul.mubr.msk.f32.vlgmr.msra.gmra.mxu0 %vm289_vm2, %v6528_v34 }
 0x19d   : > { %v6929_v50 = vadd.f32 %v1156_v43, %v6750_v41  ;;  %v787_v62 = vpop.f32.mrf.mxu1  ;;  %4968 = vmatmul.mubr.msk.f32.gmra.mxu1 %vm289_vm2, %v6426_v24  ;;  %3020 = vmatprep.mubr.f32.mxu0 %v8474_v18 }
 0x19e   : > { %v6935_v49 = vadd.f32 %v787_v62, %v6656_v35  ;;  %v1158_v33 = vpop.f32.mrf.mxu0  ;;  %2603 = vmatprep.mubr.f32.mxu1 %v8474_v18  ;;  %5438 = vmatpush3.msk.msra.mxu0 %vm322_vm1, %v6671_v47  ;;  %v8483_v47 = vld [vmem:[#allocation24_spill] sm:$0xff]  ;;  %v8484_v62 = vld [vmem:[#allocation25_spill] sm:$0xff] }
 0x19f   : > { %v6941_v55 = vadd.f32 %v1158_v33, %v6763_v56  ;;  %v789_v41 = vpop.f32.mrf.mxu1  ;;  %5063 = vmatprep.subr.msk.mxu0 %vm322_vm1, %v3841_v25 }
 0x1a0   : > { %v6945_v30 = vadd.f32 %v789_v41, %v6667_v37  ;;  %v1162_v24 = vpop.f32.mrf.mxu0  ;;  %4996 = vmatmul.mubr.msk.f32.gmra.mxu0 %vm289_vm2, %v6514_v19  ;;  %v8485_v41 = vld [vmem:[#allocation8_spill] sm:$0xff] }
 0x1a1   : > { %v6950_v35 = vadd.f32 %v1162_v24, %v6779_v11  ;;  %v793_v14 = vpop.f32.mrf.mxu1  ;;  %4969 = vmatmul.mubr.msk.f32.gmra.mxu1 %vm289_vm2, %v6451_v27  ;;  %3026 = vmatprep.mubr.f32.mxu0 %v8474_v18 }
 0x1a2   : > { %v6956_v56 = vadd.f32 %v793_v14, %v8483_v47  ;;  %v1164_v43 = vpop.f32.mrf.mxu0  ;;  %2609 = vmatprep.mubr.f32.mxu1 %v8474_v18  ;;  %v8486_v14 = vld [vmem:[#allocation27_spill] sm:$0xff] }
 0x1a3   : > { %v6960_v37 = vadd.f32 %v1164_v43, %v6788_v2  ;;  %v795_v25 = vpop.f32.mrf.mxu1 }
 0x1a4   : > { %v6963_v33 = vadd.f32 %v795_v25, %v8484_v62  ;;  %v1168_v11 = vpop.f32.mrf.mxu0  ;;  %4997 = vmatmul.mubr.msk.f32.gmra.mxu0 %vm289_vm2, %v8485_v41  ;;  %v8487_v62 = vld [vmem:[#allocation29_spill] sm:$0xff] }
 0x1a5   : > { %v6968_v27 = vadd.f32 %v1168_v11, %v6802_v12  ;;  %v799_v24 = vpop.f32.mrf.mxu1  ;;  %4970 = vmatmul.mubr.msk.f32.gmra.mxu1 %vm289_vm2, %v6440_v26  ;;  %3032 = vmatprep.mubr.f32.mxu0 %v8474_v18  ;;  %v8488_v11 = vld [vmem:[#allocation5_spill] sm:$0xff] }
 0x1a6   : > { %v6974_v2 = vadd.f32 %v799_v24, %v8486_v14  ;;  %v1170_v47 = vpop.f32.mrf.mxu0  ;;  %2615 = vmatprep.mubr.f32.mxu1 %v8474_v18  ;;  %v8490_v24 = vld [vmem:[#allocation31_spill] sm:$0xff] }
 0x1a7   : > { %v6978_v43 = vadd.f32 %v1170_v47, %v6811_v1  ;;  %v801_v25 = vpop.f32.mrf.mxu1 }
 0x1a8   : > { %v6981_v15 = vadd.f32 %v801_v25, %v8487_v62  ;;  %v1174_v12 = vpop.f32.mrf.mxu0  ;;  %4998 = vmatmul.mubr.msk.f32.gmra.mxu0 %vm289_vm2, %v8488_v11  ;;  %v8491_v62 = vld [vmem:[#allocation33_spill] sm:$0xff] }
 0x1a9   : > { %v6986_v26 = vadd.f32 %v1174_v12, %v6825_v32  ;;  %v805_v39 = vpop.f32.mrf.mxu1  ;;  %4971 = vmatmul.mubr.msk.f32.gmra.mxu1 %vm289_vm2, %v6466_v4  ;;  %3038 = vmatprep.mubr.f32.mxu0 %v8474_v18  ;;  %v8492_v12 = vld [vmem:[#allocation12_spill] sm:$0xff] }
 0x1aa   : > { %v6992_v1 = vadd.f32 %v805_v39, %v8490_v24  ;;  %v1176_v14 = vpop.f32.mrf.mxu0  ;;  %2621 = vmatprep.mubr.f32.mxu1 %v8474_v18 }
 0x1ab   : > { %8489 = vst [vmem:[#allocation24_spill] sm:$0xff] %v6986_v26  ;;  %v6996_v47 = vadd.f32 %v1176_v14, %v6834_v63  ;;  %v807_v25 = vpop.f32.mrf.mxu1 }
 0x1ac   : > { %v6999_v5 = vadd.f32 %v807_v25, %v8491_v62  ;;  %v1180_v32 = vpop.f32.mrf.mxu0  ;;  %4999 = vmatmul.mubr.msk.f32.gmra.mxu0 %vm289_vm2, %v8492_v12  ;;  %v8494_v25 = vld [vmem:[#allocation9_spill] sm:$0xff] }
 0x1ad   : > { %v7004_v4 = vadd.f32 %v1180_v32, %v6848_v42  ;;  %v7006_v26 = vpop.f32.mrf.mxu1  ;;  %4972 = vmatmul.mubr.msk.f32.gmra.mxu1 %vm289_vm2, %v6455_v28  ;;  %3044 = vmatprep.mubr.f32.mxu0 %v8474_v18 }
 0x1ae   : > { %v1182_v63 = vpop.f32.mrf.mxu0  ;;  %2627 = vmatprep.mubr.f32.mxu1 %v8474_v18 }
 0x1af   : > { %v7013_v39 = vadd.f32 %v1182_v63, %v6857_v21  ;;  %v7015_v24 = vpop.f32.mrf.mxu1 }
 0x1b0   : > { %v1186_v14 = vpop.f32.mrf.mxu0  ;;  %5000 = vmatmul.mubr.msk.f32.gmra.mxu0 %vm289_vm2, %v8494_v25 }
 0x1b1   : > { %8493 = vst [vmem:[#allocation25_spill] sm:$0xff] %v7013_v39  ;;  %v7020_v42 = vadd.f32 %v1186_v14, %v6871_v52  ;;  %v7022_v62 = vpop.f32.mrf.mxu1  ;;  %4973 = vmatmul.mubr.msk.f32.gmra.mxu1 %vm289_vm2, %v6480_v8  ;;  %3050 = vmatprep.mubr.f32.mxu0 %v8474_v18  ;;  %v8497_v39 = vld [vmem:[#allocation15_spill] sm:$0xff] }
 0x1b2   : > { %v1188_v28 = vpop.f32.mrf.mxu0  ;;  %2633 = vmatprep.mubr.f32.mxu1 %v8474_v18 }
 0x1b3   : > { %8495 = vst [vmem:[#allocation8_spill] sm:$0xff] %v7020_v42  ;;  %v7029_v21 = vadd.f32 %v1188_v28, %v6878_v20  ;;  %v7031_v32 = vpop.f32.mrf.mxu1  ;;  %v8500_v42 = vld [vmem:[#allocation13_spill] sm:$0xff] }
 0x1b4   : > { %v1192_v63 = vpop.f32.mrf.mxu0  ;;  %5001 = vmatmul.mubr.msk.f32.gmra.mxu0 %vm289_vm2, %v8497_v39 }
 0x1b5   : > { %8496 = vst [vmem:[#allocation27_spill] sm:$0xff] %v7029_v21  ;;  %v7036_v52 = vadd.f32 %v1192_v63, %v6892_v60  ;;  %v7038_v14 = vpop.f32.mrf.mxu1  ;;  %4974 = vmatmul.mubr.msk.f32.gmra.mxu1 %vm289_vm2, %v6469_v6  ;;  %3056 = vmatprep.mubr.f32.mxu0 %v8474_v18 }
 0x1b6   : > { %v1194_v8 = vpop.f32.mrf.mxu0  ;;  %2639 = vmatprep.mubr.f32.mxu1 %v8474_v18 }
 0x1b7   : > { %8498 = vst [vmem:[#allocation29_spill] sm:$0xff] %v7036_v52  ;;  %v7045_v20 = vadd.f32 %v1194_v8, %v6902_v22  ;;  %v7047_v28 = vpop.f32.mrf.mxu1  ;;  %v8502_v22 = vld [vmem:[#allocation26_spill] sm:$0xff] }
 0x1b8   : > { %v1198_v21 = vpop.f32.mrf.mxu0  ;;  %5002 = vmatmul.mubr.msk.f32.gmra.mxu0 %vm289_vm2, %v8500_v42  ;;  %v3375_v8 = vsel %vm3374_vm8, %v8502_v22, %v6684_v45  ;;  %v8504_v22 = vld [vmem:[#allocation16_spill] sm:$0xff] }
 0x1b9   : > { %8499 = vst [vmem:[#allocation5_spill] sm:$0xff] %v7045_v20  ;;  %v7052_v60 = vadd.f32 %v1198_v21, %v6915_v9  ;;  %v7054_v63 = vpop.f32.mrf.mxu1  ;;  %4975 = vmatmul.mubr.msk.f32.gmra.mxu1 %vm289_vm2, %v6492_v10  ;;  %3062 = vmatprep.mubr.f32.mxu0 %v8474_v18 }
 0x1ba   : > { %v1200_v6 = vpop.f32.mrf.mxu0  ;;  %5413 = vmatprep.mubr.msk.f32.mxu1 %vm289_vm2, %v6528_v34 }
 0x1bb   : > { %8501 = vst [vmem:[#allocation31_spill] sm:$0xff] %v7052_v60  ;;  %v7065_v20 = vadd.f32 %v1200_v6, %v6922_v31  ;;  %v7067_v9 = vpop.f32.mrf.mxu1  ;;  %v8503_v60 = vld [vmem:[#allocation17_spill] sm:$0xff] }
 0x1bc   : > { %v1204_v21 = vpop.f32.mrf.mxu0  ;;  %5003 = vmatmul.mubr.msk.f32.gmra.mxu0 %vm289_vm2, %v8503_v60 }
 0x1bd   : > { %v7072_v10 = vadd.f32 %v1204_v21, %v6935_v49  ;;  %v5311_v52 = vpop.f32.mrf.mxu1  ;;  %5414 = vmatmul.mubr.msk.f32.vlgmr.msra.gmra.mxu1 %vm289_vm2, %v6514_v19  ;;  %3068 = vmatprep.mubr.f32.mxu0 %v8474_v18 }
 0x1be   : > { %v7078_v34 = vadd.f32 %v5311_v52, %v6741_v59  ;;  %5029 = vmatpush1.msk.msra.mxu1 %vm322_vm1, %v3375_v8  ;;  %v1206_v45 = vpop.f32.mrf.mxu0  ;;  %5416 = vmatprep.mubr.msk.f32.mxu1 %vm289_vm2, %v8485_v41 }
 0x1bf   : > { %v7084_v31 = vadd.f32 %v1206_v45, %v6945_v30  ;;  %v1317_v49 = vpop.f32.mrf.mxu1  ;;  %5463 = vmatprep.subr.msk.mxu1 %vm322_vm1, %v6912_v51  ;;  %v8505_v45 = vld [vmem:[#allocation19_spill] sm:$0xff] }
 0x1c0   : > { %v7089_v19 = vadd.f32 %v1317_v49, %v6758_v16  ;;  %v1210_v6 = vpop.f32.mrf.mxu0  ;;  %5004 = vmatmul.mubr.msk.f32.gmra.mxu0 %vm289_vm2, %v8504_v22 }
 0x1c1   : > { %v7094_v59 = vadd.f32 %v1210_v6, %v6956_v56  ;;  %v5314_v52 = vpop.f32.mrf.mxu1  ;;  %5417 = vmatmul.mubr.msk.f32.gmra.mxu1 %vm289_vm2, %v8488_v11  ;;  %3074 = vmatprep.mubr.f32.mxu0 %v8474_v18 }
 0x1c2   : > { %v7100_v30 = vadd.f32 %v5314_v52, %v6770_v7  ;;  %v1212_v41 = vpop.f32.mrf.mxu0  ;;  %5419 = vmatprep.mubr.msk.f32.mxu1 %vm289_vm2, %v8492_v12  ;;  %v8506_v52 = vld [vmem:[#allocation18_spill] sm:$0xff] }
 0x1c3   : > { %v7105_v16 = vadd.f32 %v1212_v41, %v6963_v33  ;;  %v1327_v8 = vpop.f32.mrf.mxu1 }
 0x1c4   : > { %v7108_v56 = vadd.f32 %v1327_v8, %v6785_v29  ;;  %v1216_v21 = vpop.f32.mrf.mxu0  ;;  %5005 = vmatmul.mubr.msk.f32.gmra.mxu0 %vm289_vm2, %v8505_v45 }
 0x1c5   : > { %v7113_v11 = vadd.f32 %v1216_v21, %v6974_v2  ;;  %v5317_v7 = vpop.f32.mrf.mxu1  ;;  %5420 = vmatmul.mubr.msk.f32.gmra.mxu1 %vm289_vm2, %v8494_v25  ;;  %3080 = vmatprep.mubr.f32.mxu0 %v8474_v18 }
 0x1c6   : > { %v7119_v33 = vadd.f32 %v5317_v7, %v6793_v0  ;;  %v1218_v12 = vpop.f32.mrf.mxu0  ;;  %5422 = vmatprep.mubr.msk.f32.mxu1 %vm289_vm2, %v8497_v39  ;;  %v8508_v7 = vld [vmem:[#allocation21_spill] sm:$0xff] }
 0x1c7   : > { %v7124_v29 = vadd.f32 %v1218_v12, %v6981_v15  ;;  %v1337_v49 = vpop.f32.mrf.mxu1 }
 0x1c8   : > { %v7127_v2 = vadd.f32 %v1337_v49, %v6808_v13  ;;  %v1222_v6 = vpop.f32.mrf.mxu0  ;;  %5006 = vmatmul.mubr.msk.f32.gmra.mxu0 %vm289_vm2, %v8506_v52  ;;  %v8507_v13 = vld [vmem:[#allocation2_spill] sm:$0xff] }
 0x1c9   : > { %v7132_v25 = vadd.f32 %v1222_v6, %v6992_v1  ;;  %v5320_v0 = vpop.f32.mrf.mxu1  ;;  %5423 = vmatmul.mubr.msk.f32.gmra.mxu1 %vm289_vm2, %v8500_v42  ;;  %3086 = vmatprep.mubr.f32.mxu0 %v8474_v18  ;;  %v812_v41 = vadd.f32 %v7006_v26, %v8507_v13  ;;  %v8510_v26 = vld [vmem:[#allocation4_spill] sm:$0xff] }
 0x1ca   : > { %v7138_v15 = vadd.f32 %v5320_v0, %v6816_v57  ;;  %v1224_v39 = vpop.f32.mrf.mxu0  ;;  %5425 = vmatprep.mubr.msk.f32.mxu1 %vm289_vm2, %v8503_v60  ;;  %v8509_v57 = vld [vmem:[#allocation3_spill] sm:$0xff]  ;;  %v818_v6 = vadd.f32 %v7022_v62, %v8510_v26  ;;  %v8515_v26 = vld [vmem:[#allocation10_spill] sm:$0xff] }
 0x1cb   : > { %v7145_v8 = vadd.f32 %v1224_v39, %v6999_v5  ;;  %v1347_v1 = vpop.f32.mrf.mxu1  ;;  %v814_v12 = vadd.f32 %v7015_v24, %v8509_v57 }
 0x1cc   : > { %v7148_v21 = vadd.f32 %v1347_v1, %v6831_v3  ;;  %v1228_v42 = vpop.f32.mrf.mxu0  ;;  %5007 = vmatmul.mubr.msk.f32.gmra.mxu0 %vm289_vm2, %v8508_v7 }
 0x1cd   : > { %v7154_v49 = vadd.f32 %v1228_v42, %v812_v41  ;;  %v5323_v60 = vpop.f32.mrf.mxu1  ;;  %5426 = vmatmul.mubr.msk.f32.gmra.mxu1 %vm289_vm2, %v8504_v22  ;;  %3092 = vmatprep.mubr.f32.mxu0 %v8474_v18  ;;  %v8511_v22 = vld [vmem:[#allocation20_spill] sm:$0xff]  ;;  %v8512_v41 = vld [vmem:[#allocation6_spill] sm:$0xff] }
 0x1ce   : > { %v7160_v5 = vadd.f32 %v5323_v60, %v6839_v53  ;;  %v1230_v3 = vpop.f32.mrf.mxu0  ;;  %5428 = vmatprep.mubr.msk.f32.mxu1 %vm289_vm2, %v8505_v45  ;;  %v820_v53 = vadd.f32 %v7031_v32, %v8512_v41  ;;  %v8513_v45 = vld [vmem:[#allocation7_spill] sm:$0xff] }
 0x1cf   : > { %v7166_v0 = vadd.f32 %v1230_v3, %v814_v12  ;;  %v1357_v24 = vpop.f32.mrf.mxu1  ;;  %v824_v57 = vadd.f32 %v7038_v14, %v8513_v45 }
 0x1d0   : > { %v7169_v39 = vadd.f32 %v1357_v24, %v6854_v58  ;;  %v1234_v13 = vpop.f32.mrf.mxu0  ;;  %5008 = vmatmul.mubr.msk.f32.gmra.mxu0 %vm289_vm2, %v8511_v22 }
 0x1d1   : > { %v7175_v1 = vadd.f32 %v1234_v13, %v818_v6  ;;  %v5326_v42 = vpop.f32.mrf.mxu1  ;;  %5429 = vmatmul.mubr.msk.f32.gmra.mxu1 %vm289_vm2, %v8506_v52  ;;  %3098 = vmatprep.mubr.f32.mxu0 %v8474_v18  ;;  %v8514_v52 = vld [vmem:[#allocation23_spill] sm:$0xff] }
 0x1d2   : > { %v7181_v62 = vadd.f32 %v5326_v42, %v6862_v36  ;;  %v1236_v58 = vpop.f32.mrf.mxu0  ;;  %5431 = vmatprep.mubr.msk.f32.mxu1 %vm289_vm2, %v8508_v7  ;;  %v826_v36 = vadd.f32 %v7047_v28, %v8515_v26  ;;  %v8516_v7 = vld [vmem:[#allocation11_spill] sm:$0xff] }
 0x1d3   : > { %v7187_v12 = vadd.f32 %v1236_v58, %v820_v53  ;;  %v1367_v32 = vpop.f32.mrf.mxu1  ;;  %v830_v13 = vadd.f32 %v7054_v63, %v8516_v7  ;;  %v8518_v58 = vld [vmem:[#allocation14_spill] sm:$0xff]  ;;  %v8519_v63 = vld [vmem:[#allocation28_spill] sm:$0xff] }
 0x1d4   : > { %v7190_v60 = vadd.f32 %v1367_v32, %v6875_v17  ;;  %v1240_v3 = vpop.f32.mrf.mxu0  ;;  %5009 = vmatmul.mubr.msk.f32.gmra.mxu0 %vm289_vm2, %v8514_v52 }
 0x1d5   : > { %v7196_v6 = vadd.f32 %v1240_v3, %v824_v57  ;;  %v5329_v24 = vpop.f32.mrf.mxu1  ;;  %5432 = vmatmul.mubr.msk.f32.gmra.mxu1 %vm289_vm2, %v8511_v22  ;;  %3104 = vmatprep.mubr.f32.mxu0 %v8474_v18  ;;  %v8517_v22 = vld [vmem:[#allocation22_spill] sm:$0xff] }
 0x1d6   : > { %v7202_v14 = vadd.f32 %v5329_v24, %v6883_v46  ;;  %v1242_v17 = vpop.f32.mrf.mxu0  ;;  %5434 = vmatprep.mubr.msk.f32.mxu1 %vm289_vm2, %v8514_v52  ;;  %v832_v46 = vadd.f32 %v7067_v9, %v8518_v58 }
 0x1d7   : > { %v7208_v41 = vadd.f32 %v1242_v17, %v826_v36  ;;  %v1377_v28 = vpop.f32.mrf.mxu1  ;;  %v8520_v36 = vld [vmem:[#allocation32_spill] sm:$0xff] }
 0x1d8   : > { %v7211_v53 = vadd.f32 %v1377_v28, %v6896_v48  ;;  %v1246_v42 = vpop.f32.mrf.mxu0  ;;  %5010 = vmatmul.mubr.msk.f32.gmra.mxu0 %vm289_vm2, %v8517_v22 }
 0x1d9   : > { %v7217_v45 = vadd.f32 %v1246_v42, %v830_v13  ;;  %v5332_v57 = vpop.f32.mrf.mxu1  ;;  %5435 = vmatmul.mubr.msk.f32.gmra.mxu1 %vm289_vm2, %v8517_v22  ;;  %5439 = vmatprep.mubr.msk.f32.mxu0 %vm289_vm2, %v8519_v63  ;;  %v8522_v22 = vld [vmem:[#allocation35_spill] sm:$0xff] }
 0x1da   : > { %v7224_v32 = vadd.f32 %v5332_v57, %v6907_v40  ;;  %v1248_v48 = vpop.f32.mrf.mxu0  ;;  %3479 = vmatprep.mubr.f32.mxu1 %v8474_v18  ;;  %v8521_v40 = vld [vmem:[#allocation30_spill] sm:$0xff] }
 0x1db   : > { %v7227_v3 = vadd.f32 %v1248_v48, %v832_v46  ;;  %v1387_v52 = vpop.f32.mrf.mxu1 }
 0x1dc   : > { %v7230_v9 = vadd.f32 %v1387_v52, %v6919_v54  ;;  %v5337_v26 = vpop.f32.mrf.mxu0  ;;  %5440 = vmatmul.mubr.msk.f32.vlgmr.msra.gmra.mxu0 %vm289_vm2, %v8520_v36 }
 0x1dd   : > { %v7235_v24 = vadd.f32 %v5337_v26, %v7078_v34  ;;  %v1621_v17 = vpop.f32.mrf.mxu1  ;;  %5030 = vmatmul.mubr.msk.f32.vlgmr.msra.gmra.mxu1 %vm289_vm2, %v8519_v63  ;;  %5442 = vmatprep.mubr.msk.f32.mxu0 %vm289_vm2, %v8521_v40 }
 0x1de   : > { %v7242_v7 = vadd.f32 %v1621_v17, %v6929_v50  ;;  %5464 = vmatpush3.msk.msra.mxu1 %vm322_vm1, %v6912_v51  ;;  %v1782_v54 = vpop.f32.mrf.mxu0  ;;  %3485 = vmatprep.mubr.f32.mxu1 %v8474_v18 }
 0x1df   : > { %v7248_v13 = vadd.f32 %v1782_v54, %v7089_v19  ;;  %v1623_v34 = vpop.f32.mrf.mxu1  ;;  %5064 = vmatpush1.msk.msra.mxu0 %vm322_vm1, %v6899_v23  ;;  %v8523_v19 = vld [vmem:[#allocation34_spill] sm:$0xff] }
 0x1e0   : > { %v7253_v28 = vadd.f32 %v1623_v34, %v6941_v55  ;;  %v5340_v42 = vpop.f32.mrf.mxu0  ;;  %5443 = vmatmul.mubr.msk.f32.gmra.mxu0 %vm289_vm2, %v8522_v22 }
 0x1e1   : > { %v7258_v50 = vadd.f32 %v5340_v42, %v7100_v30  ;;  %v1627_v51 = vpop.f32.mrf.mxu1  ;;  %5031 = vmatmul.mubr.msk.f32.gmra.mxu1 %vm289_vm2, %v8520_v36  ;;  %5445 = vmatprep.mubr.msk.f32.mxu0 %vm289_vm2, %v8523_v19 }
 0x1e2   : > { %v7265_v58 = vadd.f32 %v1627_v51, %v6950_v35  ;;  %v1792_v23 = vpop.f32.mrf.mxu0  ;;  %3491 = vmatprep.mubr.f32.mxu1 %v8474_v18  ;;  %v8526_v51 = vld [vmem:[#allocation38_spill] sm:$0xff] }
 0x1e3   : > { %v7269_v55 = vadd.f32 %v1792_v23, %v7108_v56  ;;  %v1629_v46 = vpop.f32.mrf.mxu1 }
 0x1e4   : > { %v7272_v30 = vadd.f32 %v1629_v46, %v6960_v37  ;;  %v5343_v57 = vpop.f32.mrf.mxu0  ;;  %5446 = vmatmul.mubr.msk.f32.gmra.mxu0 %vm289_vm2, %v6776_v61  ;;  %v8527_v46 = vld [vmem:[#allocation37_spill] sm:$0xff] }
 0x1e5   : > { %v7277_v63 = vadd.f32 %v5343_v57, %v7119_v33  ;;  %v1633_v48 = vpop.f32.mrf.mxu1  ;;  %5032 = vmatmul.mubr.msk.f32.gmra.mxu1 %vm289_vm2, %v8521_v40  ;;  %5448 = vmatprep.mubr.msk.f32.mxu0 %vm289_vm2, %v6755_v38 }
 0x1e6   : > { %v7284_v35 = vadd.f32 %v1633_v48, %v6968_v27  ;;  %v1802_v56 = vpop.f32.mrf.mxu0  ;;  %3497 = vmatprep.mubr.f32.mxu1 %v8474_v18  ;;  %v8524_v27 = vld [vmem:[#allocation36_spill] sm:$0xff] }
 0x1e7   : > { %v7288_v37 = vadd.f32 %v1802_v56, %v7127_v2  ;;  %v1635_v52 = vpop.f32.mrf.mxu1  ;;  %v8525_v2 = vld [vmem:[#allocation24_spill] sm:$0xff]  ;;  %v8528_v56 = vld [vmem:[#allocation25_spill] sm:$0xff] }
 0x1e8   : > { %v7291_v33 = vadd.f32 %v1635_v52, %v6978_v43  ;;  %v5346_v26 = vpop.f32.mrf.mxu0  ;;  %5449 = vmatmul.mubr.msk.f32.gmra.mxu0 %vm289_vm2, %v6799_v44 }
 0x1e9   : > { %v7296_v36 = vadd.f32 %v5346_v26, %v7138_v15  ;;  %v1639_v17 = vpop.f32.mrf.mxu1  ;;  %5033 = vmatmul.mubr.msk.f32.gmra.mxu1 %vm289_vm2, %v8522_v22  ;;  %5451 = vmatprep.mubr.msk.f32.mxu0 %vm289_vm2, %v8524_v27  ;;  %v8529_v26 = vld [vmem:[#allocation40_spill] sm:$0xff] }
 0x1ea   : > { %v7303_v40 = vadd.f32 %v1639_v17, %v8525_v2  ;;  %v1812_v54 = vpop.f32.mrf.mxu0  ;;  %3503 = vmatprep.mubr.f32.mxu1 %v8474_v18 }
 0x1eb   : > { %v7307_v43 = vadd.f32 %v1812_v54, %v7148_v21  ;;  %v1641_v34 = vpop.f32.mrf.mxu1 }
 0x1ec   : > { %v7310_v15 = vadd.f32 %v1641_v34, %v6996_v47  ;;  %v5349_v42 = vpop.f32.mrf.mxu0  ;;  %5452 = vmatmul.mubr.msk.f32.gmra.mxu0 %vm289_vm2, %v8526_v51 }
 0x1ed   : > { %v7315_v22 = vadd.f32 %v5349_v42, %v7160_v5  ;;  %v1645_v23 = vpop.f32.mrf.mxu1  ;;  %5034 = vmatmul.mubr.msk.f32.gmra.mxu1 %vm289_vm2, %v8523_v19  ;;  %5454 = vmatprep.mubr.msk.f32.mxu0 %vm289_vm2, %v8527_v46 }
 0x1ee   : > { %v7322_v21 = vadd.f32 %v1645_v23, %v7004_v4  ;;  %v1822_v57 = vpop.f32.mrf.mxu0  ;;  %3509 = vmatprep.mubr.f32.mxu1 %v8474_v18  ;;  %v8530_v4 = vld [vmem:[#allocation39_spill] sm:$0xff] }
 0x1ef   : > { %v7326_v47 = vadd.f32 %v1822_v57, %v7169_v39  ;;  %v1647_v48 = vpop.f32.mrf.mxu1  ;;  %v8531_v39 = vld [vmem:[#allocation8_spill] sm:$0xff]  ;;  %v8533_v23 = vld [vmem:[#allocation27_spill] sm:$0xff] }
 0x1f0   : > { %v7329_v5 = vadd.f32 %v1647_v48, %v8528_v56  ;;  %v5352_v52 = vpop.f32.mrf.mxu0  ;;  %5455 = vmatmul.mubr.msk.f32.gmra.mxu0 %vm289_vm2, %v8529_v26  ;;  %v8534_v48 = vld [vmem:[#allocation42_spill] sm:$0xff] }
 0x1f1   : > { %v7334_v19 = vadd.f32 %v5352_v52, %v7181_v62  ;;  %v1651_v17 = vpop.f32.mrf.mxu1  ;;  %5035 = vmatmul.mubr.msk.f32.gmra.mxu1 %vm289_vm2, %v6776_v61  ;;  %5457 = vmatprep.mubr.msk.f32.mxu0 %vm289_vm2, %v8530_v4  ;;  %v8536_v52 = vld [vmem:[#allocation41_spill] sm:$0xff] }
 0x1f2   : > { %v7341_v2 = vadd.f32 %v1651_v17, %v8531_v39  ;;  %v1832_v54 = vpop.f32.mrf.mxu0  ;;  %3515 = vmatprep.mubr.f32.mxu1 %v8474_v18 }
 0x1f3   : > { %v7345_v34 = vadd.f32 %v1832_v54, %v7190_v60  ;;  %v1653_v42 = vpop.f32.mrf.mxu1  ;;  %v8537_v60 = vld [vmem:[#allocation29_spill] sm:$0xff] }
 0x1f4   : > { %v7348_v62 = vadd.f32 %v1653_v42, %v8533_v23  ;;  %v5355_v57 = vpop.f32.mrf.mxu0  ;;  %5458 = vmatmul.mubr.msk.f32.gmra.mxu0 %vm289_vm2, %v8534_v48  ;;  %v8538_v23 = vld [vmem:[#allocation5_spill] sm:$0xff] }
 0x1f5   : > { %8532 = vst [vmem:[#allocation33_spill] sm:$0xff] %v7345_v34  ;;  %v7353_v61 = vadd.f32 %v5355_v57, %v7202_v14  ;;  %v1657_v56 = vpop.f32.mrf.mxu1  ;;  %5036 = vmatmul.mubr.msk.f32.gmra.mxu1 %vm289_vm2, %v6755_v38  ;;  %5460 = vmatprep.mubr.msk.f32.mxu0 %vm289_vm2, %v8536_v52 }
 0x1f6   : > { %v7360_v17 = vadd.f32 %v1657_v56, %v8537_v60  ;;  %v1842_v39 = vpop.f32.mrf.mxu0  ;;  %3521 = vmatprep.mubr.f32.mxu1 %v8474_v18  ;;  %v7377_v56 = vpop.permute.xlu0 %3801 }
 0x1f7   : > { %8535 = vst [vmem:[#allocation12_spill] sm:$0xff] %v7353_v61  ;;  %v7364_v54 = vadd.f32 %v1842_v39, %v7211_v53  ;;  %v1659_v42 = vpop.f32.mrf.mxu1  ;;  %v8539_v61 = vld [vmem:[#allocation43_spill] sm:$0xff] }
 0x1f8   : > { %v7367_v14 = vadd.f32 %v1659_v42, %v8538_v23  ;;  %v5358_v57 = vpop.f32.mrf.mxu0  ;;  %5461 = vmatmul.mubr.msk.f32.gmra.mxu0 %vm289_vm2, %v8539_v61  ;;  %v8541_v53 = vld [vmem:[#allocation31_spill] sm:$0xff] }
 0x1f9   : > { %v7372_v38 = vadd.f32 %v5358_v57, %v7224_v32  ;;  %v1663_v34 = vpop.f32.mrf.mxu1  ;;  %5037 = vmatmul.mubr.msk.f32.gmra.mxu1 %vm289_vm2, %v6799_v44  ;;  %3944 = vmatprep.mubr.f32.mxu0 %v8474_v18 }
 0x1fa   : > { %v7380_v60 = vadd.f32 %v1663_v34, %v8541_v53  ;;  %v1852_v39 = vpop.f32.mrf.mxu0  ;;  %3527 = vmatprep.mubr.f32.mxu1 %v8474_v18  ;;  %v7396_v34 = vpop.permute.xlu1 %3803 }
 0x1fb   : > { %8540 = vst [vmem:[#allocation9_spill] sm:$0xff] %v7372_v38  ;;  %v7384_v42 = vadd.f32 %v1852_v39, %v7230_v9  ;;  %v1665_v23 = vpop.f32.mrf.mxu1 }
 0x1fc   : > { %v7387_v32 = vadd.f32 %v1665_v23, %v7065_v20  ;;  %v2086_v57 = vpop.f32.mrf.mxu0  ;;  %5065 = vmatmul.mubr.msk.f32.vlgmr.msra.gmra.mxu0 %vm289_vm2, %v7377_v56 }
 0x1fd   : > { %v7392_v44 = vadd.f32 %v2086_v57, %v7242_v7  ;;  %v1669_v38 = vpop.f32.mrf.mxu1  ;;  %5038 = vmatmul.mubr.msk.f32.gmra.mxu1 %vm289_vm2, %v8524_v27  ;;  %3950 = vmatprep.mubr.f32.mxu0 %v8474_v18 }
 0x1fe   : > { %v7400_v9 = vadd.f32 %v1669_v38, %v7072_v10  ;;  %v2088_v20 = vpop.f32.mrf.mxu0  ;;  %3533 = vmatprep.mubr.f32.mxu1 %v8474_v18  ;;  %v7417_v10 = vpop.permute.xlu0 %3805 }
 0x1ff   : > { %v7404_v53 = vadd.f32 %v2088_v20, %v7253_v28  ;;  %v1671_v39 = vpop.f32.mrf.mxu1 }
 0x200   : > { %v7407_v7 = vadd.f32 %v1671_v39, %v7084_v31  ;;  %v2092_v23 = vpop.f32.mrf.mxu0  ;;  %5066 = vmatmul.mubr.msk.f32.gmra.mxu0 %vm289_vm2, %v7396_v34 }
 0x201   : > { %v7412_v27 = vadd.f32 %v2092_v23, %v7265_v58  ;;  %v1675_v57 = vpop.f32.mrf.mxu1  ;;  %5039 = vmatmul.mubr.msk.f32.gmra.mxu1 %vm289_vm2, %v8526_v51  ;;  %3956 = vmatprep.mubr.f32.mxu0 %v8474_v18 }
 0x202   : > { %v7420_v28 = vadd.f32 %v1675_v57, %v7094_v59  ;;  %v2094_v31 = vpop.f32.mrf.mxu0  ;;  %3539 = vmatprep.mubr.f32.mxu1 %v8474_v18  ;;  %v7436_v59 = vpop.permute.xlu1 %3807 }
 0x203   : > { %v7424_v38 = vadd.f32 %v2094_v31, %v7272_v30  ;;  %v1677_v20 = vpop.f32.mrf.mxu1 }
 0x204   : > { %v7427_v58 = vadd.f32 %v1677_v20, %v7105_v16  ;;  %v2098_v39 = vpop.f32.mrf.mxu0  ;;  %5067 = vmatmul.mubr.msk.f32.gmra.mxu0 %vm289_vm2, %v7417_v10 }
 0x205   : > { %v7432_v51 = vadd.f32 %v2098_v39, %v7284_v35  ;;  %v1681_v23 = vpop.f32.mrf.mxu1  ;;  %5040 = vmatmul.mubr.msk.f32.gmra.mxu1 %vm289_vm2, %v8527_v46  ;;  %3962 = vmatprep.mubr.f32.mxu0 %v8474_v18 }
 0x206   : > { %v7440_v30 = vadd.f32 %v1681_v23, %v7113_v11  ;;  %v2100_v16 = vpop.f32.mrf.mxu0  ;;  %3545 = vmatprep.mubr.f32.mxu1 %v8474_v18  ;;  %v7457_v11 = vpop.permute.xlu0 %3809 }
 0x207   : > { %v7444_v57 = vadd.f32 %v2100_v16, %v7291_v33  ;;  %v1683_v31 = vpop.f32.mrf.mxu1 }
 0x208   : > { %v7447_v35 = vadd.f32 %v1683_v31, %v7124_v29  ;;  %v2104_v20 = vpop.f32.mrf.mxu0  ;;  %5068 = vmatmul.mubr.msk.f32.gmra.mxu0 %vm289_vm2, %v7436_v59 }
 0x209   : > { %v7452_v46 = vadd.f32 %v2104_v20, %v7303_v40  ;;  %v1687_v39 = vpop.f32.mrf.mxu1  ;;  %5041 = vmatmul.mubr.msk.f32.gmra.mxu1 %vm289_vm2, %v8529_v26  ;;  %3968 = vmatprep.mubr.f32.mxu0 %v8474_v18 }
 0x20a   : > { %v7460_v33 = vadd.f32 %v1687_v39, %v7132_v25  ;;  %v2106_v29 = vpop.f32.mrf.mxu0  ;;  %3551 = vmatprep.mubr.f32.mxu1 %v8474_v18  ;;  %v7476_v25 = vpop.permute.xlu1 %3811 }
 0x20b   : > { %v7464_v23 = vadd.f32 %v2106_v29, %v7310_v15  ;;  %v1689_v16 = vpop.f32.mrf.mxu1 }
 0x20c   : > { %v7467_v40 = vadd.f32 %v1689_v16, %v7145_v8  ;;  %v2110_v31 = vpop.f32.mrf.mxu0  ;;  %5069 = vmatmul.mubr.msk.f32.gmra.mxu0 %vm289_vm2, %v7457_v11 }
 0x20d   : > { %v7472_v26 = vadd.f32 %v2110_v31, %v7322_v21  ;;  %v1693_v20 = vpop.f32.mrf.mxu1  ;;  %5042 = vmatmul.mubr.msk.f32.gmra.mxu1 %vm289_vm2, %v8530_v4  ;;  %3974 = vmatprep.mubr.f32.mxu0 %v8474_v18 }
 0x20e   : > { %v7480_v15 = vadd.f32 %v1693_v20, %v7154_v49  ;;  %v2112_v8 = vpop.f32.mrf.mxu0  ;;  %3557 = vmatprep.mubr.f32.mxu1 %v8474_v18  ;;  %v7497_v49 = vpop.permute.xlu0 %3813 }
 0x20f   : > { %v7484_v39 = vadd.f32 %v2112_v8, %v7329_v5  ;;  %v1695_v29 = vpop.f32.mrf.mxu1 }
 0x210   : > { %v7487_v21 = vadd.f32 %v1695_v29, %v7166_v0  ;;  %v2116_v16 = vpop.f32.mrf.mxu0  ;;  %5070 = vmatmul.mubr.msk.f32.gmra.mxu0 %vm289_vm2, %v7476_v25 }
 0x211   : > { %v7492_v4 = vadd.f32 %v2116_v16, %v7341_v2  ;;  %v1699_v31 = vpop.f32.mrf.mxu1  ;;  %5043 = vmatmul.mubr.msk.f32.gmra.mxu1 %vm289_vm2, %v8534_v48  ;;  %3980 = vmatprep.mubr.f32.mxu0 %v8474_v18 }
 0x212   : > { %v7500_v5 = vadd.f32 %v1699_v31, %v7175_v1  ;;  %v2118_v0 = vpop.f32.mrf.mxu0  ;;  %3563 = vmatprep.mubr.f32.mxu1 %v8474_v18  ;;  %v7516_v1 = vpop.permute.xlu1 %3815 }
 0x213   : > { %v7504_v20 = vadd.f32 %v2118_v0, %v7348_v62  ;;  %v1701_v8 = vpop.f32.mrf.mxu1 }
 0x214   : > { %v7507_v2 = vadd.f32 %v1701_v8, %v7187_v12  ;;  %v2122_v29 = vpop.f32.mrf.mxu0  ;;  %5071 = vmatmul.mubr.msk.f32.gmra.mxu0 %vm289_vm2, %v7497_v49 }
 0x215   : > { %v7512_v48 = vadd.f32 %v2122_v29, %v7360_v17  ;;  %v1705_v16 = vpop.f32.mrf.mxu1  ;;  %5044 = vmatmul.mubr.msk.f32.gmra.mxu1 %vm289_vm2, %v8536_v52  ;;  %3986 = vmatprep.mubr.f32.mxu0 %v8474_v18 }
 0x216   : > { %v7520_v62 = vadd.f32 %v1705_v16, %v7196_v6  ;;  %v2124_v12 = vpop.f32.mrf.mxu0  ;;  %3569 = vmatprep.mubr.f32.mxu1 %v8474_v18  ;;  %v3818_v6 = vpop.permute.xlu0 %3817 }
 0x217   : > { %v7524_v31 = vadd.f32 %v2124_v12, %v7367_v14  ;;  %v1707_v0 = vpop.f32.mrf.mxu1 }
 0x218   : > { %v7527_v17 = vadd.f32 %v1707_v0, %v7208_v41  ;;  %v2128_v8 = vpop.f32.mrf.mxu0  ;;  %5072 = vmatmul.mubr.msk.f32.gmra.mxu0 %vm289_vm2, %v7516_v1 }
 0x219   : > { %v7532_v52 = vadd.f32 %v2128_v8, %v7380_v60  ;;  %v1711_v29 = vpop.f32.mrf.mxu1  ;;  %5045 = vmatmul.mubr.msk.f32.gmra.mxu1 %vm289_vm2, %v8539_v61  ;;  %3992 = vmatprep.mubr.f32.mxu0 %v8474_v18 }
 0x21a   : > { %v7538_v14 = vadd.f32 %v1711_v29, %v7217_v45  ;;  %v2130_v16 = vpop.f32.mrf.mxu0  ;;  %5465 = vmatprep.mubr.msk.f32.mxu1 %vm289_vm2, %v7377_v56  ;;  %v3820_v45 = vpop.permute.xlu1 %3819 }
 0x21b   : > { %v7543_v41 = vadd.f32 %v2130_v16, %v7387_v32  ;;  %v1713_v12 = vpop.f32.mrf.mxu1 }
 0x21c   : > { %v7546_v60 = vadd.f32 %v1713_v12, %v7227_v3  ;;  %v2134_v0 = vpop.f32.mrf.mxu0  ;;  %5073 = vmatmul.mubr.msk.f32.gmra.mxu0 %vm289_vm2, %v3818_v6 }
 0x21d   : > { %v7550_v61 = vadd.f32 %v2134_v0, %v7400_v9  ;;  %v5363_v8 = vpop.f32.mrf.mxu1  ;;  %5466 = vmatmul.mubr.msk.f32.vlgmr.msra.gmra.mxu1 %vm289_vm2, %v7396_v34  ;;  %3998 = vmatprep.mubr.f32.mxu0 %v8474_v18 }
 0x21e   : > { %v7556_v56 = vadd.f32 %v5363_v8, %v7235_v24  ;;  %v2136_v32 = vpop.f32.mrf.mxu0  ;;  %5468 = vmatprep.mubr.msk.f32.mxu1 %vm289_vm2, %v7417_v10  ;;  %v3822_v24 = vpop.permute.xlu0 %3821 }
 0x21f   : > { %v7561_v3 = vadd.f32 %v2136_v32, %v7407_v7  ;;  %v2247_v29 = vpop.f32.mrf.mxu1 }
 0x220   : > { %v7564_v9 = vadd.f32 %v2247_v29, %v7248_v13  ;;  %v2140_v16 = vpop.f32.mrf.mxu0  ;;  %5074 = vmatmul.mubr.msk.f32.gmra.mxu0 %vm289_vm2, %v3820_v45 }
 0x221   : > { %v7568_v34 = vadd.f32 %v2140_v16, %v7420_v28  ;;  %v5366_v12 = vpop.f32.mrf.mxu1  ;;  %5469 = vmatmul.mubr.msk.f32.gmra.mxu1 %vm289_vm2, %v7436_v59  ;;  %4004 = vmatprep.mubr.f32.mxu0 %v8474_v18 }
 0x222   : > { %v7574_v7 = vadd.f32 %v5366_v12, %v7258_v50  ;;  %v2142_v10 = vpop.f32.mrf.mxu0  ;;  %5471 = vmatprep.mubr.msk.f32.mxu1 %vm289_vm2, %v7457_v11  ;;  %v3824_v50 = vpop.permute.xlu1 %3823 }
 0x223   : > { %v7579_v13 = vadd.f32 %v2142_v10, %v7427_v58  ;;  %v2257_v0 = vpop.f32.mrf.mxu1 }
 0x224   : > { %v7582_v28 = vadd.f32 %v2257_v0, %v7269_v55  ;;  %v2146_v8 = vpop.f32.mrf.mxu0  ;;  %5075 = vmatmul.mubr.msk.f32.gmra.mxu0 %vm289_vm2, %v3822_v24 }
 0x225   : > { %v7586_v59 = vadd.f32 %v2146_v8, %v7440_v30  ;;  %v5369_v32 = vpop.f32.mrf.mxu1  ;;  %5472 = vmatmul.mubr.msk.f32.gmra.mxu1 %vm289_vm2, %v7476_v25  ;;  %4010 = vmatprep.mubr.f32.mxu0 %v8474_v18 }
 0x226   : > { %v7592_v58 = vadd.f32 %v5369_v32, %v7277_v63  ;;  %v2148_v11 = vpop.f32.mrf.mxu0  ;;  %5474 = vmatprep.mubr.msk.f32.mxu1 %vm289_vm2, %v7497_v49  ;;  %v3826_v63 = vpop.permute.xlu0 %3825 }
 0x227   : > { %v7597_v55 = vadd.f32 %v2148_v11, %v7447_v35  ;;  %v2267_v29 = vpop.f32.mrf.mxu1 }
 0x228   : > { %v7600_v30 = vadd.f32 %v2267_v29, %v7288_v37  ;;  %v2152_v16 = vpop.f32.mrf.mxu0  ;;  %5076 = vmatmul.mubr.msk.f32.gmra.mxu0 %vm289_vm2, %v3824_v50 }
 0x229   : > { %v7604_v25 = vadd.f32 %v2152_v16, %v7460_v33  ;;  %v5372_v12 = vpop.f32.mrf.mxu1  ;;  %5475 = vmatmul.mubr.msk.f32.gmra.mxu1 %vm289_vm2, %v7516_v1  ;;  %4016 = vmatprep.mubr.f32.mxu0 %v8474_v18 }
 0x22a   : > { %v7610_v35 = vadd.f32 %v5372_v12, %v7296_v36  ;;  %v2154_v49 = vpop.f32.mrf.mxu0  ;;  %5477 = vmatprep.mubr.msk.f32.mxu1 %vm289_vm2, %v3818_v6  ;;  %v3828_v36 = vpop.permute.xlu1 %3827  ;;  %v8542_v12 = vld [vmem:[#allocation33_spill] sm:$0xff] }
 0x22b   : > { %v7614_v37 = vadd.f32 %v2154_v49, %v7467_v40  ;;  %v2277_v10 = vpop.f32.mrf.mxu1 }
 0x22c   : > { %v7617_v33 = vadd.f32 %v2277_v10, %v7307_v43  ;;  %v2158_v0 = vpop.f32.mrf.mxu0  ;;  %5077 = vmatmul.mubr.msk.f32.gmra.mxu0 %vm289_vm2, %v3826_v63 }
 0x22d   : > { %v7621_v1 = vadd.f32 %v2158_v0, %v7480_v15  ;;  %v5375_v8 = vpop.f32.mrf.mxu1  ;;  %5478 = vmatmul.mubr.msk.f32.gmra.mxu1 %vm289_vm2, %v3820_v45  ;;  %4022 = vmatprep.mubr.f32.mxu0 %v8474_v18 }
 0x22e   : > { %v7626_v6 = vadd.f32 %v5375_v8, %v7315_v22  ;;  %v2160_v40 = vpop.f32.mrf.mxu0  ;;  %5480 = vmatprep.mubr.msk.f32.mxu1 %vm289_vm2, %v3822_v24  ;;  %v3830_v22 = vpop.permute.xlu0 %3829 }
 0x22f   : > { %v7630_v43 = vadd.f32 %v2160_v40, %v7487_v21  ;;  %v2287_v32 = vpop.f32.mrf.mxu1 }
 0x230   : > { %v7633_v11 = vadd.f32 %v2287_v32, %v7326_v47  ;;  %v2164_v15 = vpop.f32.mrf.mxu0  ;;  %5078 = vmatmul.mubr.msk.f32.gmra.mxu0 %vm289_vm2, %v3828_v36 }
 0x231   : > { %v7637_v45 = vadd.f32 %v2164_v15, %v7500_v5  ;;  %v5378_v29 = vpop.f32.mrf.mxu1  ;;  %5481 = vmatmul.mubr.msk.f32.gmra.mxu1 %vm289_vm2, %v3824_v50  ;;  %4028 = vmatprep.mubr.f32.mxu0 %v8474_v18  ;;  %v8544_v15 = vld [vmem:[#allocation9_spill] sm:$0xff] }
 0x232   : > { %v7642_v24 = vadd.f32 %v5378_v29, %v7334_v19  ;;  %v2166_v21 = vpop.f32.mrf.mxu0  ;;  %5483 = vmatprep.mubr.msk.f32.mxu1 %vm289_vm2, %v3826_v63  ;;  %v3832_v19 = vpop.permute.xlu1 %3831  ;;  %v8543_v63 = vld [vmem:[#allocation12_spill] sm:$0xff] }
 0x233   : > { %v7646_v47 = vadd.f32 %v2166_v21, %v7507_v2  ;;  %v2297_v16 = vpop.f32.mrf.mxu1 }
 0x234   : > { %v7649_v49 = vadd.f32 %v2297_v16, %v8542_v12  ;;  %v2170_v5 = vpop.f32.mrf.mxu0  ;;  %5079 = vmatmul.mubr.msk.f32.gmra.mxu0 %vm289_vm2, %v3830_v22 }
 0x235   : > { %v7653_v50 = vadd.f32 %v2170_v5, %v7520_v62  ;;  %v5381_v10 = vpop.f32.mrf.mxu1  ;;  %5484 = vmatmul.mubr.msk.f32.gmra.mxu1 %vm289_vm2, %v3828_v36  ;;  %4034 = vmatprep.mubr.f32.mxu0 %v8474_v18 }
 0x236   : > { %v7658_v0 = vadd.f32 %v5381_v10, %v8543_v63  ;;  %v2172_v2 = vpop.f32.mrf.mxu0  ;;  %5486 = vmatprep.mubr.msk.f32.mxu1 %vm289_vm2, %v3830_v22 }
 0x237   : > { %v7662_v8 = vadd.f32 %v2172_v2, %v7527_v17  ;;  %v2307_v40 = vpop.f32.mrf.mxu1 }
 0x238   : > { %v7665_v32 = vadd.f32 %v2307_v40, %v7364_v54  ;;  %v2176_v62 = vpop.f32.mrf.mxu0  ;;  %5080 = vmatmul.mubr.msk.f32.gmra.mxu0 %vm289_vm2, %v3832_v19 }
 0x239   : > { %v7669_v36 = vadd.f32 %v2176_v62, %v7538_v14  ;;  %v5384_v18 = vpop.f32.mrf.mxu1  ;;  %5487 = vmatmul.mubr.msk.f32.gmra.mxu1 %vm289_vm2, %v3832_v19 }
 0x23a   : > { %v2373_v29 = vadd.f32 %v5384_v18, %v8544_v15  ;;  %v2178_v21 = vpop.f32.mrf.mxu0 }
 0x23b   : > { %v7674_v22 = vadd.f32 %v2178_v21, %v7546_v60  ;;  %v2317_v17 = vpop.f32.mrf.mxu1 }
 0x23c   : > { %v2370_v16 = vadd.f32 %v2317_v17, %v7384_v42  ;;  %v5389_v54 = vpop.f32.mrf.mxu0 }
 0x23d   : > { %v7678_v12 = vadd.f32 %v5389_v54, %v7556_v56  ;;  %v2551_v5 = vpop.f32.mrf.mxu1 }
 0x23e   : > { %v2791_v14 = vadd.f32 %v2551_v5, %v7392_v44  ;;  %v2712_v10 = vpop.f32.mrf.mxu0 }
 0x23f   : > { %v7682_v63 = vadd.f32 %v2712_v10, %v7564_v9  ;;  %v2553_v19 = vpop.f32.mrf.mxu1 }
 0x240   : > { %v2792_v2 = vadd.f32 %v2553_v19, %v7404_v53  ;;  %v5392_v40 = vpop.f32.mrf.mxu0 }
 0x241   : > { %v7686_v60 = vadd.f32 %v5392_v40, %v7574_v7  ;;  %v2557_v62 = vpop.f32.mrf.mxu1 }
 0x242   : > { %v2794_v42 = vadd.f32 %v2557_v62, %v7412_v27  ;;  %v2722_v18 = vpop.f32.mrf.mxu0 }
 0x243   : > { %v7690_v56 = vadd.f32 %v2722_v18, %v7582_v28  ;;  %v2559_v15 = vpop.f32.mrf.mxu1 }
 0x244   : > { %v2795_v44 = vadd.f32 %v2559_v15, %v7424_v38  ;;  %v5395_v21 = vpop.f32.mrf.mxu0 }
 0x245   : > { %v7694_v9 = vadd.f32 %v5395_v21, %v7592_v58  ;;  %v2563_v17 = vpop.f32.mrf.mxu1 }
 0x246   : > { %v2797_v53 = vadd.f32 %v2563_v17, %v7432_v51  ;;  %v2732_v54 = vpop.f32.mrf.mxu0 }
 0x247   : > { %v7698_v7 = vadd.f32 %v2732_v54, %v7600_v30  ;;  %v2565_v5 = vpop.f32.mrf.mxu1 }
 0x248   : > { %v2798_v27 = vadd.f32 %v2565_v5, %v7444_v57  ;;  %v5398_v10 = vpop.f32.mrf.mxu0 }
 0x249   : > { %v7702_v28 = vadd.f32 %v5398_v10, %v7610_v35  ;;  %v2569_v19 = vpop.f32.mrf.mxu1 }
 0x24a   : > { %v2800_v38 = vadd.f32 %v2569_v19, %v7452_v46  ;;  %v2742_v40 = vpop.f32.mrf.mxu0 }
 0x24b   : > { %v7706_v58 = vadd.f32 %v2742_v40, %v7617_v33  ;;  %v2571_v62 = vpop.f32.mrf.mxu1 }
 0x24c   : > { %v2801_v51 = vadd.f32 %v2571_v62, %v7464_v23  ;;  %v5401_v18 = vpop.f32.mrf.mxu0 }
 0x24d   : > { %v7710_v30 = vadd.f32 %v5401_v18, %v7626_v6  ;;  %v2575_v15 = vpop.f32.mrf.mxu1 }
 0x24e   : > { %v2803_v57 = vadd.f32 %v2575_v15, %v7472_v26  ;;  %v2752_v21 = vpop.f32.mrf.mxu0 }
 0x24f   : > { %v7714_v35 = vadd.f32 %v2752_v21, %v7633_v11  ;;  %v2577_v17 = vpop.f32.mrf.mxu1 }
 0x250   : > { %v2804_v46 = vadd.f32 %v2577_v17, %v7484_v39  ;;  %v5404_v54 = vpop.f32.mrf.mxu0 }
 0x251   : > { %v7718_v33 = vadd.f32 %v5404_v54, %v7642_v24  ;;  %v2581_v5 = vpop.f32.mrf.mxu1 }
 0x252   : > { %v2806_v23 = vadd.f32 %v2581_v5, %v7492_v4  ;;  %v2762_v10 = vpop.f32.mrf.mxu0 }
 0x253   : > { %v7722_v6 = vadd.f32 %v2762_v10, %v7649_v49  ;;  %v2583_v19 = vpop.f32.mrf.mxu1 }
 0x254   : > { %v2807_v26 = vadd.f32 %v2583_v19, %v7504_v20  ;;  %v5407_v40 = vpop.f32.mrf.mxu0 }
 0x255   : > { %v7726_v11 = vadd.f32 %v5407_v40, %v7658_v0  ;;  %v2587_v62 = vpop.f32.mrf.mxu1 }
 0x256   : > { %v2809_v39 = vadd.f32 %v2587_v62, %v7512_v48  ;;  %v2772_v18 = vpop.f32.mrf.mxu0 }
 0x257   : > { %v7730_v24 = vadd.f32 %v2772_v18, %v7665_v32  ;;  %v2589_v15 = vpop.f32.mrf.mxu1 }
 0x258   : > { %v2810_v4 = vadd.f32 %v2589_v15, %v7524_v31  ;;  %v5410_v21 = vpop.f32.mrf.mxu0 }
 0x259   : > { %v7733_v49 = vadd.f32 %v5410_v21, %v2373_v29  ;;  %v2593_v17 = vpop.f32.mrf.mxu1 }
 0x25a   : > { %v2812_v20 = vadd.f32 %v2593_v17, %v7532_v52  ;;  %v2782_v54 = vpop.f32.mrf.mxu0 }
 0x25b   : > { %v7736_v5 = vadd.f32 %v2782_v54, %v2370_v16  ;;  %v2595_v0 = vpop.f32.mrf.mxu1 }
 0x25c   : > { %v2813_v10 = vadd.f32 %v2595_v0, %v7543_v41  ;;  %v3016_v48 = vpop.f32.mrf.mxu0 }
 0x25d   : > { %v7739_v19 = vadd.f32 %v3016_v48, %v2791_v14  ;;  %v2599_v32 = vpop.f32.mrf.mxu1 }
 0x25e   : > { %v2815_v40 = vadd.f32 %v2599_v32, %v7550_v61  ;;  %v3018_v62 = vpop.f32.mrf.mxu0 }
 0x25f   : > { %v7742_v31 = vadd.f32 %v3018_v62, %v2792_v2  ;;  %v2601_v29 = vpop.f32.mrf.mxu1 }
 0x260   : > { %v2816_v18 = vadd.f32 %v2601_v29, %v7561_v3  ;;  %v3022_v15 = vpop.f32.mrf.mxu0 }
 0x261   : > { %v7745_v52 = vadd.f32 %v3022_v15, %v2794_v42  ;;  %v2605_v16 = vpop.f32.mrf.mxu1 }
 0x262   : > { %v2818_v21 = vadd.f32 %v2605_v16, %v7568_v34  ;;  %v3024_v17 = vpop.f32.mrf.mxu0 }
 0x263   : > { %v7748_v41 = vadd.f32 %v3024_v17, %v2795_v44  ;;  %v2607_v14 = vpop.f32.mrf.mxu1 }
 0x264   : > { %v2819_v54 = vadd.f32 %v2607_v14, %v7579_v13  ;;  %v3028_v0 = vpop.f32.mrf.mxu0 }
 0x265   : > { %v7751_v61 = vadd.f32 %v3028_v0, %v2797_v53  ;;  %v2611_v2 = vpop.f32.mrf.mxu1 }
 0x266   : > { %v2821_v48 = vadd.f32 %v2611_v2, %v7586_v59  ;;  %v3030_v32 = vpop.f32.mrf.mxu0 }
 0x267   : > { %v7754_v3 = vadd.f32 %v3030_v32, %v2798_v27  ;;  %v2613_v42 = vpop.f32.mrf.mxu1 }
 0x268   : > { %v2822_v62 = vadd.f32 %v2613_v42, %v7597_v55  ;;  %v3034_v29 = vpop.f32.mrf.mxu0 }
 0x269   : > { %v7757_v34 = vadd.f32 %v3034_v29, %v2800_v38  ;;  %v2617_v44 = vpop.f32.mrf.mxu1 }
 0x26a   : > { %v2824_v15 = vadd.f32 %v2617_v44, %v7604_v25  ;;  %v3036_v16 = vpop.f32.mrf.mxu0 }
 0x26b   : > { %v7760_v13 = vadd.f32 %v3036_v16, %v2801_v51  ;;  %v2619_v53 = vpop.f32.mrf.mxu1 }
 0x26c   : > { %v2825_v17 = vadd.f32 %v2619_v53, %v7614_v37  ;;  %v3040_v14 = vpop.f32.mrf.mxu0 }
 0x26d   : > { %v7763_v59 = vadd.f32 %v3040_v14, %v2803_v57  ;;  %v2623_v27 = vpop.f32.mrf.mxu1 }
 0x26e   : > { %v2827_v0 = vadd.f32 %v2623_v27, %v7621_v1  ;;  %v3042_v2 = vpop.f32.mrf.mxu0 }
 0x26f   : > { %v7766_v55 = vadd.f32 %v3042_v2, %v2804_v46  ;;  %v2625_v38 = vpop.f32.mrf.mxu1 }
 0x270   : > { %v2828_v32 = vadd.f32 %v2625_v38, %v7630_v43  ;;  %v3046_v42 = vpop.f32.mrf.mxu0 }
 0x271   : > { %v7769_v25 = vadd.f32 %v3046_v42, %v2806_v23  ;;  %v2629_v51 = vpop.f32.mrf.mxu1 }
 0x272   : > { %v2830_v29 = vadd.f32 %v2629_v51, %v7637_v45  ;;  %v3048_v44 = vpop.f32.mrf.mxu0 }
 0x273   : > { %v7772_v37 = vadd.f32 %v3048_v44, %v2807_v26  ;;  %v2631_v57 = vpop.f32.mrf.mxu1 }
 0x274   : > { %v2831_v16 = vadd.f32 %v2631_v57, %v7646_v47  ;;  %v3052_v53 = vpop.f32.mrf.mxu0 }
 0x275   : > { %v7775_v1 = vadd.f32 %v3052_v53, %v2809_v39  ;;  %v2635_v46 = vpop.f32.mrf.mxu1 }
 0x276   : > { %v2833_v14 = vadd.f32 %v2635_v46, %v7653_v50  ;;  %v3054_v27 = vpop.f32.mrf.mxu0 }
 0x277   : > { %v7778_v43 = vadd.f32 %v3054_v27, %v2810_v4  ;;  %v2637_v23 = vpop.f32.mrf.mxu1 }
 0x278   : > { %v2834_v2 = vadd.f32 %v2637_v23, %v7662_v8  ;;  %v3058_v38 = vpop.f32.mrf.mxu0 }
 0x279   : > { %v7781_v45 = vadd.f32 %v3058_v38, %v2812_v20  ;;  %v2641_v26 = vpop.f32.mrf.mxu1 }
 0x27a   : > { %v2836_v42 = vadd.f32 %v2641_v26, %v7669_v36  ;;  %v3060_v51 = vpop.f32.mrf.mxu0 }
 0x27b   : > { %v7784_v47 = vadd.f32 %v3060_v51, %v2813_v10  ;;  %v2643_v39 = vpop.f32.mrf.mxu1 }
 0x27c   : > { %v2837_v44 = vadd.f32 %v2643_v39, %v7674_v22  ;;  %v3064_v57 = vpop.f32.mrf.mxu0 }
 0x27d   : > { %v7787_v50 = vadd.f32 %v3064_v57, %v2815_v40  ;;  %v5415_v4 = vpop.f32.mrf.mxu1 }
 0x27e   : > { %v7790_v53 = vadd.f32 %v5415_v4, %v7678_v12  ;;  %v3066_v8 = vpop.f32.mrf.mxu0 }
 0x27f   : > { %v7792_v46 = vadd.f32 %v3066_v8, %v2816_v18  ;;  %v3177_v20 = vpop.f32.mrf.mxu1 }
 0x280   : > { %v7795_v27 = vadd.f32 %v3177_v20, %v7682_v63  ;;  %v3070_v36 = vpop.f32.mrf.mxu0 }
 0x281   : > { %v7797_v10 = vadd.f32 %v3070_v36, %v2818_v21  ;;  %v5418_v23 = vpop.f32.mrf.mxu1 }
 0x282   : > { %v7800_v22 = vadd.f32 %v5418_v23, %v7686_v60  ;;  %v3072_v40 = vpop.f32.mrf.mxu0 }
 0x283   : > { %v7802_v38 = vadd.f32 %v3072_v40, %v2819_v54  ;;  %v3187_v26 = vpop.f32.mrf.mxu1 }
 0x284   : > { %v7805_v12 = vadd.f32 %v3187_v26, %v7690_v56  ;;  %v3076_v18 = vpop.f32.mrf.mxu0 }
 0x285   : > { %v7807_v51 = vadd.f32 %v3076_v18, %v2821_v48  ;;  %v5421_v39 = vpop.f32.mrf.mxu1 }
 0x286   : > { %v7810_v63 = vadd.f32 %v5421_v39, %v7694_v9  ;;  %v3078_v21 = vpop.f32.mrf.mxu0 }
 0x287   : > { %v7812_v57 = vadd.f32 %v3078_v21, %v2822_v62  ;;  %v3197_v4 = vpop.f32.mrf.mxu1 }
 0x288   : > { %v7815_v60 = vadd.f32 %v3197_v4, %v7698_v7  ;;  %v3082_v54 = vpop.f32.mrf.mxu0 }
 0x289   : > { %v7817_v8 = vadd.f32 %v3082_v54, %v2824_v15  ;;  %v5424_v20 = vpop.f32.mrf.mxu1 }
 0x28a   : > { %v3279_v56 = vadd.f32 %v5424_v20, %v7702_v28  ;;  %v3084_v36 = vpop.f32.mrf.mxu0 }
 0x28b   : > { %v7820_v48 = vadd.f32 %v3084_v36, %v2825_v17  ;;  %v3207_v23 = vpop.f32.mrf.mxu1 }
 0x28c   : > { %v7823_v9 = vadd.f32 %v3207_v23, %v7706_v58  ;;  %v3088_v40 = vpop.f32.mrf.mxu0 }
 0x28d   : > { %8545 = vst [vmem:[#allocation15_spill] sm:$0xff] %v7820_v48  ;;  %v7825_v62 = vadd.f32 %v3088_v40, %v2827_v0  ;;  %v5427_v26 = vpop.f32.mrf.mxu1 }
 0x28e   : > { %v3285_v7 = vadd.f32 %v5427_v26, %v7710_v30  ;;  %v3090_v18 = vpop.f32.mrf.mxu0 }
 0x28f   : > { %8546 = vst [vmem:[#allocation13_spill] sm:$0xff] %v7825_v62  ;;  %v7828_v39 = vadd.f32 %v3090_v18, %v2828_v32  ;;  %v3217_v15 = vpop.f32.mrf.mxu1 }
 0x290   : > { %v7831_v21 = vadd.f32 %v3217_v15, %v7714_v35  ;;  %v3094_v28 = vpop.f32.mrf.mxu0 }
 0x291   : > { %8547 = vst [vmem:[#allocation26_spill] sm:$0xff] %v7828_v39  ;;  %v7833_v17 = vadd.f32 %v3094_v28, %v2830_v29  ;;  %v5430_v4 = vpop.f32.mrf.mxu1  ;;  %v4380_v39 = vlaneseq }
 0x292   : > { %v3291_v58 = vadd.f32 %v5430_v4, %v7718_v33  ;;  %v3096_v54 = vpop.f32.mrf.mxu0 }
 0x293   : > { %8548 = vst [vmem:[#allocation17_spill] sm:$0xff] %v7833_v17  ;;  %v7836_v20 = vadd.f32 %v3096_v54, %v2831_v16  ;;  %v3227_v0 = vpop.f32.mrf.mxu1 }
 0x294   : > { %v7839_v36 = vadd.f32 %v3227_v0, %v7722_v6  ;;  %v3100_v30 = vpop.f32.mrf.mxu0 }
 0x295   : > { %8549 = vst [vmem:[#allocation16_spill] sm:$0xff] %v7836_v20  ;;  %v7841_v32 = vadd.f32 %v3100_v30, %v2833_v14  ;;  %v5433_v23 = vpop.f32.mrf.mxu1 }
 0x296   : > { %v3297_v35 = vadd.f32 %v5433_v23, %v7726_v11  ;;  %v3102_v40 = vpop.f32.mrf.mxu0 }
 0x297   : > { %8550 = vst [vmem:[#allocation19_spill] sm:$0xff] %v7841_v32  ;;  %v7844_v26 = vadd.f32 %v3102_v40, %v2834_v2  ;;  %v3237_v29 = vpop.f32.mrf.mxu1 }
 0x298   : > { %v3294_v18 = vadd.f32 %v3237_v29, %v7730_v24  ;;  %v3106_v33 = vpop.f32.mrf.mxu0 }
 0x299   : > { %8551 = vst [vmem:[#allocation18_spill] sm:$0xff] %v7844_v26  ;;  %v7847_v15 = vadd.f32 %v3106_v33, %v2836_v42  ;;  %v5436_v16 = vpop.f32.mrf.mxu1 }
 0x29a   : > { %v3303_v28 = vadd.f32 %v5436_v16, %v7733_v49  ;;  %v3108_v6 = vpop.f32.mrf.mxu0 }
 0x29b   : > { %8552 = vst [vmem:[#allocation2_spill] sm:$0xff] %v7847_v15  ;;  %v7850_v4 = vadd.f32 %v3108_v6, %v2837_v44  ;;  %v3247_v14 = vpop.f32.mrf.mxu1 }
 0x29c   : > { %v3300_v54 = vadd.f32 %v3247_v14, %v7736_v5  ;;  %v5441_v0 = vpop.f32.mrf.mxu0 }
 0x29d   : > { %8553 = vst [vmem:[#allocation21_spill] sm:$0xff] %v7850_v4  ;;  %v3481_v11 = vpop.f32.mrf.mxu1 }
 0x29e   : > { %v3721_v2 = vadd.f32 %v3481_v11, %v7739_v19  ;;  %v3642_v30 = vpop.f32.mrf.mxu0 }
 0x29f   : > { %v3483_v23 = vpop.f32.mrf.mxu1 }
 0x2a0   : > { %v5444_v40 = vpop.f32.mrf.mxu0 }
 0x2a1   : > { %v3487_v24 = vpop.f32.mrf.mxu1 }
 0x2a2   : > { %v3652_v29 = vpop.f32.mrf.mxu0 }
 0x2a3   : > { %v3489_v42 = vpop.f32.mrf.mxu1 }
 0x2a4   : > { %v5447_v33 = vpop.f32.mrf.mxu0 }
 0x2a5   : > { %v3493_v15 = vpop.f32.mrf.mxu1 }
 0x2a6   : > { %v7855_v49 = vadd.f32 %v3493_v15, %v7751_v61  ;;  %v3662_v44 = vpop.f32.mrf.mxu0 }
 0x2a7   : > { %v7857_v16 = vpop.f32.mrf.mxu1 }
 0x2a8   : > { %v5450_v6 = vpop.f32.mrf.mxu0 }
 0x2a9   : > { %v7859_v5 = vadd.f32 %v5450_v6, %v3279_v56  ;;  %v3499_v14 = vpop.f32.mrf.mxu1 }
 0x2aa   : > { %v7862_v19 = vadd.f32 %v3499_v14, %v7757_v34  ;;  %v3672_v11 = vpop.f32.mrf.mxu0 }
 0x2ab   : > { %8554 = vst [vmem:[#allocation3_spill] sm:$0xff] %v7859_v5  ;;  %v3501_v4 = vpop.f32.mrf.mxu1  ;;  %v4381_v5 = vshrl.u32 %v4380_v39, 7 }
 0x2ac   : > { %v5453_v26 = vpop.f32.mrf.mxu0 }
 0x2ad   : > { %v7864_v32 = vadd.f32 %v5453_v26, %v3285_v7  ;;  %v3505_v20 = vpop.f32.mrf.mxu1 }
 0x2ae   : > { %v7867_v17 = vadd.f32 %v3505_v20, %v7763_v59  ;;  %v3682_v61 = vpop.f32.mrf.mxu0 }
 0x2af   : > { %8555 = vst [vmem:[#allocation4_spill] sm:$0xff] %v7864_v32  ;;  %v3507_v15 = vpop.f32.mrf.mxu1 }
 0x2b0   : > { %v5456_v62 = vpop.f32.mrf.mxu0 }
 0x2b1   : > { %v7869_v48 = vadd.f32 %v5456_v62, %v3291_v58  ;;  %v3511_v56 = vpop.f32.mrf.mxu1 }
 0x2b2   : > { %v7872_v6 = vadd.f32 %v3511_v56, %v7769_v25  ;;  %v7874_v34 = vpop.f32.mrf.mxu0  ;;  %v4382_v25 = vsub.s32 0, %v4381_v5  ;;  %v4386_v56 = vsub.s32 1, %v4381_v5 }
 0x2b3   : > { %8556 = vst [vmem:[#allocation20_spill] sm:$0xff] %v7869_v48  ;;  %v3513_v14 = vpop.f32.mrf.mxu1 }
 0x2b4   : > { %8557 = vst [vmem:[#allocation6_spill] sm:$0xff] %v7872_v6  ;;  %v7877_v7 = vadd.f32 %v3513_v14, %v7772_v37  ;;  %v5459_v26 = vpop.f32.mrf.mxu0  ;;  %v4378_v37 = vld [vmem:[%s8405_s2] sm:$0x7] }
 0x2b5   : > { %v7879_v59 = vadd.f32 %v5459_v26, %v3297_v35  ;;  %v3517_v20 = vpop.f32.mrf.mxu1  ;;  %v4390_v35 = vsub.s32 2, %v4381_v5 }
 0x2b6   : > { %v7882_v32 = vadd.f32 %v3517_v20, %v7775_v1  ;;  %v3702_v62 = vpop.f32.mrf.mxu0 }
 0x2b7   : > { %8558 = vst [vmem:[#allocation7_spill] sm:$0xff] %v7879_v59  ;;  %v7884_v58 = vadd.f32 %v3702_v62, %v3294_v18  ;;  %v3519_v48 = vpop.f32.mrf.mxu1  ;;  %v7907_v59 = vadd.f32 %v3642_v30, %v7795_v27  ;;  %v3725_v27 = vadd.f32 %v3489_v42, %v7748_v41  ;;  %v3731_v41 = vadd.f32 %v3501_v4, %v7760_v13 }
 0x2b8   : > { %v7887_v6 = vadd.f32 %v3519_v48, %v7778_v43  ;;  %v5462_v39 = vpop.f32.mrf.mxu0  ;;  %v7901_v43 = vrot.slane %v4378_v37, %v4386_v56  ;;  %v7904_v48 = vadd.f32 %v5441_v0, %v7790_v53  ;;  %v7920_v53 = vadd.f32 %v3652_v29, %v7805_v12 }
 0x2b9   : > { %8559 = vst [vmem:[#allocation23_spill] sm:$0xff] %v7884_v58  ;;  %v7892_v14 = vadd.f32 %v5462_v39, %v3303_v28  ;;  %v3523_v26 = vpop.f32.mrf.mxu1  ;;  %v7899_v58 = vrot.slane %v4378_v37, %v4382_v25  ;;  %v7916_v39 = vadd.f32 %v5444_v40, %v7800_v22  ;;  %v3724_v25 = vadd.f32 %v3487_v24, %v7745_v52 }
 0x2ba   : > { %v7895_v1 = vadd.f32 %v3523_v26, %v7781_v45  ;;  %v3712_v18 = vpop.f32.mrf.mxu0  ;;  %v7912_v45 = vrot.slane %v4378_v37, %v4390_v35  ;;  %v3728_v12 = vadd.f32 %v7857_v16, %v7754_v3  ;;  %v7942_v42 = vadd.f32 %v3682_v61, %v7831_v21 }
 0x2bb   : > { %v7897_v20 = vadd.f32 %v3712_v18, %v3300_v54  ;;  %v3525_v62 = vpop.f32.mrf.mxu1  ;;  %v3722_v54 = vadd.f32 %v3483_v23, %v7742_v31  ;;  %v7930_v31 = vadd.f32 %v3662_v44, %v7815_v60  ;;  %v7935_v23 = vadd.f32 %v3672_v11, %v7823_v9 }
 0x2bc   : > { %v7910_v28 = vadd.f32 %v3525_v62, %v7784_v47  ;;  %v3946_v5 = vpop.f32.mrf.mxu0  ;;  %v7924_v47 = vadd.f32 %v5447_v33, %v7810_v63  ;;  %v7945_v33 = vadd.f32 %v3507_v15, %v7766_v55  ;;  %v7953_v11 = vadd.f32 %v7874_v34, %v7839_v36 }
 0x2bd   : > { %v4186_v56 = vadd.f32 %v3946_v5, %v3721_v2  ;;  %v3529_v26 = vpop.f32.mrf.mxu1 }
 0x2be   : > { %v7927_v0 = vadd.f32 %v3529_v26, %v7787_v50  ;;  %v3948_v30 = vpop.f32.mrf.mxu0 }
 0x2bf   : > { %vm4234_vm10 = vcmp.gt.f32.partialorder %v4186_v56, 0.0  ;;  %v4282_v22 = vmul.f32 0.1, %v4186_v56  ;;  %v4187_v52 = vadd.f32 %v3948_v30, %v3722_v54  ;;  %v3531_v2 = vpop.f32.mrf.mxu1 }
 0x2c0   : > { %v7939_v63 = vadd.f32 %v3531_v2, %v7792_v46  ;;  %v3952_v50 = vpop.f32.mrf.mxu0 }
 0x2c1   : > { %v4330_v40 = vsel %vm4234_vm10, %v4186_v56, %v4282_v22  ;;  %vm4235_vm11 = vcmp.gt.f32.partialorder %v4187_v52, 0.0  ;;  %v4283_v60 = vmul.f32 0.1, %v4187_v52  ;;  %v4189_v24 = vadd.f32 %v3952_v50, %v3724_v25  ;;  %v3535_v29 = vpop.f32.mrf.mxu1 }
 0x2c2   : > { %v4395_v3 = vmul.f32 %v7899_v58, %v4330_v40  ;;  %v7949_v9 = vadd.f32 %v3535_v29, %v7797_v10  ;;  %v3954_v13 = vpop.f32.mrf.mxu0 }
 0x2c3   : > { %v4331_v46 = vsel %vm4235_vm11, %v4187_v52, %v4283_v60  ;;  %vm4237_vm12 = vcmp.gt.f32.partialorder %v4189_v24, 0.0  ;;  %v4285_v4 = vmul.f32 0.1, %v4189_v24  ;;  %v4190_v44 = vadd.f32 %v3954_v13, %v3725_v27  ;;  %v3537_v16 = vpop.f32.mrf.mxu1 }
 0x2c4   : > { %v4396_v21 = vmul.f32 %v7901_v43, %v4331_v46  ;;  %v7957_v55 = vadd.f32 %v3537_v16, %v7802_v38  ;;  %v3958_v61 = vpop.f32.mrf.mxu0  ;;  %v4541_v15 = vmul.f32 %v4395_v3, %v4395_v3  ;;  %v8560_v16 = vld [vmem:[#allocation15_spill] sm:$0xff] }
 0x2c5   : > { %v4333_v37 = vsel %vm4237_vm12, %v4189_v24, %v4285_v4  ;;  %vm4238_vm13 = vcmp.gt.f32.partialorder %v4190_v44, 0.0  ;;  %v4286_v10 = vmul.f32 0.1, %v4190_v44  ;;  %v4192_v35 = vadd.f32 %v3958_v61, %v7855_v49  ;;  %v3541_v18 = vpop.f32.mrf.mxu1 }
 0x2c6   : > { %v4398_v62 = vmul.f32 %v7899_v58, %v4333_v37  ;;  %v7962_v5 = vadd.f32 %v3541_v18, %v7807_v51  ;;  %v3960_v36 = vpop.f32.mrf.mxu0  ;;  %v7964_v34 = vadd.f32 %v4396_v21, %v4395_v3  ;;  %v4542_v54 = vmul.f32 %v4396_v21, %v4396_v21 }
 0x2c7   : > { %v4334_v25 = vsel %vm4238_vm13, %v4190_v44, %v4286_v10  ;;  %vm4240_vm14 = vcmp.gt.f32.partialorder %v4192_v35, 0.0  ;;  %v4288_v38 = vmul.f32 0.1, %v4192_v35  ;;  %v4193_v56 = vadd.f32 %v3960_v36, %v3728_v12  ;;  %v3543_v26 = vpop.f32.mrf.mxu1 }
 0x2c8   : > { %v4399_v27 = vmul.f32 %v7901_v43, %v4334_v25  ;;  %v7968_v30 = vadd.f32 %v3543_v26, %v7812_v57  ;;  %v3964_v49 = vpop.f32.mrf.mxu0  ;;  %v7970_v22 = vadd.f32 %v4542_v54, %v4541_v15  ;;  %v4544_v52 = vmul.f32 %v4398_v62, %v4398_v62 }
 0x2c9   : > { %v4336_v51 = vsel %vm4240_vm14, %v4192_v35, %v4288_v38  ;;  %vm4241_vm15 = vcmp.gt.f32.partialorder %v4193_v56, 0.0  ;;  %v4289_v2 = vmul.f32 0.1, %v4193_v56  ;;  %v4195_v50 = vadd.f32 %v3964_v49, %v7862_v19  ;;  %v3547_v40 = vpop.f32.mrf.mxu1 }
 0x2ca   : > { %v4401_v60 = vmul.f32 %v7899_v58, %v4336_v51  ;;  %v7975_v12 = vadd.f32 %v3547_v40, %v7817_v8  ;;  %v3966_v24 = vpop.f32.mrf.mxu0  ;;  %v7977_v29 = vadd.f32 %v4399_v27, %v4398_v62  ;;  %v4545_v57 = vmul.f32 %v4399_v27, %v4399_v27  ;;  %v8561_v62 = vld [vmem:[#allocation13_spill] sm:$0xff] }
 0x2cb   : > { %v4337_v3 = vsel %vm4241_vm15, %v4193_v56, %v4289_v2  ;;  %vm4243_vm0 = vcmp.gt.f32.partialorder %v4195_v50, 0.0  ;;  %v4291_v13 = vmul.f32 0.1, %v4195_v50  ;;  %v4196_v46 = vadd.f32 %v3966_v24, %v3731_v41  ;;  %v3549_v4 = vpop.f32.mrf.mxu1 }
 0x2cc   : > { %v4402_v44 = vmul.f32 %v7901_v43, %v4337_v3  ;;  %v7981_v21 = vadd.f32 %v3549_v4, %v8560_v16  ;;  %v3970_v19 = vpop.f32.mrf.mxu0  ;;  %v7983_v61 = vadd.f32 %v4545_v57, %v4544_v52  ;;  %v4547_v15 = vmul.f32 %v4401_v60, %v4401_v60  ;;  %v8562_v52 = vld [vmem:[#allocation26_spill] sm:$0xff] }
 0x2cd   : > { %v4339_v8 = vsel %vm4243_vm0, %v4195_v50, %v4291_v13  ;;  %vm4244_vm1 = vcmp.gt.f32.partialorder %v4196_v46, 0.0  ;;  %v4292_v37 = vmul.f32 0.1, %v4196_v46  ;;  %v4198_v10 = vadd.f32 %v3970_v19, %v7867_v17  ;;  %v3553_v35 = vpop.f32.mrf.mxu1 }
 0x2ce   : > { %v4404_v18 = vmul.f32 %v7899_v58, %v4339_v8  ;;  %v7988_v41 = vadd.f32 %v3553_v35, %v8561_v62  ;;  %v3972_v36 = vpop.f32.mrf.mxu0  ;;  %v4548_v54 = vmul.f32 %v4402_v44, %v4402_v44  ;;  %v7990_v25 = vadd.f32 %v4402_v44, %v4401_v60  ;;  %v8563_v60 = vld [vmem:[#allocation6_spill] sm:$0xff]  ;;  %v8565_v35 = vld [vmem:[#allocation16_spill] sm:$0xff] }
 0x2cf   : > { %v4340_v38 = vsel %vm4244_vm1, %v4196_v46, %v4292_v37  ;;  %vm4246_vm2 = vcmp.gt.f32.partialorder %v4198_v10, 0.0  ;;  %v4294_v56 = vmul.f32 0.1, %v4198_v10  ;;  %v4199_v26 = vadd.f32 %v3972_v36, %v7945_v33  ;;  %v3555_v27 = vpop.f32.mrf.mxu1  ;;  %v8564_v46 = vld [vmem:[#allocation17_spill] sm:$0xff] }
 0x2d0   : > { %v4405_v49 = vmul.f32 %v7901_v43, %v4340_v38  ;;  %v7995_v17 = vadd.f32 %v3555_v27, %v8562_v52  ;;  %v3976_v51 = vpop.f32.mrf.mxu0  ;;  %v7997_v2 = vadd.f32 %v4548_v54, %v4547_v15  ;;  %v4550_v50 = vmul.f32 %v4404_v18, %v4404_v18  ;;  %v8566_v52 = vld [vmem:[#allocation19_spill] sm:$0xff] }
 0x2d1   : > { %v4342_v40 = vsel %vm4246_vm2, %v4198_v10, %v4294_v56  ;;  %vm4247_vm3 = vcmp.gt.f32.partialorder %v4199_v26, 0.0  ;;  %v4295_v24 = vmul.f32 0.1, %v4199_v26  ;;  %v4201_v57 = vadd.f32 %v3976_v51, %v8563_v60  ;;  %v3559_v3 = vpop.f32.mrf.mxu1 }
 0x2d2   : > { %v4407_v13 = vmul.f32 %v7899_v58, %v4342_v40  ;;  %v8002_v33 = vadd.f32 %v3559_v3, %v8564_v46  ;;  %v3978_v4 = vpop.f32.mrf.mxu0  ;;  %v8004_v44 = vadd.f32 %v4405_v49, %v4404_v18  ;;  %v4551_v16 = vmul.f32 %v4405_v49, %v4405_v49 }
 0x2d3   : > { %v4343_v19 = vsel %vm4247_vm3, %v4199_v26, %v4295_v24  ;;  %vm4249_vm4 = vcmp.gt.f32.partialorder %v4201_v57, 0.0  ;;  %v4297_v15 = vmul.f32 0.1, %v4201_v57  ;;  %v4202_v8 = vadd.f32 %v3978_v4, %v7877_v7  ;;  %v3561_v37 = vpop.f32.mrf.mxu1  ;;  %v8567_v4 = vld [vmem:[#allocation18_spill] sm:$0xff] }
 0x2d4   : > { %v4408_v10 = vmul.f32 %v7901_v43, %v4343_v19  ;;  %v8009_v62 = vadd.f32 %v3561_v37, %v8565_v35  ;;  %v3982_v36 = vpop.f32.mrf.mxu0  ;;  %v4553_v54 = vmul.f32 %v4407_v13, %v4407_v13  ;;  %v8011_v38 = vadd.f32 %v4551_v16, %v4550_v50 }
 0x2d5   : > { %v4345_v56 = vsel %vm4249_vm4, %v4201_v57, %v4297_v15  ;;  %vm4250_vm5 = vcmp.gt.f32.partialorder %v4202_v8, 0.0  ;;  %v4298_v18 = vmul.f32 0.1, %v4202_v8  ;;  %v4204_v27 = vadd.f32 %v3982_v36, %v7882_v32  ;;  %v3565_v26 = vpop.f32.mrf.mxu1  ;;  %v8568_v36 = vld [vmem:[#allocation2_spill] sm:$0xff] }
 0x2d6   : > { %v4410_v49 = vmul.f32 %v7899_v58, %v4345_v56  ;;  %v8016_v7 = vadd.f32 %v3565_v26, %v8566_v52  ;;  %v3984_v51 = vpop.f32.mrf.mxu0  ;;  %v8018_v40 = vadd.f32 %v4408_v10, %v4407_v13  ;;  %v4554_v24 = vmul.f32 %v4408_v10, %v4408_v10 }
 0x2d7   : > { %v4346_v60 = vsel %vm4250_vm5, %v4202_v8, %v4298_v18  ;;  %vm4252_vm6 = vcmp.gt.f32.partialorder %v4204_v27, 0.0  ;;  %v4300_v3 = vmul.f32 0.1, %v4204_v27  ;;  %v4205_v50 = vadd.f32 %v3984_v51, %v7887_v6  ;;  %v3567_v57 = vpop.f32.mrf.mxu1 }
 0x2d8   : > { %v4411_v46 = vmul.f32 %v7901_v43, %v4346_v60  ;;  %v8023_v32 = vadd.f32 %v3567_v57, %v8567_v4  ;;  %v3988_v16 = vpop.f32.mrf.mxu0  ;;  %v8025_v19 = vadd.f32 %v4554_v24, %v4553_v54  ;;  %v4556_v15 = vmul.f32 %v4410_v49, %v4410_v49  ;;  %v8569_v60 = vld [vmem:[#allocation21_spill] sm:$0xff] }
 0x2d9   : > { %v4348_v37 = vsel %vm4252_vm6, %v4204_v27, %v4300_v3  ;;  %vm4253_vm7 = vcmp.gt.f32.partialorder %v4205_v50, 0.0  ;;  %v4301_v13 = vmul.f32 0.1, %v4205_v50  ;;  %v4207_v10 = vadd.f32 %v3988_v16, %v7895_v1  ;;  %v3571_v8 = vpop.f32.mrf.mxu1 }
 0x2da   : > { %v4413_v35 = vmul.f32 %v7899_v58, %v4348_v37  ;;  %v8030_v6 = vadd.f32 %v3571_v8, %v8568_v36  ;;  %v3990_v56 = vpop.f32.mrf.mxu0  ;;  %v8032_v18 = vadd.f32 %v4411_v46, %v4410_v49  ;;  %v4557_v26 = vmul.f32 %v4411_v46, %v4411_v46 }
 0x2db   : > { %v4349_v52 = vsel %vm4253_vm7, %v4205_v50, %v4301_v13  ;;  %vm4255_vm8 = vcmp.gt.f32.partialorder %v4207_v10, 0.0  ;;  %v4303_v54 = vmul.f32 0.1, %v4207_v10  ;;  %v4208_v51 = vadd.f32 %v3990_v56, %v7910_v28  ;;  %v3573_v27 = vpop.f32.mrf.mxu1 }
 0x2dc   : > { %v4414_v24 = vmul.f32 %v7901_v43, %v4349_v52  ;;  %v8037_v1 = vadd.f32 %v3573_v27, %v8569_v60  ;;  %v3994_v3 = vpop.f32.mrf.mxu0  ;;  %v8039_v57 = vmul.f32 %v4413_v35, %v4413_v35  ;;  %v8041_v4 = vadd.f32 %v4557_v26, %v4556_v15 }
 0x2dd   : > { %v4351_v16 = vsel %vm4255_vm8, %v4207_v10, %v4303_v54  ;;  %vm4256_vm9 = vcmp.gt.f32.partialorder %v4208_v51, 0.0  ;;  %v4304_v49 = vmul.f32 0.1, %v4208_v51  ;;  %v4210_v50 = vadd.f32 %v3994_v3, %v7927_v0  ;;  %v5467_v46 = vpop.f32.mrf.mxu1 }
 0x2de   : > { %8570 = vst [vmem:[#allocation10_spill] sm:$0xff] %v8041_v4  ;;  %v8045_v37 = vmul.f32 %v7899_v58, %v4351_v16  ;;  %v4191_v28 = vadd.f32 %v5467_v46, %v7904_v48  ;;  %v3996_v13 = vpop.f32.mrf.mxu0  ;;  %v8048_v8 = vadd.f32 %v4414_v24, %v4413_v35  ;;  %v8050_v36 = vmul.f32 %v4414_v24, %v4414_v24 }
 0x2df   : > { %v4352_v56 = vsel %vm4256_vm9, %v4208_v51, %v4304_v49  ;;  %vm4258_vm10 = vcmp.gt.f32.partialorder %v4210_v50, 0.0  ;;  %v4306_v15 = vmul.f32 0.1, %v4210_v50  ;;  %v4211_v10 = vadd.f32 %v3996_v13, %v7939_v63  ;;  %v4107_v26 = vpop.f32.mrf.mxu1 }
 0x2e0   : > { %v8054_v52 = vmul.f32 %v7901_v43, %v4352_v56  ;;  %vm4239_vm11 = vcmp.gt.f32.partialorder %v4191_v28, 0.0  ;;  %v4287_v0 = vmul.f32 0.1, %v4191_v28  ;;  %v4188_v54 = vadd.f32 %v4107_v26, %v7907_v59  ;;  %v4000_v27 = vpop.f32.mrf.mxu0 }
 0x2e1   : > { %v4354_v48 = vsel %vm4258_vm10, %v4210_v50, %v4306_v15  ;;  %vm4259_vm12 = vcmp.gt.f32.partialorder %v4211_v10, 0.0  ;;  %v4307_v35 = vmul.f32 0.1, %v4211_v10  ;;  %v4213_v24 = vadd.f32 %v4000_v27, %v7949_v9  ;;  %v5470_v60 = vpop.f32.mrf.mxu1 }
 0x2e2   : > { %vm4444_vm13 = vcmask 261120   ;;  %v8059_v51 = vmul.f32 %v7899_v58, %v4354_v48  ;;  %v4335_v63 = vsel %vm4239_vm11, %v4191_v28, %v4287_v0  ;;  %vm4236_vm14 = vcmp.gt.f32.partialorder %v4188_v54, 0.0  ;;  %v4002_v16 = vpop.f32.mrf.mxu0 }
 0x2e3   : > { %v4284_v3 = vmul.f32 0.1, %v4188_v54  ;;  %v8062_v49 = vmul.f32 %v7912_v45, %v4335_v63  ;;  %v4355_v46 = vsel %vm4259_vm12, %v4211_v10, %v4307_v35  ;;  %vm4261_vm15 = vcmp.gt.f32.partialorder %v4213_v24, 0.0  ;;  %v4117_v50 = vpop.f32.mrf.mxu1 }
 0x2e4   : > { %v4309_v59 = vmul.f32 0.1, %v4213_v24  ;;  %v8065_v13 = vmul.f32 %v7901_v43, %v4355_v46  ;;  %v4197_v56 = vadd.f32 %v5470_v60, %v7916_v39  ;;  %v4214_v15 = vadd.f32 %v4002_v16, %v7957_v55  ;;  %v4006_v26 = vpop.f32.mrf.mxu0 }
 0x2e5   : > { %v4332_v9 = vsel %vm4236_vm14, %v4188_v54, %v4284_v3  ;;  %v4194_v27 = vadd.f32 %v4117_v50, %v7920_v53  ;;  %v4216_v48 = vadd.f32 %v4006_v26, %v7962_v5  ;;  %v5473_v10 = vpop.f32.mrf.mxu1 }
 0x2e6   : > { %v4397_v28 = vmul.f32 %v7912_v45, %v4332_v9  ;;  %v4357_v0 = vsel %vm4261_vm15, %v4213_v24, %v4309_v59  ;;  %vm4245_vm0 = vcmp.gt.f32.partialorder %v4197_v56, 0.0  ;;  %v4293_v63 = vmul.f32 0.1, %v4197_v56  ;;  %v4008_v54 = vpop.f32.mrf.mxu0 }
 0x2e7   : > { %v8073_v35 = vmul.f32 %v7899_v58, %v4357_v0  ;;  %vm4262_vm1 = vcmp.gt.f32.partialorder %v4214_v15, 0.0  ;;  %v4310_v3 = vmul.f32 0.1, %v4214_v15  ;;  %vm4242_vm2 = vcmp.gt.f32.partialorder %v4194_v27, 0.0  ;;  %v4127_v55 = vpop.f32.mrf.mxu1 }
 0x2e8   : > { %v4290_v39 = vmul.f32 0.1, %v4194_v27  ;;  %vm4264_vm3 = vcmp.gt.f32.partialorder %v4216_v48, 0.0  ;;  %v4341_v60 = vsel %vm4245_vm0, %v4197_v56, %v4293_v63  ;;  %v4312_v16 = vmul.f32 0.1, %v4216_v48  ;;  %v4012_v5 = vpop.f32.mrf.mxu0 }
 0x2e9   : > { %8571 = vst [vmem:[#allocation11_spill] sm:$0xff] %v8073_v35  ;;  %v4203_v24 = vadd.f32 %v5473_v10, %v7924_v47  ;;  %v4217_v53 = vadd.f32 %v4008_v54, %v7968_v30  ;;  %v8078_v46 = vmul.f32 %v7912_v45, %v4341_v60  ;;  %v4358_v59 = vsel %vm4262_vm1, %v4214_v15, %v4310_v3  ;;  %v5476_v26 = vpop.f32.mrf.mxu1  ;;  %v8574_v60 = vld [vmem:[#allocation3_spill] sm:$0xff] }
 0x2ea   : > { %v4338_v50 = vsel %vm4242_vm2, %v4194_v27, %v4290_v39  ;;  %v4200_v9 = vadd.f32 %v4127_v55, %v7930_v31  ;;  %v8082_v0 = vmul.f32 %v7901_v43, %v4358_v59  ;;  %v4360_v56 = vsel %vm4264_vm3, %v4216_v48, %v4312_v16  ;;  %v4014_v47 = vpop.f32.mrf.mxu0 }
 0x2eb   : > { %v8085_v35 = vmul.f32 %v7912_v45, %v4338_v50  ;;  %vm4251_vm4 = vcmp.gt.f32.partialorder %v4203_v24, 0.0  ;;  %v8088_v30 = vmul.f32 %v7899_v58, %v4360_v56  ;;  %v4299_v10 = vmul.f32 0.1, %v4203_v24  ;;  %v4137_v15 = vpop.f32.mrf.mxu1 }
 0x2ec   : > { %8572 = vst [vmem:[#allocation22_spill] sm:$0xff] %v8082_v0  ;;  %vm4265_vm5 = vcmp.gt.f32.partialorder %v4217_v53, 0.0  ;;  %v4313_v63 = vmul.f32 0.1, %v4217_v53  ;;  %vm4248_vm6 = vcmp.gt.f32.partialorder %v4200_v9, 0.0  ;;  %v4450_v31 = vsel %vm4444_vm13, %v8062_v49, 0.0  ;;  %v4018_v3 = vpop.f32.mrf.mxu0 }
 0x2ed   : > { %8573 = vst [vmem:[#allocation14_spill] sm:$0xff] %v8088_v30  ;;  %v4296_v27 = vmul.f32 0.1, %v4200_v9  ;;  %v4219_v54 = vadd.f32 %v4012_v5, %v7975_v12  ;;  %v4347_v39 = vsel %vm4251_vm4, %v4203_v24, %v4299_v10  ;;  %v4451_v48 = vadd.f32 %v4450_v31, %v7977_v29  ;;  %v5479_v59 = vpop.f32.mrf.mxu1 }
 0x2ee   : > { %v4361_v55 = vsel %vm4265_vm5, %v4217_v53, %v4313_v63  ;;  %v4209_v16 = vadd.f32 %v5476_v26, %v8574_v60  ;;  %v8096_v50 = vmul.f32 %v7912_v45, %v4347_v39  ;;  %v4020_v30 = vpop.f32.mrf.mxu0  ;;  %v4445_v53 = vsel %vm4444_vm13, %v4397_v28, 0.0 }
 0x2ef   : > { %v8099_v56 = vmul.f32 %v7901_v43, %v4361_v55  ;;  %v4344_v0 = vsel %vm4248_vm6, %v4200_v9, %v4296_v27  ;;  %vm4267_vm7 = vcmp.gt.f32.partialorder %v4219_v54, 0.0  ;;  %4452 = vadd.xlane.f32.xlu1 %v4451_v48  ;;  %v4315_v12 = vmul.f32 0.1, %v4219_v54  ;;  %v4147_v29 = vpop.f32.mrf.mxu1 }
 0x2f0   : > { %v8102_v4 = vmul.f32 %v7912_v45, %v4344_v0  ;;  %vm4257_vm8 = vcmp.gt.f32.partialorder %v4209_v16, 0.0  ;;  %v4305_v24 = vmul.f32 0.1, %v4209_v16  ;;  %v4220_v5 = vadd.f32 %v4014_v47, %v7981_v21  ;;  %v4024_v0 = vpop.f32.mrf.mxu0  ;;  %v8575_v47 = vld [vmem:[#allocation4_spill] sm:$0xff] }
 0x2f1   : > { %v4206_v26 = vadd.f32 %v4137_v15, %v7935_v23  ;;  %v4543_v10 = vmul.f32 %v4397_v28, %v4397_v28  ;;  %v4363_v63 = vsel %vm4267_vm7, %v4219_v54, %v4315_v12  ;;  %v4446_v9 = vadd.f32 %v4445_v53, %v7964_v34  ;;  %v5482_v60 = vpop.f32.mrf.mxu1 }
 0x2f2   : > { %v4353_v31 = vsel %vm4257_vm8, %v4209_v16, %v4305_v24  ;;  %v4222_v27 = vadd.f32 %v4018_v3, %v7988_v41  ;;  %v8110_v39 = vmul.f32 %v7899_v58, %v4363_v63  ;;  %vm4268_vm9 = vcmp.gt.f32.partialorder %v4220_v5, 0.0  ;;  %v4026_v24 = vpop.f32.mrf.mxu0 }
 0x2f3   : > { %v8113_v55 = vmul.f32 %v7912_v45, %v4353_v31  ;;  %v4316_v48 = vmul.f32 0.1, %v4220_v5  ;;  %4447 = vadd.xlane.f32.xlu0 %v4446_v9  ;;  %vm4254_vm10 = vcmp.gt.f32.partialorder %v4206_v26, 0.0  ;;  %v4302_v23 = vmul.f32 0.1, %v4206_v26 }
 0x2f4   : > { %v4590_v21 = vsel %vm4444_vm13, %v4543_v10, 0.0  ;;  %vm4270_vm11 = vcmp.gt.f32.partialorder %v4222_v27, 0.0  ;;  %v4318_v41 = vmul.f32 0.1, %v4222_v27  ;;  %v4215_v15 = vadd.f32 %v5479_v59, %v8575_v47  ;;  %v4157_v10 = vpop.f32.mrf.mxu1 }
 0x2f5   : > { %v4364_v28 = vsel %vm4268_vm9, %v4220_v5, %v4316_v48  ;;  %v4591_v34 = vadd.f32 %v4590_v21, %v7970_v22  ;;  %v4350_v3 = vsel %vm4254_vm10, %v4206_v26, %v4302_v23  ;;  %v4546_v16 = vmul.f32 %v8062_v49, %v8062_v49  ;;  %v8576_v23 = vld [vmem:[#allocation20_spill] sm:$0xff] }
 0x2f6   : > { %v8119_v54 = vmul.f32 %v7901_v43, %v4364_v28  ;;  %v4223_v12 = vadd.f32 %v4020_v30, %v7995_v17  ;;  %v8125_v53 = vmul.f32 %v7912_v45, %v4350_v3  ;;  %v4366_v5 = vsel %vm4270_vm11, %v4222_v27, %v4318_v41  ;;  %v4030_v28 = vpop.f32.mrf.mxu0 }
 0x2f7   : > { %4592 = vadd.xlane.f32.xlu1 %v4591_v34  ;;  %vm4263_vm12 = vcmp.gt.f32.partialorder %v4215_v15, 0.0  ;;  %v4311_v22 = vmul.f32 0.1, %v4215_v15  ;;  %v8128_v59 = vmul.f32 %v7899_v58, %v4366_v5  ;;  %v4595_v63 = vsel %vm4444_vm13, %v4546_v16, 0.0 }
 0x2f8   : > { %vm4271_vm14 = vcmp.gt.f32.partialorder %v4223_v12, 0.0  ;;  %v4319_v26 = vmul.f32 0.1, %v4223_v12  ;;  %v4596_v49 = vadd.f32 %v4595_v63, %v7983_v61  ;;  %v4212_v17 = vadd.f32 %v4147_v29, %v7942_v42  ;;  %v5485_v29 = vpop.f32.mrf.mxu1 }
 0x2f9   : > { %v4359_v31 = vsel %vm4263_vm12, %v4215_v15, %v4311_v22  ;;  %v4549_v30 = vmul.f32 %v8085_v35, %v8085_v35  ;;  %v4225_v48 = vadd.f32 %v4024_v0, %v8002_v33  ;;  %v4221_v21 = vadd.f32 %v5482_v60, %v8576_v23 }
 0x2fa   : > { %v8136_v9 = vmul.f32 %v7912_v45, %v4359_v31  ;;  %v4367_v27 = vsel %vm4271_vm14, %v4223_v12, %v4319_v26  ;;  %4597 = vadd.xlane.f32.xlu0 %v4596_v49  ;;  %vm4260_vm15 = vcmp.gt.f32.partialorder %v4212_v17, 0.0  ;;  %v4308_v61 = vmul.f32 0.1, %v4212_v17  ;;  %v4167_v31 = vpop.f32.mrf.mxu1 }
 0x2fb   : > { %v8141_v34 = vmul.f32 %v7901_v43, %v4367_v27  ;;  %v4600_v42 = vsel %vm4444_vm13, %v4549_v30, 0.0  ;;  %vm4273_vm0 = vcmp.gt.f32.partialorder %v4225_v48, 0.0  ;;  %v4321_v47 = vmul.f32 0.1, %v4225_v48 }
 0x2fc   : > { %v4601_v41 = vadd.f32 %v4600_v42, %v7997_v2  ;;  %vm4269_vm1 = vcmp.gt.f32.partialorder %v4221_v21, 0.0  ;;  %v4356_v15 = vsel %vm4260_vm15, %v4212_v17, %v4308_v61  ;;  %v4317_v3 = vmul.f32 0.1, %v4221_v21  ;;  %v4032_v2 = vpop.f32.mrf.mxu0  ;;  %v8577_v17 = vld [vmem:[#allocation7_spill] sm:$0xff] }
 0x2fd   : > { %v4460_v33 = vsel %vm4444_vm13, %v8078_v46, 0.0  ;;  %v4226_v0 = vadd.f32 %v4026_v24, %v8009_v62  ;;  %v8149_v60 = vmul.f32 %v7912_v45, %v4356_v15  ;;  %v4369_v16 = vsel %vm4273_vm0, %v4225_v48, %v4321_v47  ;;  %v8578_v15 = vld [vmem:[#allocation23_spill] sm:$0xff] }
 0x2fe   : > { %4602 = vadd.xlane.f32.xlu1 %v4601_v41  ;;  %v4461_v12 = vadd.f32 %v4460_v33, %v8004_v44  ;;  %v4218_v5 = vadd.f32 %v4157_v10, %v7953_v11  ;;  %v8154_v22 = vmul.f32 %v7899_v58, %v4369_v16  ;;  %v4365_v63 = vsel %vm4269_vm1, %v4221_v21, %v4317_v3  ;;  %v4036_v61 = vpop.f32.mrf.mxu0 }
 0x2ff   : > { %vm4274_vm2 = vcmp.gt.f32.partialorder %v4226_v0, 0.0  ;;  %v4322_v26 = vmul.f32 0.1, %v4226_v0  ;;  %v8157_v49 = vmul.f32 %v7912_v45, %v4365_v63  ;;  %v4465_v24 = vsel %vm4444_vm13, %v8102_v4, 0.0 }
 0x300   : > { %4462 = vadd.xlane.f32.xlu0 %v4461_v12  ;;  %vm4266_vm3 = vcmp.gt.f32.partialorder %v4218_v5, 0.0  ;;  %v4314_v62 = vmul.f32 0.1, %v4218_v5  ;;  %v4466_v11 = vadd.f32 %v4465_v24, %v8018_v40  ;;  %v4228_v10 = vadd.f32 %v4030_v28, %v8016_v7  ;;  %v5488_v7 = vpop.f32.mrf.mxu1  ;;  %v4038_v63 = vpop.f32.mrf.mxu0 }
 0x301   : > { %v4370_v44 = vsel %vm4274_vm2, %v4226_v0, %v4322_v26  ;;  %v4227_v30 = vadd.f32 %v5485_v29, %v8577_v17  ;;  %v4455_v23 = vsel %vm4444_vm13, %v8085_v35, 0.0  ;;  %v4229_v21 = vadd.f32 %v4032_v2, %v8023_v32 }
 0x302   : > { %v8165_v27 = vmul.f32 %v7901_v43, %v4370_v44  ;;  %v4362_v48 = vsel %vm4266_vm3, %v4218_v5, %v4314_v62  ;;  %4467 = vadd.xlane.f32.xlu1 %v4466_v11  ;;  %vm4276_vm4 = vcmp.gt.f32.partialorder %v4228_v10, 0.0  ;;  %v4324_v40 = vmul.f32 0.1, %v4228_v10 }
 0x303   : > { %v8171_v42 = vmul.f32 %v7912_v45, %v4362_v48  ;;  %vm4275_vm5 = vcmp.gt.f32.partialorder %v4227_v30, 0.0  ;;  %v4323_v28 = vmul.f32 0.1, %v4227_v30  ;;  %v4456_v29 = vadd.f32 %v4455_v23, %v7990_v25 }
 0x304   : > { %vm4277_vm6 = vcmp.gt.f32.partialorder %v4229_v21, 0.0  ;;  %v4325_v41 = vmul.f32 0.1, %v4229_v21  ;;  %v4372_v47 = vsel %vm4276_vm4, %v4228_v10, %v4324_v40  ;;  %v4224_v3 = vadd.f32 %v4167_v31, %v8578_v15 }
 0x305   : > { %v4555_v32 = vmul.f32 %v8102_v4, %v8102_v4  ;;  %v4231_v35 = vadd.f32 %v4036_v61, %v8030_v6  ;;  %v8179_v33 = vmul.f32 %v7899_v58, %v4372_v47  ;;  %v4371_v0 = vsel %vm4275_vm5, %v4227_v30, %v4323_v28  ;;  %4457 = vadd.xlane.f32.xlu0 %v4456_v29  ;;  %v4177_v4 = vpop.f32.mrf.mxu1 }
 0x306   : > { %v4373_v16 = vsel %vm4277_vm6, %v4229_v21, %v4325_v41  ;;  %v4233_v12 = vadd.f32 %v5488_v7, %v7892_v14  ;;  %v8183_v25 = vmul.f32 %v7912_v45, %v4371_v0  ;;  %vm4272_vm7 = vcmp.gt.f32.partialorder %v4224_v3, 0.0 }
 0x307   : > { %v8186_v5 = vmul.f32 %v7901_v43, %v4373_v16  ;;  %v4320_v2 = vmul.f32 0.1, %v4224_v3  ;;  %v4610_v6 = vsel %vm4444_vm13, %v4555_v32, 0.0  ;;  %vm4279_vm8 = vcmp.gt.f32.partialorder %v4231_v35, 0.0  ;;  %v8579_v32 = vld [vmem:[#allocation10_spill] sm:$0xff] }
 0x308   : > { %v4327_v26 = vmul.f32 0.1, %v4231_v35  ;;  %vm4281_vm9 = vcmp.gt.f32.partialorder %v4233_v12, 0.0  ;;  %v4611_v62 = vadd.f32 %v4610_v6, %v8025_v19  ;;  %v4329_v24 = vmul.f32 0.1, %v4233_v12 }
 0x309   : > { %v4368_v31 = vsel %vm4272_vm7, %v4224_v3, %v4320_v2  ;;  %v4552_v14 = vmul.f32 %v8078_v46, %v8078_v46  ;;  %v4232_v10 = vadd.f32 %v4038_v63, %v8037_v1  ;;  %v4230_v17 = vadd.f32 %v4177_v4, %v7897_v20 }
 0x30a   : > { %v8193_v44 = vmul.f32 %v7912_v45, %v4368_v31  ;;  %v4375_v11 = vsel %vm4279_vm8, %v4231_v35, %v4327_v26  ;;  %4612 = vadd.xlane.f32.xlu1 %v4611_v62  ;;  %v4377_v48 = vsel %vm4281_vm9, %v4233_v12, %v4329_v24  ;;  %v4475_v19 = vsel %vm4444_vm13, %v8125_v53, 0.0  ;;  %v8580_v26 = vld [vmem:[#allocation14_spill] sm:$0xff]  ;;  %v8581_v31 = vld [vmem:[#allocation11_spill] sm:$0xff] }
 0x30b   : > { %v8198_v30 = vmul.f32 %v7899_v58, %v4375_v11  ;;  %v4605_v23 = vsel %vm4444_vm13, %v4552_v14, 0.0  ;;  %v8204_v46 = vmul.f32 %v7912_v45, %v4377_v48  ;;  %vm4280_vm10 = vcmp.gt.f32.partialorder %v4232_v10, 0.0  ;;  %v8582_v62 = vld [vmem:[#allocation22_spill] sm:$0xff] }
 0x30c   : > { %v4606_v21 = vadd.f32 %v4605_v23, %v8011_v38  ;;  %v4328_v61 = vmul.f32 0.1, %v4232_v10  ;;  %vm4278_vm11 = vcmp.gt.f32.partialorder %v4230_v17, 0.0  ;;  %v4326_v1 = vmul.f32 0.1, %v4230_v17 }
 0x30d   : > { %v4476_v20 = vadd.f32 %v4475_v19, %v8048_v8  ;;  %v4470_v58 = vsel %vm4444_vm13, %v8096_v50, 0.0  ;;  %v4561_v28 = vmul.f32 %v8125_v53, %v8125_v53  ;;  %v4619_v29 = vadd.f32 %v8050_v36, %v8039_v57 }
 0x30e   : > { %4607 = vadd.xlane.f32.xlu0 %v4606_v21  ;;  %v4376_v40 = vsel %vm4280_vm10, %v4232_v10, %v4328_v61  ;;  %v4471_v7 = vadd.f32 %v4470_v58, %v8032_v18  ;;  %v4374_v41 = vsel %vm4278_vm11, %v4230_v17, %v4326_v1  ;;  %v4558_v8 = vmul.f32 %v8096_v50, %v8096_v50 }
 0x30f   : > { %v8216_v38 = vmul.f32 %v7901_v43, %v4376_v40  ;;  %4477 = vadd.xlane.f32.xlu1 %v4476_v20  ;;  %v4484_v47 = vadd.f32 %v8065_v13, %v8059_v51  ;;  %v8223_v15 = vmul.f32 %v7912_v45, %v4374_v41  ;;  %v4620_v18 = vsel %vm4444_vm13, %v4561_v28, 0.0 }
 0x310   : > { %v4485_v53 = vsel %vm4444_vm13, %v8149_v60, 0.0  ;;  %v4479_v43 = vadd.f32 %v8054_v52, %v8045_v37  ;;  %v4621_v57 = vadd.f32 %v4620_v18, %v4619_v29  ;;  %v4615_v36 = vsel %vm4444_vm13, %v4558_v8, 0.0 }
 0x311   : > { %v4486_v3 = vadd.f32 %v4485_v53, %v4484_v47  ;;  %v4480_v50 = vsel %vm4444_vm13, %v8113_v55, 0.0  ;;  %v4616_v35 = vadd.f32 %v4615_v36, %v8579_v32  ;;  %v4565_v0 = vmul.f32 %v8059_v51, %v8059_v51 }
 0x312   : > { %4472 = vadd.xlane.f32.xlu0 %v4471_v7  ;;  %v4481_v45 = vadd.f32 %v4480_v50, %v4479_v43  ;;  %v4566_v16 = vmul.f32 %v8065_v13, %v8065_v13  ;;  %v4567_v12 = vmul.f32 %v8149_v60, %v8149_v60  ;;  %v4562_v2 = vmul.f32 %v8045_v37, %v8045_v37 }
 0x313   : > { %4622 = vadd.xlane.f32.xlu1 %v4621_v57  ;;  %v4563_v63 = vmul.f32 %v8054_v52, %v8054_v52  ;;  %v4564_v4 = vmul.f32 %v8113_v55, %v8113_v55  ;;  %v4494_v51 = vadd.f32 %v8099_v56, %v8580_v26  ;;  %v4495_v13 = vsel %vm4444_vm13, %v8171_v42, 0.0 }
 0x314   : > { %v4629_v6 = vadd.f32 %v4566_v16, %v4565_v0  ;;  %v4489_v24 = vadd.f32 %v8582_v62, %v8581_v31  ;;  %v4630_v60 = vsel %vm4444_vm13, %v4567_v12, 0.0  ;;  %v4490_v52 = vsel %vm4444_vm13, %v8136_v9, 0.0 }
 0x315   : > { %v4624_v14 = vadd.f32 %v4563_v63, %v4562_v2  ;;  %v4625_v37 = vsel %vm4444_vm13, %v4564_v4, 0.0  ;;  %v4496_v11 = vadd.f32 %v4495_v13, %v4494_v51  ;;  %v4571_v17 = vmul.f32 %v8580_v26, %v8580_v26 }
 0x316   : > { %4617 = vadd.xlane.f32.xlu0 %v4616_v35  ;;  %v4631_v55 = vadd.f32 %v4630_v60, %v4629_v6  ;;  %v4491_v10 = vadd.f32 %v4490_v52, %v4489_v24  ;;  %v4572_v23 = vmul.f32 %v8099_v56, %v8099_v56  ;;  %v4573_v19 = vmul.f32 %v8171_v42, %v8171_v42 }
 0x317   : > { %4487 = vadd.xlane.f32.xlu1 %v4486_v3  ;;  %v4626_v48 = vadd.f32 %v4625_v37, %v4624_v14  ;;  %v4568_v21 = vmul.f32 %v8581_v31, %v8581_v31  ;;  %v4569_v61 = vmul.f32 %v8582_v62, %v8582_v62  ;;  %v4570_v1 = vmul.f32 %v8136_v9, %v8136_v9 }
 0x318   : > { %v4504_v20 = vadd.f32 %v8141_v34, %v8128_v59  ;;  %v4505_v58 = vsel %vm4444_vm13, %v8193_v44, 0.0  ;;  %v4639_v40 = vadd.f32 %v4572_v23, %v4571_v17  ;;  %v4640_v56 = vsel %vm4444_vm13, %v4573_v19, 0.0 }
 0x319   : > { %v4499_v42 = vadd.f32 %v8119_v54, %v8110_v39  ;;  %v4500_v7 = vsel %vm4444_vm13, %v8157_v49, 0.0  ;;  %v4634_v28 = vadd.f32 %v4569_v61, %v4568_v21  ;;  %v4635_v29 = vsel %vm4444_vm13, %v4570_v1, 0.0 }
 0x31a   : > { %4482 = vadd.xlane.f32.xlu0 %v4481_v45  ;;  %v4506_v9 = vadd.f32 %v4505_v58, %v4504_v20  ;;  %v4577_v41 = vmul.f32 %v8128_v59, %v8128_v59  ;;  %v4641_v8 = vadd.f32 %v4640_v56, %v4639_v40  ;;  %v4578_v18 = vmul.f32 %v8141_v34, %v8141_v34 }
 0x31b   : > { %4632 = vadd.xlane.f32.xlu1 %v4631_v55  ;;  %v4501_v47 = vadd.f32 %v4500_v7, %v4499_v42  ;;  %v4579_v53 = vmul.f32 %v8193_v44, %v8193_v44  ;;  %v4636_v43 = vadd.f32 %v4635_v29, %v4634_v28  ;;  %v4574_v57 = vmul.f32 %v8110_v39, %v8110_v39 }
 0x31c   : > { %v4575_v36 = vmul.f32 %v8119_v54, %v8119_v54  ;;  %v4576_v3 = vmul.f32 %v8157_v49, %v8157_v49  ;;  %v4649_v59 = vadd.f32 %v4578_v18, %v4577_v41  ;;  %v4514_v32 = vadd.f32 %v8186_v5, %v8179_v33 }
 0x31d   : > { %v4650_v50 = vsel %vm4444_vm13, %v4579_v53, 0.0  ;;  %v4515_v34 = vsel %vm4444_vm13, %v8223_v15, 0.0  ;;  %v4509_v39 = vadd.f32 %v8165_v27, %v8154_v22  ;;  %v4510_v54 = vsel %vm4444_vm13, %v8183_v25, 0.0 }
 0x31e   : > { %4627 = vadd.xlane.f32.xlu0 %v4626_v48  ;;  %v4644_v44 = vadd.f32 %v4575_v36, %v4574_v57  ;;  %v4645_v35 = vsel %vm4444_vm13, %v4576_v3, 0.0  ;;  %v4651_v49 = vadd.f32 %v4650_v50, %v4649_v59  ;;  %v4516_v45 = vadd.f32 %v4515_v34, %v4514_v32 }
 0x31f   : > { %4497 = vadd.xlane.f32.xlu1 %v4496_v11  ;;  %v4583_v0 = vmul.f32 %v8179_v33, %v8179_v33  ;;  %v4584_v16 = vmul.f32 %v8186_v5, %v8186_v5  ;;  %v4511_v2 = vadd.f32 %v4510_v54, %v4509_v39  ;;  %v4585_v63 = vmul.f32 %v8223_v15, %v8223_v15 }
 0x320   : > { %v4646_v12 = vadd.f32 %v4645_v35, %v4644_v44  ;;  %v4580_v4 = vmul.f32 %v8154_v22, %v8154_v22  ;;  %v4581_v26 = vmul.f32 %v8165_v27, %v8165_v27  ;;  %v4582_v51 = vmul.f32 %v8183_v25, %v8183_v25 }
 0x321   : > { %v4659_v6 = vadd.f32 %v4584_v16, %v4583_v0  ;;  %v4519_v33 = vadd.f32 %v8216_v38, %v8198_v30  ;;  %v4660_v5 = vsel %vm4444_vm13, %v4585_v63, 0.0  ;;  %v4520_v13 = vsel %vm4444_vm13, %v8204_v46, 0.0 }
 0x322   : > { %4492 = vadd.xlane.f32.xlu0 %v4491_v10  ;;  %v4586_v15 = vmul.f32 %v8198_v30, %v8198_v30  ;;  %v4587_v22 = vmul.f32 %v8216_v38, %v8216_v38  ;;  %v4654_v31 = vadd.f32 %v4581_v26, %v4580_v4  ;;  %v4655_v25 = vsel %vm4444_vm13, %v4582_v51, 0.0 }
 0x323   : > { %4642 = vadd.xlane.f32.xlu1 %v4641_v8  ;;  %v4661_v27 = vadd.f32 %v4660_v5, %v4659_v6  ;;  %v4521_v62 = vadd.f32 %v4520_v13, %v4519_v33  ;;  %v4588_v24 = vmul.f32 %v8204_v46, %v8204_v46 }
 0x324   : > { %v4664_v60 = vadd.f32 %v4587_v22, %v4586_v15  ;;  %v4656_v14 = vadd.f32 %v4655_v25, %v4654_v31 }
 0x325   : > { %v4665_v37 = vsel %vm4444_vm13, %v4588_v24, 0.0  ;;  %vm4524_vm13 = vcmask 7168  }
 0x326   : > { %4637 = vadd.xlane.f32.xlu0 %v4636_v43  ;;  %v4666_v30 = vadd.f32 %v4665_v37, %v4664_v60 }
 0x327   : > { %4507 = vadd.xlane.f32.xlu1 %v4506_v9 }
 0x32a   : > { %4502 = vadd.xlane.f32.xlu0 %v4501_v47 }
 0x32b   : > { %4652 = vadd.xlane.f32.xlu1 %v4651_v49 }
 0x32e   : > { %4647 = vadd.xlane.f32.xlu0 %v4646_v12 }
 0x32f   : > { %4517 = vadd.xlane.f32.xlu1 %v4516_v45 }
 0x332   : > { %4512 = vadd.xlane.f32.xlu0 %v4511_v2 }
 0x333   : > { %4662 = vadd.xlane.f32.xlu1 %v4661_v27 }
 0x336   : > { %4657 = vadd.xlane.f32.xlu0 %v4656_v14 }
 0x33a   : > { %4522 = vadd.xlane.f32.xlu0 %v4521_v62 }
 0x33e   : > { %4667 = vadd.xlane.f32.xlu0 %v4666_v30 }
 0x378   : > { %v4453_v46 = vpop.xlane.xlu1 %4452 }
 0x379   : > { %4526 = vst.msk [vmem:[%s8329_s24 + $0x8] sm:$0xff] %vm4524_vm13, %v4453_v46 }
 0x37c   : > { %v4448_v38 = vpop.xlane.xlu0 %4447 }
 0x37d   : > { %4525 = vst.msk [vmem:[%s8329_s24] sm:$0xff] %vm4524_vm13, %v4448_v38 }
 0x380   : > { %v4593_v52 = vpop.xlane.xlu1 %4592 }
 0x381   : > { %4669 = vst.msk [vmem:[%s8336_s10] sm:$0xff] %vm4524_vm13, %v4593_v52 }
 0x383   : > { %v4598_v55 = vpop.xlane.xlu0 %4597 }
 0x384   : > { %4670 = vst.msk [vmem:[%s8336_s10 + $0x8] sm:$0xff] %vm4524_vm13, %v4598_v55 }
 0x387   : > { %v4603_v11 = vpop.xlane.xlu1 %4602 }
 0x388   : > { %4671 = vst.msk [vmem:[%s8336_s10 + $0x10] sm:$0xff] %vm4524_vm13, %v4603_v11 }
 0x389   : > { %v4463_v10 = vpop.xlane.xlu0 %4462 }
 0x38a   : > { %4528 = vst.msk [vmem:[%s8329_s24 + $0x18] sm:$0xff] %vm4524_vm13, %v4463_v10 }
 0x38b   : > { %v4468_v17 = vpop.xlane.xlu1 %4467 }
 0x38c   : > { %4529 = vst.msk [vmem:[%s8329_s24 + $0x20] sm:$0xff] %vm4524_vm13, %v4468_v17 }
 0x38e   : > { %v4458_v48 = vpop.xlane.xlu0 %4457 }
 0x38f   : > { %4527 = vst.msk [vmem:[%s8329_s24 + $0x10] sm:$0xff] %vm4524_vm13, %v4458_v48 }
 0x393   : > { %v4613_v23 = vpop.xlane.xlu1 %4612 }
 0x394   : > { %4673 = vst.msk [vmem:[%s8336_s10 + $0x20] sm:$0xff] %vm4524_vm13, %v4613_v23 }
 0x397   : > { %v4608_v19 = vpop.xlane.xlu0 %4607 }
 0x398   : > { %4672 = vst.msk [vmem:[%s8336_s10 + $0x18] sm:$0xff] %vm4524_vm13, %v4608_v19  ;;  %v4478_v21 = vpop.xlane.xlu1 %4477 }
 0x399   : > { %4531 = vst.msk [vmem:[%s8329_s24 + $0x30] sm:$0xff] %vm4524_vm13, %v4478_v21 }
 0x39b   : > { %v4473_v61 = vpop.xlane.xlu0 %4472 }
 0x39c   : > { %4530 = vst.msk [vmem:[%s8329_s24 + $0x28] sm:$0xff] %vm4524_vm13, %v4473_v61  ;;  %v4623_v1 = vpop.xlane.xlu1 %4622 }
 0x39d   : > { %4675 = vst.msk [vmem:[%s8336_s10 + $0x30] sm:$0xff] %vm4524_vm13, %v4623_v1 }
 0x39f   : > { %v4618_v20 = vpop.xlane.xlu0 %4617 }
 0x3a0   : > { %4674 = vst.msk [vmem:[%s8336_s10 + $0x28] sm:$0xff] %vm4524_vm13, %v4618_v20  ;;  %v4488_v58 = vpop.xlane.xlu1 %4487 }
 0x3a1   : > { %4533 = vst.msk [vmem:[%s8329_s24 + $0x40] sm:$0xff] %vm4524_vm13, %v4488_v58 }
 0x3a3   : > { %v4483_v40 = vpop.xlane.xlu0 %4482 }
 0x3a4   : > { %4532 = vst.msk [vmem:[%s8329_s24 + $0x38] sm:$0xff] %vm4524_vm13, %v4483_v40  ;;  %v4633_v56 = vpop.xlane.xlu1 %4632 }
 0x3a5   : > { %4677 = vst.msk [vmem:[%s8336_s10 + $0x40] sm:$0xff] %vm4524_vm13, %v4633_v56 }
 0x3a7   : > { %v4628_v42 = vpop.xlane.xlu0 %4627 }
 0x3a8   : > { %4676 = vst.msk [vmem:[%s8336_s10 + $0x38] sm:$0xff] %vm4524_vm13, %v4628_v42  ;;  %v4498_v7 = vpop.xlane.xlu1 %4497 }
 0x3a9   : > { %4535 = vst.msk [vmem:[%s8329_s24 + $0x50] sm:$0xff] %vm4524_vm13, %v4498_v7 }
 0x3ab   : > { %v4493_v28 = vpop.xlane.xlu0 %4492 }
 0x3ac   : > { %4534 = vst.msk [vmem:[%s8329_s24 + $0x48] sm:$0xff] %vm4524_vm13, %v4493_v28  ;;  %v4643_v29 = vpop.xlane.xlu1 %4642 }
 0x3ad   : > { %4679 = vst.msk [vmem:[%s8336_s10 + $0x50] sm:$0xff] %vm4524_vm13, %v4643_v29 }
 0x3af   : > { %v4638_v9 = vpop.xlane.xlu0 %4637 }
 0x3b0   : > { %4678 = vst.msk [vmem:[%s8336_s10 + $0x48] sm:$0xff] %vm4524_vm13, %v4638_v9  ;;  %v4508_v41 = vpop.xlane.xlu1 %4507 }
 0x3b1   : > { %4537 = vst.msk [vmem:[%s8329_s24 + $0x60] sm:$0xff] %vm4524_vm13, %v4508_v41 }
 0x3b3   : > { %v4503_v8 = vpop.xlane.xlu0 %4502 }
 0x3b4   : > { %4536 = vst.msk [vmem:[%s8329_s24 + $0x58] sm:$0xff] %vm4524_vm13, %v4503_v8  ;;  %v4653_v47 = vpop.xlane.xlu1 %4652 }
 0x3b5   : > { %4681 = vst.msk [vmem:[%s8336_s10 + $0x60] sm:$0xff] %vm4524_vm13, %v4653_v47 }
 0x3b7   : > { %v4648_v18 = vpop.xlane.xlu0 %4647 }
 0x3b8   : > { %4680 = vst.msk [vmem:[%s8336_s10 + $0x58] sm:$0xff] %vm4524_vm13, %v4648_v18  ;;  %v4518_v53 = vpop.xlane.xlu1 %4517 }
 0x3b9   : > { %4539 = vst.msk [vmem:[%s8329_s24 + $0x70] sm:$0xff] %vm4524_vm13, %v4518_v53 }
 0x3bb   : > { %v4513_v43 = vpop.xlane.xlu0 %4512 }
 0x3bc   : > { %4538 = vst.msk [vmem:[%s8329_s24 + $0x68] sm:$0xff] %vm4524_vm13, %v4513_v43  ;;  %v4663_v57 = vpop.xlane.xlu1 %4662 }
 0x3bd   : > { %4683 = vst.msk [vmem:[%s8336_s10 + $0x70] sm:$0xff] %vm4524_vm13, %v4663_v57 }
 0x3bf   : > { %v4658_v36 = vpop.xlane.xlu0 %4657 }
 0x3c0   : > { %4682 = vst.msk [vmem:[%s8336_s10 + $0x68] sm:$0xff] %vm4524_vm13, %v4658_v36 }
 0x3c3   : > { %v4523_v3 = vpop.xlane.xlu0 %4522 }
 0x3c4   : > { %4540 = vst.msk [vmem:[%s8329_s24 + $0x78] sm:$0xff] %vm4524_vm13, %v4523_v3 }
 0x3c7   : > { %v4668_v59 = vpop.xlane.xlu0 %4667 }
 0x3c8   : > { %4684 = vst.msk [vmem:[%s8336_s10 + $0x78] sm:$0xff] %vm4524_vm13, %v4668_v59 }
 0x3c9 PF: > { %s15_s15 = sadd.s32 1, %s5523_s15  }
 0x3ca   : > { %p12_p4 = scmp.ge.s32.totalorder %s15_s15, 4  }
 0x3cc   :  { %14 = sbr.rel (!%p12_p4) target bundleno = 1 (0x1), region = 74 }

</bundles_post_ra>
